<compile_context>
chip_gen: v6e
topology: v6e:2x2x1
jax: 0.10.0
libtpu: 0.0.40
codegen_flags: <defaults>
</compile_context>

<pallas_src>
import jax
import jax.numpy as jnp
from jax import lax
from jax.experimental import pallas as pl
from jax.experimental.pallas import tpu as pltpu


# ------------------------------- Pallas kernels ------------------------------

def _input_proj_kernel(x_ref, w_ref, b_ref, out_ref):
    """Hoisted layer-0 input projection: (T*B, D) @ (D, 4H) + folded bias, bf16 MXU."""
    out_ref[...] = (
        jnp.dot(x_ref[...].astype(jnp.bfloat16), w_ref[...],
                preferred_element_type=jnp.float32)
        + b_ref[...])


def _make_stack_fc_kernel(num_layers, tt):
    """Fused multi-layer LSTM recurrence + final Linear.

    Ref order: xg0, whh_0, [wih_l, whh_l, bias_l for l=1..L-1], fc_w, fc_b,
               out, h_scratch, c_scratch.
    """

    def kernel(*refs):
        it = iter(refs)
        xg0_ref = next(it)                       # (TT, 4, B, H) f32, gate-major
        whh_refs = [next(it)]                    # each (4, H, H) bf16
        wih_refs = [None]
        b_refs = [None]
        for _ in range(1, num_layers):
            wih_refs.append(next(it))            # (4, H, H) bf16
            whh_refs.append(next(it))            # (4, H, H) bf16
            b_refs.append(next(it))              # (4, 1, H) f32
        fc_w_ref = next(it)                      # (H, O) bf16
        fc_b_ref = next(it)                      # (1, O) f32
        out_ref = next(it)                       # (B, O) f32
        h_scr = next(it)                         # (L, B, H) f32
        c_scr = next(it)                         # (L, B, H) f32

        tb = pl.program_id(0)

        @pl.when(tb == 0)
        def _init():
            h_scr[...] = jnp.zeros_like(h_scr)
            c_scr[...] = jnp.zeros_like(c_scr)

        def cell(pre, c):
            i = jax.nn.sigmoid(pre[0])
            f = jax.nn.sigmoid(pre[1])
            g = jnp.tanh(pre[2])
            o = jax.nn.sigmoid(pre[3])
            c_new = f * c + i * g
            h_new = o * jnp.tanh(c_new)
            return h_new, c_new

        def timestep(ld, carry):
            # ---- layer 0: x @ W_ih + bias already hoisted out of the loop ----
            xg_t = xg0_ref[ld]                   # (4, B, H) f32
            h0 = h_scr[0]
            c0 = c_scr[0]
            h0b = h0.astype(jnp.bfloat16)
            pre = [xg_t[g] + jnp.dot(h0b, whh_refs[0][g],
                                     preferred_element_type=jnp.float32)
                   for g in range(4)]
            h_new, c_new = cell(pre, c0)
            h_scr[0] = h_new
            c_scr[0] = c_new
            x_in = h_new
            # ---- layers 1..L-1 (their input projection depends on layer l-1's h) ----
            for l in range(1, num_layers):
                hl = h_scr[l]
                cl = c_scr[l]
                xb = x_in.astype(jnp.bfloat16)
                hb = hl.astype(jnp.bfloat16)
                pre = [jnp.dot(xb, wih_refs[l][g],
                               preferred_element_type=jnp.float32)
                       + jnp.dot(hb, whh_refs[l][g],
                                 preferred_element_type=jnp.float32)
                       + b_refs[l][g]
                       for g in range(4)]
                h_new, c_new = cell(pre, cl)
                h_scr[l] = h_new
                c_scr[l] = c_new
                x_in = h_new
            return carry

        lax.fori_loop(0, tt, timestep, 0, unroll=True)

        # Fused FC on the last hidden state of the last layer (== out[:, -1, :] @ W^T + b).
        @pl.when(tb == pl.num_programs(0) - 1)
        def _finalize():
            h_last = h_scr[num_layers - 1].astype(jnp.bfloat16)
            out_ref[...] = (jnp.dot(h_last, fc_w_ref[...],
                                    preferred_element_type=jnp.float32)
                            + fc_b_ref[...])

    return kernel


# ------------------------------- wrappers ------------------------------------

def input_projection(x2d, w_t_bf16, bias):
    """x2d: (N, D) f32; w: (D, 4H) bf16; bias: (1, 4H) f32 -> (N, 4H) f32."""
    N, D = x2d.shape
    F = w_t_bf16.shape[1]
    return pl.pallas_call(
        _input_proj_kernel,
        out_shape=jax.ShapeDtypeStruct((N, F), jnp.float32),
        in_specs=[
            pl.BlockSpec((N, D), lambda: (0, 0)),
            pl.BlockSpec((D, F), lambda: (0, 0)),
            pl.BlockSpec((1, F), lambda: (0, 0)),
        ],
        out_specs=pl.BlockSpec((N, F), lambda: (0, 0)),
    )(x2d, w_t_bf16, bias)


def lstm_stack_fc(xg0, layers, fc_w_t, fc_b, *, tt):
    """xg0: (T, 4, B, H) precomputed layer-0 gates; returns (B, O)."""
    T, _, B, H = xg0.shape
    L = len(layers)
    O = fc_w_t.shape[1]
    assert T % tt == 0

    inputs = [xg0, layers[0]["whh_g"]]
    in_specs = [
        pl.BlockSpec((tt, 4, B, H), lambda t: (t, 0, 0, 0)),
        pl.BlockSpec((4, H, H), lambda t: (0, 0, 0)),
    ]
    for lp in layers[1:]:
        inputs += [lp["wih_g"], lp["whh_g"], lp["bias_g"]]
        in_specs += [
            pl.BlockSpec((4, H, H), lambda t: (0, 0, 0)),
            pl.BlockSpec((4, H, H), lambda t: (0, 0, 0)),
            pl.BlockSpec((4, 1, H), lambda t: (0, 0, 0)),
        ]
    inputs += [fc_w_t, fc_b]
    in_specs += [
        pl.BlockSpec((H, O), lambda t: (0, 0)),
        pl.BlockSpec((1, O), lambda t: (0, 0)),
    ]

    return pl.pallas_call(
        _make_stack_fc_kernel(L, tt),
        out_shape=jax.ShapeDtypeStruct((B, O), jnp.float32),
        grid=(T // tt,),
        in_specs=in_specs,
        out_specs=pl.BlockSpec((B, O), lambda t: (0, 0)),
        scratch_shapes=[
            pltpu.VMEM((L, B, H), jnp.float32),   # h state for all layers
            pltpu.VMEM((L, B, H), jnp.float32),   # c state for all layers
        ],
        compiler_params=pltpu.CompilerParams(
            dimension_semantics=("arbitrary",)),  # time is a serial recurrence
    )(*inputs)


def _time_block(T, max_tt=8):
    """Largest divisor of T that is <= max_tt (timesteps per grid step)."""
    tt = min(T, max_tt)
    while T % tt:
        tt -= 1
    return tt


def init_params(key, input_dim, hidden_dim, layer_dim, output_dim):
    """PyTorch-like init U(-1/sqrt(H), 1/sqrt(H)); weights stored bf16 gate-major."""
    H = hidden_dim
    bound = float(H) ** -0.5
    layers = []
    for l in range(layer_dim):
        d_in = input_dim if l == 0 else H
        key, k1, k2, k3, k4 = jax.random.split(key, 5)
        w_ih = jax.random.uniform(k1, (4 * H, d_in), jnp.float32, -bound, bound)
        w_hh = jax.random.uniform(k2, (4 * H, H), jnp.float32, -bound, bound)
        b_ih = jax.random.uniform(k3, (4 * H,), jnp.float32, -bound, bound)
        b_hh = jax.random.uniform(k4, (4 * H,), jnp.float32, -bound, bound)
        bias = b_ih + b_hh                                            # fold the two biases
        whh_g = w_hh.reshape(4, H, H).transpose(0, 2, 1).astype(jnp.bfloat16)  # (4, Hin, Hout)
        if l == 0:
            layers.append({
                "w_ih_t": w_ih.T.astype(jnp.bfloat16),                # (D, 4H)
                "bias_flat": bias[None, :],                           # (1, 4H) f32
                "whh_g": whh_g,                                       # (4, H, H)
            })
        else:
            layers.append({
                "wih_g": w_ih.reshape(4, H, H).transpose(0, 2, 1).astype(jnp.bfloat16),
                "whh_g": whh_g,
                "bias_g": bias.reshape(4, 1, H),                      # (4, 1, H) f32
            })
    key, k1, k2 = jax.random.split(key, 3)
    w_fc = jax.random.uniform(k1, (output_dim, H), jnp.float32, -bound, bound)
    b_fc = jax.random.uniform(k2, (output_dim,), jnp.float32, -bound, bound)
    return {"layers": layers,
            "fc_w_t": w_fc.T.astype(jnp.bfloat16),                    # (H, O)
            "fc_b": b_fc[None, :]}                                    # (1, O)


@jax.jit
def lstm_model_forward(params, x_btd):
    """x_btd: (B, T, D) batch_first, like the PyTorch module. Returns (B, O)."""
    layers = params["layers"]
    H = layers[0]["whh_g"].shape[-1]
    x = jnp.transpose(x_btd, (1, 0, 2)).astype(jnp.float32)           # (T, B, D)
    T, B, D = x.shape
    # Hoisted layer-0 input projection: one (T*B, D) @ (D, 4H) matmul (Pallas kernel),
    # then wrapper-side layout plumbing to the gate-major (T, 4, B, H) slab.
    xg2d = input_projection(x.reshape(T * B, D),
                            layers[0]["w_ih_t"], layers[0]["bias_flat"])   # (T*B, 4H)
    xg0 = xg2d.reshape(T, B, 4, H).transpose(0, 2, 1, 3)              # (T, 4, B, H)
    tt = _time_block(T)
    return lstm_stack_fc(xg0, layers, params["fc_w_t"], params["fc_b"], tt=tt)


# ------------------------------- reference (pure JAX) -------------------------

def _reference_forward(params, x_btd):
    """Same math / same bf16 operand casts, written step-by-step in plain JAX."""
    layers = params["layers"]
    L = len(layers)
    H = layers[0]["whh_g"].shape[-1]
    x = jnp.transpose(x_btd, (1, 0, 2)).astype(jnp.float32)           # (T, B, D)
    T, B, _ = x.shape
    h = [jnp.zeros((B, H), jnp.float32) for _ in range(L)]
    c = [jnp.zeros((B, H), jnp.float32) for _ in range(L)]

    def cell(pre, cc):
        i = jax.nn.sigmoid(pre[0])
        f = jax.nn.sigmoid(pre[1])
        g = jnp.tanh(pre[2])
        o = jax.nn.sigmoid(pre[3])
        cn = f * cc + i * g
        hn = o * jnp.tanh(cn)
        return hn, cn

    for t in range(T):
        xt = x[t]
        xg = (jnp.dot(xt.astype(jnp.bfloat16), layers[0]["w_ih_t"],
                      preferred_element_type=jnp.float32)
              + layers[0]["bias_flat"])                               # (B, 4H)
        pre = [xg[:, g * H:(g + 1) * H]
               + jnp.dot(h[0].astype(jnp.bfloat16), layers[0]["whh_g"][g],
                         preferred_element_type=jnp.float32)
               for g in range(4)]
        h[0], c[0] = cell(pre, c[0])
        x_in = h[0]
        for l in range(1, L):
            pre = [jnp.dot(x_in.astype(jnp.bfloat16), layers[l]["wih_g"][g],
                           preferred_element_type=jnp.float32)
                   + jnp.dot(h[l].astype(jnp.bfloat16), layers[l]["whh_g"][g],
                             preferred_element_type=jnp.float32)
                   + layers[l]["bias_g"][g]
                   for g in range(4)]
            h[l], c[l] = cell(pre, c[l])
            x_in = h[l]
    return (jnp.dot(h[L - 1].astype(jnp.bfloat16), params["fc_w_t"],
                    preferred_element_type=jnp.float32)
            + params["fc_b"])


# ------------------------------- main -----------------------------------------

if __name__ == "__main__":
    input_dim, hidden_dim, layer_dim, output_dim = 16, 32, 2, 4
    batch, seq = 2, 8

    key = jax.random.PRNGKey(0)
    k_param, k_x = jax.random.split(key)
    params = init_params(k_param, input_dim, hidden_dim, layer_dim, output_dim)
    x = jax.random.normal(k_x, (batch, seq, input_dim), jnp.float32)   # (B, T, D)

    out = lstm_model_forward(params, x)
    out = jax.block_until_ready(out)

    ref = _reference_forward(params, x)
    assert out.shape == (batch, output_dim)
    assert jnp.allclose(out, ref, atol=5e-3, rtol=5e-3), "mismatch vs reference"

    print("KERNEL_OK")
</pallas_src>

<mosaic_0001>
module attributes {stable_mosaic.version = 11 : i64} {
  func.func @_input_proj_kernel(%arg0: memref<16x16xf32, #tpu.memory_space<vmem>>, %arg1: memref<16x128xbf16, #tpu.memory_space<vmem>>, %arg2: memref<1x128xf32, #tpu.memory_space<vmem>>, %arg3: memref<16x128xf32, #tpu.memory_space<vmem>>) attributes {dimension_semantics = [], scalar_prefetch = 0 : i64, scratch_operands = 0 : i64, tpu.core_type = #tpu.core_type<tc>} {
    %c0 = arith.constant 0 : index
    %c0_0 = arith.constant 0 : index
    %0 = vector.load %arg0[%c0, %c0_0] : memref<16x16xf32, #tpu.memory_space<vmem>>, vector<16x16xf32>
    %1 = arith.truncf %0 : vector<16x16xf32> to vector<16x16xbf16>
    %c0_1 = arith.constant 0 : index
    %c0_2 = arith.constant 0 : index
    %2 = vector.load %arg1[%c0_1, %c0_2] : memref<16x128xbf16, #tpu.memory_space<vmem>>, vector<16x128xbf16>
    %cst = arith.constant dense<0.000000e+00> : vector<16x128xf32>
    %3 = tpu.matmul %1, %2, %cst {dimension_numbers = #tpu.dot_dimension_numbers<[1], [0], [0], [1], [0, 0, 1, 1], [], []>} : vector<16x16xbf16>, vector<16x128xbf16>, vector<16x128xf32> -> vector<16x128xf32>
    %c0_3 = arith.constant 0 : index
    %c0_4 = arith.constant 0 : index
    %4 = vector.load %arg2[%c0_3, %c0_4] : memref<1x128xf32, #tpu.memory_space<vmem>>, vector<1x128xf32>
    %5 = vector.broadcast %4 : vector<1x128xf32> to vector<16x128xf32>
    %6 = arith.addf %3, %5 : vector<16x128xf32>
    %c0_5 = arith.constant 0 : index
    %c0_6 = arith.constant 0 : index
    %7 = vector.load %arg3[%c0_5, %c0_6] : memref<16x128xf32, #tpu.memory_space<vmem>>, vector<16x128xf32>
    tpu.vector_store %arg3[%c0_5, %c0_6], %6 {strides = array<i32>} : memref<16x128xf32, #tpu.memory_space<vmem>>, vector<16x128xf32>,
    return
  }
}

module attributes {stable_mosaic.version = 11 : i64} {
  func.func @kernel(%arg0: i32, %arg1: memref<8x4x2x32xf32, #tpu.memory_space<vmem>>, %arg2: memref<4x32x32xbf16, #tpu.memory_space<vmem>>, %arg3: memref<4x32x32xbf16, #tpu.memory_space<vmem>>, %arg4: memref<4x32x32xbf16, #tpu.memory_space<vmem>>, %arg5: memref<4x1x32xf32, #tpu.memory_space<vmem>>, %arg6: memref<32x4xbf16, #tpu.memory_space<vmem>>, %arg7: memref<1x4xf32, #tpu.memory_space<vmem>>, %arg8: memref<2x4xf32, #tpu.memory_space<vmem>>, %arg9: memref<2x2x32xf32, #tpu.memory_space<vmem>>, %arg10: memref<2x2x32xf32, #tpu.memory_space<vmem>>) attributes {dimension_semantics = [#tpu.dimension_semantics<arbitrary>], iteration_bounds = array<i64: 1>, scalar_prefetch = 0 : i64, scratch_operands = 2 : i64, tpu.core_type = #tpu.core_type<tc>, window_params = [{transform_indices = @transform_0, window_bounds = array<i64: 8, 4, 2, 32>}, {pipeline_mode = #tpu.pipeline_mode<synchronous>, transform_indices = @transform_1, window_bounds = array<i64: 4, 32, 32>}, {pipeline_mode = #tpu.pipeline_mode<synchronous>, transform_indices = @transform_2, window_bounds = array<i64: 4, 32, 32>}, {pipeline_mode = #tpu.pipeline_mode<synchronous>, transform_indices = @transform_3, window_bounds = array<i64: 4, 32, 32>}, {pipeline_mode = #tpu.pipeline_mode<synchronous>, transform_indices = @transform_4, window_bounds = array<i64: 4, 1, 32>}, {pipeline_mode = #tpu.pipeline_mode<synchronous>, transform_indices = @transform_5, window_bounds = array<i64: 32, 4>}, {pipeline_mode = #tpu.pipeline_mode<synchronous>, transform_indices = @transform_6, window_bounds = array<i64: 1, 4>}, {pipeline_mode = #tpu.pipeline_mode<synchronous>, transform_indices = @transform_7, window_bounds = array<i64: 2, 4>}]} {
    %c0_i32 = arith.constant 0 : i32
    %0 = arith.cmpi eq, %arg0, %c0_i32 : i32
    %1 = arith.extui %0 : i1 to i32
    %c0_i32_0 = arith.constant 0 : i32
    %2 = arith.cmpi ne, %1, %c0_i32_0 : i32
    scf.if %2 {
      %cst_743 = arith.constant 0.000000e+00 : f32
      %1094 = vector.broadcast %cst_743 : f32 to vector<2x2x32xf32>
      %c0_744 = arith.constant 0 : index
      %c0_745 = arith.constant 0 : index
      %c0_746 = arith.constant 0 : index
      %1095 = vector.load %arg9[%c0_744, %c0_745, %c0_746] : memref<2x2x32xf32, #tpu.memory_space<vmem>>, vector<2x2x32xf32>
      tpu.vector_store %arg9[%c0_744, %c0_745, %c0_746], %1094 {strides = array<i32>} : memref<2x2x32xf32, #tpu.memory_space<vmem>>, vector<2x2x32xf32>,
      %cst_747 = arith.constant 0.000000e+00 : f32
      %1096 = vector.broadcast %cst_747 : f32 to vector<2x2x32xf32>
      %c0_748 = arith.constant 0 : index
      %c0_749 = arith.constant 0 : index
      %c0_750 = arith.constant 0 : index
      %1097 = vector.load %arg10[%c0_748, %c0_749, %c0_750] : memref<2x2x32xf32, #tpu.memory_space<vmem>>, vector<2x2x32xf32>
      tpu.vector_store %arg10[%c0_748, %c0_749, %c0_750], %1096 {strides = array<i32>} : memref<2x2x32xf32, #tpu.memory_space<vmem>>, vector<2x2x32xf32>,
    } else {
    }
    %c0_i32_1 = arith.constant 0 : i32
    %3 = arith.index_cast %c0_i32_1 : i32 to index
    %c0 = arith.constant 0 : index
    %c0_2 = arith.constant 0 : index
    %c0_3 = arith.constant 0 : index
    %4 = vector.load %arg1[%3, %c0, %c0_2, %c0_3] : memref<8x4x2x32xf32, #tpu.memory_space<vmem>>, vector<1x4x2x32xf32>
    %5 = vector.shape_cast %4 : vector<1x4x2x32xf32> to vector<4x2x32xf32>
    %c0_4 = arith.constant 0 : index
    %c0_5 = arith.constant 0 : index
    %c0_6 = arith.constant 0 : index
    %6 = vector.load %arg9[%c0_4, %c0_5, %c0_6] : memref<2x2x32xf32, #tpu.memory_space<vmem>>, vector<1x2x32xf32>
    %7 = vector.shape_cast %6 : vector<1x2x32xf32> to vector<2x32xf32>
    %c0_7 = arith.constant 0 : index
    %c0_8 = arith.constant 0 : index
    %c0_9 = arith.constant 0 : index
    %8 = vector.load %arg10[%c0_7, %c0_8, %c0_9] : memref<2x2x32xf32, #tpu.memory_space<vmem>>, vector<1x2x32xf32>
    %9 = vector.shape_cast %8 : vector<1x2x32xf32> to vector<2x32xf32>
    %10 = arith.truncf %7 : vector<2x32xf32> to vector<2x32xbf16>
    %11 = vector.extract_strided_slice %5 {offsets = [0, 0, 0], sizes = [1, 2, 32], strides = [1, 1, 1]} : vector<4x2x32xf32> to vector<1x2x32xf32>
    %12 = vector.shape_cast %11 : vector<1x2x32xf32> to vector<2x32xf32>
    %c0_10 = arith.constant 0 : index
    %c0_11 = arith.constant 0 : index
    %c0_12 = arith.constant 0 : index
    %13 = vector.load %arg2[%c0_10, %c0_11, %c0_12] : memref<4x32x32xbf16, #tpu.memory_space<vmem>>, vector<1x32x32xbf16>
    %14 = vector.shape_cast %13 : vector<1x32x32xbf16> to vector<32x32xbf16>
    %cst = arith.constant dense<0.000000e+00> : vector<2x32xf32>
    %15 = tpu.matmul %10, %14, %cst {dimension_numbers = #tpu.dot_dimension_numbers<[1], [0], [0], [1], [0, 0, 1, 1], [], []>} : vector<2x32xbf16>, vector<32x32xbf16>, vector<2x32xf32> -> vector<2x32xf32>
    %16 = arith.addf %12, %15 : vector<2x32xf32>
    %17 = vector.extract_strided_slice %5 {offsets = [1, 0, 0], sizes = [1, 2, 32], strides = [1, 1, 1]} : vector<4x2x32xf32> to vector<1x2x32xf32>
    %18 = vector.shape_cast %17 : vector<1x2x32xf32> to vector<2x32xf32>
    %c1 = arith.constant 1 : index
    %c0_13 = arith.constant 0 : index
    %c0_14 = arith.constant 0 : index
    %19 = vector.load %arg2[%c1, %c0_13, %c0_14] : memref<4x32x32xbf16, #tpu.memory_space<vmem>>, vector<1x32x32xbf16>
    %20 = vector.shape_cast %19 : vector<1x32x32xbf16> to vector<32x32xbf16>
    %cst_15 = arith.constant dense<0.000000e+00> : vector<2x32xf32>
    %21 = tpu.matmul %10, %20, %cst_15 {dimension_numbers = #tpu.dot_dimension_numbers<[1], [0], [0], [1], [0, 0, 1, 1], [], []>} : vector<2x32xbf16>, vector<32x32xbf16>, vector<2x32xf32> -> vector<2x32xf32>
    %22 = arith.addf %18, %21 : vector<2x32xf32>
    %23 = vector.extract_strided_slice %5 {offsets = [2, 0, 0], sizes = [1, 2, 32], strides = [1, 1, 1]} : vector<4x2x32xf32> to vector<1x2x32xf32>
    %24 = vector.shape_cast %23 : vector<1x2x32xf32> to vector<2x32xf32>
    %c2 = arith.constant 2 : index
    %c0_16 = arith.constant 0 : index
    %c0_17 = arith.constant 0 : index
    %25 = vector.load %arg2[%c2, %c0_16, %c0_17] : memref<4x32x32xbf16, #tpu.memory_space<vmem>>, vector<1x32x32xbf16>
    %26 = vector.shape_cast %25 : vector<1x32x32xbf16> to vector<32x32xbf16>
    %cst_18 = arith.constant dense<0.000000e+00> : vector<2x32xf32>
    %27 = tpu.matmul %10, %26, %cst_18 {dimension_numbers = #tpu.dot_dimension_numbers<[1], [0], [0], [1], [0, 0, 1, 1], [], []>} : vector<2x32xbf16>, vector<32x32xbf16>, vector<2x32xf32> -> vector<2x32xf32>
    %28 = arith.addf %24, %27 : vector<2x32xf32>
    %29 = vector.extract_strided_slice %5 {offsets = [3, 0, 0], sizes = [1, 2, 32], strides = [1, 1, 1]} : vector<4x2x32xf32> to vector<1x2x32xf32>
    %30 = vector.shape_cast %29 : vector<1x2x32xf32> to vector<2x32xf32>
    %c3 = arith.constant 3 : index
    %c0_19 = arith.constant 0 : index
    %c0_20 = arith.constant 0 : index
    %31 = vector.load %arg2[%c3, %c0_19, %c0_20] : memref<4x32x32xbf16, #tpu.memory_space<vmem>>, vector<1x32x32xbf16>
    %32 = vector.shape_cast %31 : vector<1x32x32xbf16> to vector<32x32xbf16>
    %cst_21 = arith.constant dense<0.000000e+00> : vector<2x32xf32>
    %33 = tpu.matmul %10, %32, %cst_21 {dimension_numbers = #tpu.dot_dimension_numbers<[1], [0], [0], [1], [0, 0, 1, 1], [], []>} : vector<2x32xbf16>, vector<32x32xbf16>, vector<2x32xf32> -> vector<2x32xf32>
    %34 = arith.addf %30, %33 : vector<2x32xf32>
    %35 = arith.negf %16 : vector<2x32xf32>
    %36 = math.exp %35 : vector<2x32xf32>
    %cst_22 = arith.constant 1.000000e+00 : f32
    %37 = vector.broadcast %cst_22 : f32 to vector<2x32xf32>
    %38 = arith.addf %37, %36 : vector<2x32xf32>
    %39 = arith.divf %37, %38 : vector<2x32xf32>
    %40 = arith.negf %22 : vector<2x32xf32>
    %41 = math.exp %40 : vector<2x32xf32>
    %cst_23 = arith.constant 1.000000e+00 : f32
    %42 = vector.broadcast %cst_23 : f32 to vector<2x32xf32>
    %43 = arith.addf %42, %41 : vector<2x32xf32>
    %44 = arith.divf %42, %43 : vector<2x32xf32>
    %45 = math.tanh %28 : vector<2x32xf32>
    %46 = arith.negf %34 : vector<2x32xf32>
    %47 = math.exp %46 : vector<2x32xf32>
    %cst_24 = arith.constant 1.000000e+00 : f32
    %48 = vector.broadcast %cst_24 : f32 to vector<2x32xf32>
    %49 = arith.addf %48, %47 : vector<2x32xf32>
    %50 = arith.divf %48, %49 : vector<2x32xf32>
    %51 = arith.mulf %44, %9 : vector<2x32xf32>
    %52 = arith.mulf %39, %45 : vector<2x32xf32>
    %53 = arith.addf %51, %52 : vector<2x32xf32>
    %54 = math.tanh %53 : vector<2x32xf32>
    %55 = arith.mulf %50, %54 : vector<2x32xf32>
    %c0_25 = arith.constant 0 : index
    %c0_26 = arith.constant 0 : index
    %c0_27 = arith.constant 0 : index
    %56 = vector.load %arg9[%c0_25, %c0_26, %c0_27] : memref<2x2x32xf32, #tpu.memory_space<vmem>>, vector<1x2x32xf32>
    %57 = vector.shape_cast %56 : vector<1x2x32xf32> to vector<2x32xf32>
    %58 = vector.shape_cast %55 : vector<2x32xf32> to vector<1x2x32xf32>
    tpu.vector_store %arg9[%c0_25, %c0_26, %c0_27], %58 {strides = array<i32>} : memref<2x2x32xf32, #tpu.memory_space<vmem>>, vector<1x2x32xf32>,
    %c0_28 = arith.constant 0 : index
    %c0_29 = arith.constant 0 : index
    %c0_30 = arith.constant 0 : index
    %59 = vector.load %arg10[%c0_28, %c0_29, %c0_30] : memref<2x2x32xf32, #tpu.memory_space<vmem>>, vector<1x2x32xf32>
    %60 = vector.shape_cast %59 : vector<1x2x32xf32> to vector<2x32xf32>
    %61 = vector.shape_cast %53 : vector<2x32xf32> to vector<1x2x32xf32>
    tpu.vector_store %arg10[%c0_28, %c0_29, %c0_30], %61 {strides = array<i32>} : memref<2x2x32xf32, #tpu.memory_space<vmem>>, vector<1x2x32xf32>,
    %c1_31 = arith.constant 1 : index
    %c0_32 = arith.constant 0 : index
    %c0_33 = arith.constant 0 : index
    %62 = vector.load %arg9[%c1_31, %c0_32, %c0_33] : memref<2x2x32xf32, #tpu.memory_space<vmem>>, vector<1x2x32xf32>
    %63 = vector.shape_cast %62 : vector<1x2x32xf32> to vector<2x32xf32>
    %c1_34 = arith.constant 1 : index
    %c0_35 = arith.constant 0 : index
    %c0_36 = arith.constant 0 : index
    %64 = vector.load %arg10[%c1_34, %c0_35, %c0_36] : memref<2x2x32xf32, #tpu.memory_space<vmem>>, vector<1x2x32xf32>
    %65 = vector.shape_cast %64 : vector<1x2x32xf32> to vector<2x32xf32>
    %66 = arith.truncf %55 : vector<2x32xf32> to vector<2x32xbf16>
    %67 = arith.truncf %63 : vector<2x32xf32> to vector<2x32xbf16>
    %c0_37 = arith.constant 0 : index
    %c0_38 = arith.constant 0 : index
    %c0_39 = arith.constant 0 : index
    %68 = vector.load %arg3[%c0_37, %c0_38, %c0_39] : memref<4x32x32xbf16, #tpu.memory_space<vmem>>, vector<1x32x32xbf16>
    %69 = vector.shape_cast %68 : vector<1x32x32xbf16> to vector<32x32xbf16>
    %cst_40 = arith.constant dense<0.000000e+00> : vector<2x32xf32>
    %70 = tpu.matmul %66, %69, %cst_40 {dimension_numbers = #tpu.dot_dimension_numbers<[1], [0], [0], [1], [0, 0, 1, 1], [], []>} : vector<2x32xbf16>, vector<32x32xbf16>, vector<2x32xf32> -> vector<2x32xf32>
    %c0_41 = arith.constant 0 : index
    %c0_42 = arith.constant 0 : index
    %c0_43 = arith.constant 0 : index
    %71 = vector.load %arg4[%c0_41, %c0_42, %c0_43] : memref<4x32x32xbf16, #tpu.memory_space<vmem>>, vector<1x32x32xbf16>
    %72 = vector.shape_cast %71 : vector<1x32x32xbf16> to vector<32x32xbf16>
    %cst_44 = arith.constant dense<0.000000e+00> : vector<2x32xf32>
    %73 = tpu.matmul %67, %72, %cst_44 {dimension_numbers = #tpu.dot_dimension_numbers<[1], [0], [0], [1], [0, 0, 1, 1], [], []>} : vector<2x32xbf16>, vector<32x32xbf16>, vector<2x32xf32> -> vector<2x32xf32>
    %74 = arith.addf %70, %73 : vector<2x32xf32>
    %c0_45 = arith.constant 0 : index
    %c0_46 = arith.constant 0 : index
    %c0_47 = arith.constant 0 : index
    %75 = vector.load %arg5[%c0_45, %c0_46, %c0_47] : memref<4x1x32xf32, #tpu.memory_space<vmem>>, vector<1x1x32xf32>
    %76 = vector.shape_cast %75 : vector<1x1x32xf32> to vector<1x32xf32>
    %77 = vector.broadcast %76 : vector<1x32xf32> to vector<2x32xf32>
    %78 = arith.addf %74, %77 : vector<2x32xf32>
    %c1_48 = arith.constant 1 : index
    %c0_49 = arith.constant 0 : index
    %c0_50 = arith.constant 0 : index
    %79 = vector.load %arg3[%c1_48, %c0_49, %c0_50] : memref<4x32x32xbf16, #tpu.memory_space<vmem>>, vector<1x32x32xbf16>
    %80 = vector.shape_cast %79 : vector<1x32x32xbf16> to vector<32x32xbf16>
    %cst_51 = arith.constant dense<0.000000e+00> : vector<2x32xf32>
    %81 = tpu.matmul %66, %80, %cst_51 {dimension_numbers = #tpu.dot_dimension_numbers<[1], [0], [0], [1], [0, 0, 1, 1], [], []>} : vector<2x32xbf16>, vector<32x32xbf16>, vector<2x32xf32> -> vector<2x32xf32>
    %c1_52 = arith.constant 1 : index
    %c0_53 = arith.constant 0 : index
    %c0_54 = arith.constant 0 : index
    %82 = vector.load %arg4[%c1_52, %c0_53, %c0_54] : memref<4x32x32xbf16, #tpu.memory_space<vmem>>, vector<1x32x32xbf16>
    %83 = vector.shape_cast %82 : vector<1x32x32xbf16> to vector<32x32xbf16>
    %cst_55 = arith.constant dense<0.000000e+00> : vector<2x32xf32>
    %84 = tpu.matmul %67, %83, %cst_55 {dimension_numbers = #tpu.dot_dimension_numbers<[1], [0], [0], [1], [0, 0, 1, 1], [], []>} : vector<2x32xbf16>, vector<32x32xbf16>, vector<2x32xf32> -> vector<2x32xf32>
    %85 = arith.addf %81, %84 : vector<2x32xf32>
    %c1_56 = arith.constant 1 : index
    %c0_57 = arith.constant 0 : index
    %c0_58 = arith.constant 0 : index
    %86 = vector.load %arg5[%c1_56, %c0_57, %c0_58] : memref<4x1x32xf32, #tpu.memory_space<vmem>>, vector<1x1x32xf32>
    %87 = vector.shape_cast %86 : vector<1x1x32xf32> to vector<1x32xf32>
    %88 = vector.broadcast %87 : vector<1x32xf32> to vector<2x32xf32>
    %89 = arith.addf %85, %88 : vector<2x32xf32>
    %c2_59 = arith.constant 2 : index
    %c0_60 = arith.constant 0 : index
    %c0_61 = arith.constant 0 : index
    %90 = vector.load %arg3[%c2_59, %c0_60, %c0_61] : memref<4x32x32xbf16, #tpu.memory_space<vmem>>, vector<1x32x32xbf16>
    %91 = vector.shape_cast %90 : vector<1x32x32xbf16> to vector<32x32xbf16>
    %cst_62 = arith.constant dense<0.000000e+00> : vector<2x32xf32>
    %92 = tpu.matmul %66, %91, %cst_62 {dimension_numbers = #tpu.dot_dimension_numbers<[1], [0], [0], [1], [0, 0, 1, 1], [], []>} : vector<2x32xbf16>, vector<32x32xbf16>, vector<2x32xf32> -> vector<2x32xf32>
    %c2_63 = arith.constant 2 : index
    %c0_64 = arith.constant 0 : index
    %c0_65 = arith.constant 0 : index
    %93 = vector.load %arg4[%c2_63, %c0_64, %c0_65] : memref<4x32x32xbf16, #tpu.memory_space<vmem>>, vector<1x32x32xbf16>
    %94 = vector.shape_cast %93 : vector<1x32x32xbf16> to vector<32x32xbf16>
    %cst_66 = arith.constant dense<0.000000e+00> : vector<2x32xf32>
    %95 = tpu.matmul %67, %94, %cst_66 {dimension_numbers = #tpu.dot_dimension_numbers<[1], [0], [0], [1], [0, 0, 1, 1], [], []>} : vector<2x32xbf16>, vector<32x32xbf16>, vector<2x32xf32> -> vector<2x32xf32>
    %96 = arith.addf %92, %95 : vector<2x32xf32>
    %c2_67 = arith.constant 2 : index
    %c0_68 = arith.constant 0 : index
    %c0_69 = arith.constant 0 : index
    %97 = vector.load %arg5[%c2_67, %c0_68, %c0_69] : memref<4x1x32xf32, #tpu.memory_space<vmem>>, vector<1x1x32xf32>
    %98 = vector.shape_cast %97 : vector<1x1x32xf32> to vector<1x32xf32>
    %99 = vector.broadcast %98 : vector<1x32xf32> to vector<2x32xf32>
    %100 = arith.addf %96, %99 : vector<2x32xf32>
    %c3_70 = arith.constant 3 : index
    %c0_71 = arith.constant 0 : index
    %c0_72 = arith.constant 0 : index
    %101 = vector.load %arg3[%c3_70, %c0_71, %c0_72] : memref<4x32x32xbf16, #tpu.memory_space<vmem>>, vector<1x32x32xbf16>
    %102 = vector.shape_cast %101 : vector<1x32x32xbf16> to vector<32x32xbf16>
    %cst_73 = arith.constant dense<0.000000e+00> : vector<2x32xf32>
    %103 = tpu.matmul %66, %102, %cst_73 {dimension_numbers = #tpu.dot_dimension_numbers<[1], [0], [0], [1], [0, 0, 1, 1], [], []>} : vector<2x32xbf16>, vector<32x32xbf16>, vector<2x32xf32> -> vector<2x32xf32>
    %c3_74 = arith.constant 3 : index
    %c0_75 = arith.constant 0 : index
    %c0_76 = arith.constant 0 : index
    %104 = vector.load %arg4[%c3_74, %c0_75, %c0_76] : memref<4x32x32xbf16, #tpu.memory_space<vmem>>, vector<1x32x32xbf16>
    %105 = vector.shape_cast %104 : vector<1x32x32xbf16> to vector<32x32xbf16>
    %cst_77 = arith.constant dense<0.000000e+00> : vector<2x32xf32>
    %106 = tpu.matmul %67, %105, %cst_77 {dimension_numbers = #tpu.dot_dimension_numbers<[1], [0], [0], [1], [0, 0, 1, 1], [], []>} : vector<2x32xbf16>, vector<32x32xbf16>, vector<2x32xf32> -> vector<2x32xf32>
    %107 = arith.addf %103, %106 : vector<2x32xf32>
    %c3_78 = arith.constant 3 : index
    %c0_79 = arith.constant 0 : index
    %c0_80 = arith.constant 0 : index
    %108 = vector.load %arg5[%c3_78, %c0_79, %c0_80] : memref<4x1x32xf32, #tpu.memory_space<vmem>>, vector<1x1x32xf32>
    %109 = vector.shape_cast %108 : vector<1x1x32xf32> to vector<1x32xf32>
    %110 = vector.broadcast %109 : vector<1x32xf32> to vector<2x32xf32>
    %111 = arith.addf %107, %110 : vector<2x32xf32>
    %112 = arith.negf %78 : vector<2x32xf32>
    %113 = math.exp %112 : vector<2x32xf32>
    %cst_81 = arith.constant 1.000000e+00 : f32
    %114 = vector.broadcast %cst_81 : f32 to vector<2x32xf32>
    %115 = arith.addf %114, %113 : vector<2x32xf32>
    %116 = arith.divf %114, %115 : vector<2x32xf32>
    %117 = arith.negf %89 : vector<2x32xf32>
    %118 = math.exp %117 : vector<2x32xf32>
    %cst_82 = arith.constant 1.000000e+00 : f32
    %119 = vector.broadcast %cst_82 : f32 to vector<2x32xf32>
    %120 = arith.addf %119, %118 : vector<2x32xf32>
    %121 = arith.divf %119, %120 : vector<2x32xf32>
    %122 = math.tanh %100 : vector<2x32xf32>
    %123 = arith.negf %111 : vector<2x32xf32>
    %124 = math.exp %123 : vector<2x32xf32>
    %cst_83 = arith.constant 1.000000e+00 : f32
    %125 = vector.broadcast %cst_83 : f32 to vector<2x32xf32>
    %126 = arith.addf %125, %124 : vector<2x32xf32>
    %127 = arith.divf %125, %126 : vector<2x32xf32>
    %128 = arith.mulf %121, %65 : vector<2x32xf32>
    %129 = arith.mulf %116, %122 : vector<2x32xf32>
    %130 = arith.addf %128, %129 : vector<2x32xf32>
    %131 = math.tanh %130 : vector<2x32xf32>
    %132 = arith.mulf %127, %131 : vector<2x32xf32>
    %c1_84 = arith.constant 1 : index
    %c0_85 = arith.constant 0 : index
    %c0_86 = arith.constant 0 : index
    %133 = vector.load %arg9[%c1_84, %c0_85, %c0_86] : memref<2x2x32xf32, #tpu.memory_space<vmem>>, vector<1x2x32xf32>
    %134 = vector.shape_cast %133 : vector<1x2x32xf32> to vector<2x32xf32>
    %135 = vector.shape_cast %132 : vector<2x32xf32> to vector<1x2x32xf32>
    tpu.vector_store %arg9[%c1_84, %c0_85, %c0_86], %135 {strides = array<i32>} : memref<2x2x32xf32, #tpu.memory_space<vmem>>, vector<1x2x32xf32>,
    %c1_87 = arith.constant 1 : index
    %c0_88 = arith.constant 0 : index
    %c0_89 = arith.constant 0 : index
    %136 = vector.load %arg10[%c1_87, %c0_88, %c0_89] : memref<2x2x32xf32, #tpu.memory_space<vmem>>, vector<1x2x32xf32>
    %137 = vector.shape_cast %136 : vector<1x2x32xf32> to vector<2x32xf32>
    %138 = vector.shape_cast %130 : vector<2x32xf32> to vector<1x2x32xf32>
    tpu.vector_store %arg10[%c1_87, %c0_88, %c0_89], %138 {strides = array<i32>} : memref<2x2x32xf32, #tpu.memory_space<vmem>>, vector<1x2x32xf32>,
    %c1_i32 = arith.constant 1 : i32
    %139 = arith.index_cast %c1_i32 : i32 to index
    %c0_90 = arith.constant 0 : index
    %c0_91 = arith.constant 0 : index
    %c0_92 = arith.constant 0 : index
    %140 = vector.load %arg1[%139, %c0_90, %c0_91, %c0_92] : memref<8x4x2x32xf32, #tpu.memory_space<vmem>>, vector<1x4x2x32xf32>
    %141 = vector.shape_cast %140 : vector<1x4x2x32xf32> to vector<4x2x32xf32>
    %c0_93 = arith.constant 0 : index
    %c0_94 = arith.constant 0 : index
    %c0_95 = arith.constant 0 : index
    %142 = vector.load %arg9[%c0_93, %c0_94, %c0_95] : memref<2x2x32xf32, #tpu.memory_space<vmem>>, vector<1x2x32xf32>
    %143 = vector.shape_cast %142 : vector<1x2x32xf32> to vector<2x32xf32>
    %c0_96 = arith.constant 0 : index
    %c0_97 = arith.constant 0 : index
    %c0_98 = arith.constant 0 : index
    %144 = vector.load %arg10[%c0_96, %c0_97, %c0_98] : memref<2x2x32xf32, #tpu.memory_space<vmem>>, vector<1x2x32xf32>
    %145 = vector.shape_cast %144 : vector<1x2x32xf32> to vector<2x32xf32>
    %146 = arith.truncf %143 : vector<2x32xf32> to vector<2x32xbf16>
    %147 = vector.extract_strided_slice %141 {offsets = [0, 0, 0], sizes = [1, 2, 32], strides = [1, 1, 1]} : vector<4x2x32xf32> to vector<1x2x32xf32>
    %148 = vector.shape_cast %147 : vector<1x2x32xf32> to vector<2x32xf32>
    %c0_99 = arith.constant 0 : index
    %c0_100 = arith.constant 0 : index
    %c0_101 = arith.constant 0 : index
    %149 = vector.load %arg2[%c0_99, %c0_100, %c0_101] : memref<4x32x32xbf16, #tpu.memory_space<vmem>>, vector<1x32x32xbf16>
    %150 = vector.shape_cast %149 : vector<1x32x32xbf16> to vector<32x32xbf16>
    %cst_102 = arith.constant dense<0.000000e+00> : vector<2x32xf32>
    %151 = tpu.matmul %146, %150, %cst_102 {dimension_numbers = #tpu.dot_dimension_numbers<[1], [0], [0], [1], [0, 0, 1, 1], [], []>} : vector<2x32xbf16>, vector<32x32xbf16>, vector<2x32xf32> -> vector<2x32xf32>
    %152 = arith.addf %148, %151 : vector<2x32xf32>
    %153 = vector.extract_strided_slice %141 {offsets = [1, 0, 0], sizes = [1, 2, 32], strides = [1, 1, 1]} : vector<4x2x32xf32> to vector<1x2x32xf32>
    %154 = vector.shape_cast %153 : vector<1x2x32xf32> to vector<2x32xf32>
    %c1_103 = arith.constant 1 : index
    %c0_104 = arith.constant 0 : index
    %c0_105 = arith.constant 0 : index
    %155 = vector.load %arg2[%c1_103, %c0_104, %c0_105] : memref<4x32x32xbf16, #tpu.memory_space<vmem>>, vector<1x32x32xbf16>
    %156 = vector.shape_cast %155 : vector<1x32x32xbf16> to vector<32x32xbf16>
    %cst_106 = arith.constant dense<0.000000e+00> : vector<2x32xf32>
    %157 = tpu.matmul %146, %156, %cst_106 {dimension_numbers = #tpu.dot_dimension_numbers<[1], [0], [0], [1], [0, 0, 1, 1], [], []>} : vector<2x32xbf16>, vector<32x32xbf16>, vector<2x32xf32> -> vector<2x32xf32>
    %158 = arith.addf %154, %157 : vector<2x32xf32>
    %159 = vector.extract_strided_slice %141 {offsets = [2, 0, 0], sizes = [1, 2, 32], strides = [1, 1, 1]} : vector<4x2x32xf32> to vector<1x2x32xf32>
    %160 = vector.shape_cast %159 : vector<1x2x32xf32> to vector<2x32xf32>
    %c2_107 = arith.constant 2 : index
    %c0_108 = arith.constant 0 : index
    %c0_109 = arith.constant 0 : index
    %161 = vector.load %arg2[%c2_107, %c0_108, %c0_109] : memref<4x32x32xbf16, #tpu.memory_space<vmem>>, vector<1x32x32xbf16>
    %162 = vector.shape_cast %161 : vector<1x32x32xbf16> to vector<32x32xbf16>
    %cst_110 = arith.constant dense<0.000000e+00> : vector<2x32xf32>
    %163 = tpu.matmul %146, %162, %cst_110 {dimension_numbers = #tpu.dot_dimension_numbers<[1], [0], [0], [1], [0, 0, 1, 1], [], []>} : vector<2x32xbf16>, vector<32x32xbf16>, vector<2x32xf32> -> vector<2x32xf32>
    %164 = arith.addf %160, %163 : vector<2x32xf32>
    %165 = vector.extract_strided_slice %141 {offsets = [3, 0, 0], sizes = [1, 2, 32], strides = [1, 1, 1]} : vector<4x2x32xf32> to vector<1x2x32xf32>
    %166 = vector.shape_cast %165 : vector<1x2x32xf32> to vector<2x32xf32>
    %c3_111 = arith.constant 3 : index
    %c0_112 = arith.constant 0 : index
    %c0_113 = arith.constant 0 : index
    %167 = vector.load %arg2[%c3_111, %c0_112, %c0_113] : memref<4x32x32xbf16, #tpu.memory_space<vmem>>, vector<1x32x32xbf16>
    %168 = vector.shape_cast %167 : vector<1x32x32xbf16> to vector<32x32xbf16>
    %cst_114 = arith.constant dense<0.000000e+00> : vector<2x32xf32>
    %169 = tpu.matmul %146, %168, %cst_114 {dimension_numbers = #tpu.dot_dimension_numbers<[1], [0], [0], [1], [0, 0, 1, 1], [], []>} : vector<2x32xbf16>, vector<32x32xbf16>, vector<2x32xf32> -> vector<2x32xf32>
    %170 = arith.addf %166, %169 : vector<2x32xf32>
    %171 = arith.negf %152 : vector<2x32xf32>
    %172 = math.exp %171 : vector<2x32xf32>
    %cst_115 = arith.constant 1.000000e+00 : f32
    %173 = vector.broadcast %cst_115 : f32 to vector<2x32xf32>
    %174 = arith.addf %173, %172 : vector<2x32xf32>
    %175 = arith.divf %173, %174 : vector<2x32xf32>
    %176 = arith.negf %158 : vector<2x32xf32>
    %177 = math.exp %176 : vector<2x32xf32>
    %cst_116 = arith.constant 1.000000e+00 : f32
    %178 = vector.broadcast %cst_116 : f32 to vector<2x32xf32>
    %179 = arith.addf %178, %177 : vector<2x32xf32>
    %180 = arith.divf %178, %179 : vector<2x32xf32>
    %181 = math.tanh %164 : vector<2x32xf32>
    %182 = arith.negf %170 : vector<2x32xf32>
    %183 = math.exp %182 : vector<2x32xf32>
    %cst_117 = arith.constant 1.000000e+00 : f32
    %184 = vector.broadcast %cst_117 : f32 to vector<2x32xf32>
    %185 = arith.addf %184, %183 : vector<2x32xf32>
    %186 = arith.divf %184, %185 : vector<2x32xf32>
    %187 = arith.mulf %180, %145 : vector<2x32xf32>
    %188 = arith.mulf %175, %181 : vector<2x32xf32>
    %189 = arith.addf %187, %188 : vector<2x32xf32>
    %190 = math.tanh %189 : vector<2x32xf32>
    %191 = arith.mulf %186, %190 : vector<2x32xf32>
    %c0_118 = arith.constant 0 : index
    %c0_119 = arith.constant 0 : index
    %c0_120 = arith.constant 0 : index
    %192 = vector.load %arg9[%c0_118, %c0_119, %c0_120] : memref<2x2x32xf32, #tpu.memory_space<vmem>>, vector<1x2x32xf32>
    %193 = vector.shape_cast %192 : vector<1x2x32xf32> to vector<2x32xf32>
    %194 = vector.shape_cast %191 : vector<2x32xf32> to vector<1x2x32xf32>
    tpu.vector_store %arg9[%c0_118, %c0_119, %c0_120], %194 {strides = array<i32>} : memref<2x2x32xf32, #tpu.memory_space<vmem>>, vector<1x2x32xf32>,
    %c0_121 = arith.constant 0 : index
    %c0_122 = arith.constant 0 : index
    %c0_123 = arith.constant 0 : index
    %195 = vector.load %arg10[%c0_121, %c0_122, %c0_123] : memref<2x2x32xf32, #tpu.memory_space<vmem>>, vector<1x2x32xf32>
    %196 = vector.shape_cast %195 : vector<1x2x32xf32> to vector<2x32xf32>
    %197 = vector.shape_cast %189 : vector<2x32xf32> to vector<1x2x32xf32>
    tpu.vector_store %arg10[%c0_121, %c0_122, %c0_123], %197 {strides = array<i32>} : memref<2x2x32xf32, #tpu.memory_space<vmem>>, vector<1x2x32xf32>,
    %c1_124 = arith.constant 1 : index
    %c0_125 = arith.constant 0 : index
    %c0_126 = arith.constant 0 : index
    %198 = vector.load %arg9[%c1_124, %c0_125, %c0_126] : memref<2x2x32xf32, #tpu.memory_space<vmem>>, vector<1x2x32xf32>
    %199 = vector.shape_cast %198 : vector<1x2x32xf32> to vector<2x32xf32>
    %c1_127 = arith.constant 1 : index
    %c0_128 = arith.constant 0 : index
    %c0_129 = arith.constant 0 : index
    %200 = vector.load %arg10[%c1_127, %c0_128, %c0_129] : memref<2x2x32xf32, #tpu.memory_space<vmem>>, vector<1x2x32xf32>
    %201 = vector.shape_cast %200 : vector<1x2x32xf32> to vector<2x32xf32>
    %202 = arith.truncf %191 : vector<2x32xf32> to vector<2x32xbf16>
    %203 = arith.truncf %199 : vector<2x32xf32> to vector<2x32xbf16>
    %c0_130 = arith.constant 0 : index
    %c0_131 = arith.constant 0 : index
    %c0_132 = arith.constant 0 : index
    %204 = vector.load %arg3[%c0_130, %c0_131, %c0_132] : memref<4x32x32xbf16, #tpu.memory_space<vmem>>, vector<1x32x32xbf16>
    %205 = vector.shape_cast %204 : vector<1x32x32xbf16> to vector<32x32xbf16>
    %cst_133 = arith.constant dense<0.000000e+00> : vector<2x32xf32>
    %206 = tpu.matmul %202, %205, %cst_133 {dimension_numbers = #tpu.dot_dimension_numbers<[1], [0], [0], [1], [0, 0, 1, 1], [], []>} : vector<2x32xbf16>, vector<32x32xbf16>, vector<2x32xf32> -> vector<2x32xf32>
    %c0_134 = arith.constant 0 : index
    %c0_135 = arith.constant 0 : index
    %c0_136 = arith.constant 0 : index
    %207 = vector.load %arg4[%c0_134, %c0_135, %c0_136] : memref<4x32x32xbf16, #tpu.memory_space<vmem>>, vector<1x32x32xbf16>
    %208 = vector.shape_cast %207 : vector<1x32x32xbf16> to vector<32x32xbf16>
    %cst_137 = arith.constant dense<0.000000e+00> : vector<2x32xf32>
    %209 = tpu.matmul %203, %208, %cst_137 {dimension_numbers = #tpu.dot_dimension_numbers<[1], [0], [0], [1], [0, 0, 1, 1], [], []>} : vector<2x32xbf16>, vector<32x32xbf16>, vector<2x32xf32> -> vector<2x32xf32>
    %210 = arith.addf %206, %209 : vector<2x32xf32>
    %c0_138 = arith.constant 0 : index
    %c0_139 = arith.constant 0 : index
    %c0_140 = arith.constant 0 : index
    %211 = vector.load %arg5[%c0_138, %c0_139, %c0_140] : memref<4x1x32xf32, #tpu.memory_space<vmem>>, vector<1x1x32xf32>
    %212 = vector.shape_cast %211 : vector<1x1x32xf32> to vector<1x32xf32>
    %213 = vector.broadcast %212 : vector<1x32xf32> to vector<2x32xf32>
    %214 = arith.addf %210, %213 : vector<2x32xf32>
    %c1_141 = arith.constant 1 : index
    %c0_142 = arith.constant 0 : index
    %c0_143 = arith.constant 0 : index
    %215 = vector.load %arg3[%c1_141, %c0_142, %c0_143] : memref<4x32x32xbf16, #tpu.memory_space<vmem>>, vector<1x32x32xbf16>
    %216 = vector.shape_cast %215 : vector<1x32x32xbf16> to vector<32x32xbf16>
    %cst_144 = arith.constant dense<0.000000e+00> : vector<2x32xf32>
    %217 = tpu.matmul %202, %216, %cst_144 {dimension_numbers = #tpu.dot_dimension_numbers<[1], [0], [0], [1], [0, 0, 1, 1], [], []>} : vector<2x32xbf16>, vector<32x32xbf16>, vector<2x32xf32> -> vector<2x32xf32>
    %c1_145 = arith.constant 1 : index
    %c0_146 = arith.constant 0 : index
    %c0_147 = arith.constant 0 : index
    %218 = vector.load %arg4[%c1_145, %c0_146, %c0_147] : memref<4x32x32xbf16, #tpu.memory_space<vmem>>, vector<1x32x32xbf16>
    %219 = vector.shape_cast %218 : vector<1x32x32xbf16> to vector<32x32xbf16>
    %cst_148 = arith.constant dense<0.000000e+00> : vector<2x32xf32>
    %220 = tpu.matmul %203, %219, %cst_148 {dimension_numbers = #tpu.dot_dimension_numbers<[1], [0], [0], [1], [0, 0, 1, 1], [], []>} : vector<2x32xbf16>, vector<32x32xbf16>, vector<2x32xf32> -> vector<2x32xf32>
    %221 = arith.addf %217, %220 : vector<2x32xf32>
    %c1_149 = arith.constant 1 : index
    %c0_150 = arith.constant 0 : index
    %c0_151 = arith.constant 0 : index
    %222 = vector.load %arg5[%c1_149, %c0_150, %c0_151] : memref<4x1x32xf32, #tpu.memory_space<vmem>>, vector<1x1x32xf32>
    %223 = vector.shape_cast %222 : vector<1x1x32xf32> to vector<1x32xf32>
    %224 = vector.broadcast %223 : vector<1x32xf32> to vector<2x32xf32>
    %225 = arith.addf %221, %224 : vector<2x32xf32>
    %c2_152 = arith.constant 2 : index
    %c0_153 = arith.constant 0 : index
    %c0_154 = arith.constant 0 : index
    %226 = vector.load %arg3[%c2_152, %c0_153, %c0_154] : memref<4x32x32xbf16, #tpu.memory_space<vmem>>, vector<1x32x32xbf16>
    %227 = vector.shape_cast %226 : vector<1x32x32xbf16> to vector<32x32xbf16>
    %cst_155 = arith.constant dense<0.000000e+00> : vector<2x32xf32>
    %228 = tpu.matmul %202, %227, %cst_155 {dimension_numbers = #tpu.dot_dimension_numbers<[1], [0], [0], [1], [0, 0, 1, 1], [], []>} : vector<2x32xbf16>, vector<32x32xbf16>, vector<2x32xf32> -> vector<2x32xf32>
    %c2_156 = arith.constant 2 : index
    %c0_157 = arith.constant 0 : index
    %c0_158 = arith.constant 0 : index
    %229 = vector.load %arg4[%c2_156, %c0_157, %c0_158] : memref<4x32x32xbf16, #tpu.memory_space<vmem>>, vector<1x32x32xbf16>
    %230 = vector.shape_cast %229 : vector<1x32x32xbf16> to vector<32x32xbf16>
    %cst_159 = arith.constant dense<0.000000e+00> : vector<2x32xf32>
    %231 = tpu.matmul %203, %230, %cst_159 {dimension_numbers = #tpu.dot_dimension_numbers<[1], [0], [0], [1], [0, 0, 1, 1], [], []>} : vector<2x32xbf16>, vector<32x32xbf16>, vector<2x32xf32> -> vector<2x32xf32>
    %232 = arith.addf %228, %231 : vector<2x32xf32>
    %c2_160 = arith.constant 2 : index
    %c0_161 = arith.constant 0 : index
    %c0_162 = arith.constant 0 : index
    %233 = vector.load %arg5[%c2_160, %c0_161, %c0_162] : memref<4x1x32xf32, #tpu.memory_space<vmem>>, vector<1x1x32xf32>
    %234 = vector.shape_cast %233 : vector<1x1x32xf32> to vector<1x32xf32>
    %235 = vector.broadcast %234 : vector<1x32xf32> to vector<2x32xf32>
    %236 = arith.addf %232, %235 : vector<2x32xf32>
    %c3_163 = arith.constant 3 : index
    %c0_164 = arith.constant 0 : index
    %c0_165 = arith.constant 0 : index
    %237 = vector.load %arg3[%c3_163, %c0_164, %c0_165] : memref<4x32x32xbf16, #tpu.memory_space<vmem>>, vector<1x32x32xbf16>
    %238 = vector.shape_cast %237 : vector<1x32x32xbf16> to vector<32x32xbf16>
    %cst_166 = arith.constant dense<0.000000e+00> : vector<2x32xf32>
    %239 = tpu.matmul %202, %238, %cst_166 {dimension_numbers = #tpu.dot_dimension_numbers<[1], [0], [0], [1], [0, 0, 1, 1], [], []>} : vector<2x32xbf16>, vector<32x32xbf16>, vector<2x32xf32> -> vector<2x32xf32>
    %c3_167 = arith.constant 3 : index
    %c0_168 = arith.constant 0 : index
    %c0_169 = arith.constant 0 : index
    %240 = vector.load %arg4[%c3_167, %c0_168, %c0_169] : memref<4x32x32xbf16, #tpu.memory_space<vmem>>, vector<1x32x32xbf16>
    %241 = vector.shape_cast %240 : vector<1x32x32xbf16> to vector<32x32xbf16>
    %cst_170 = arith.constant dense<0.000000e+00> : vector<2x32xf32>
    %242 = tpu.matmul %203, %241, %cst_170 {dimension_numbers = #tpu.dot_dimension_numbers<[1], [0], [0], [1], [0, 0, 1, 1], [], []>} : vector<2x32xbf16>, vector<32x32xbf16>, vector<2x32xf32> -> vector<2x32xf32>
    %243 = arith.addf %239, %242 : vector<2x32xf32>
    %c3_171 = arith.constant 3 : index
    %c0_172 = arith.constant 0 : index
    %c0_173 = arith.constant 0 : index
    %244 = vector.load %arg5[%c3_171, %c0_172, %c0_173] : memref<4x1x32xf32, #tpu.memory_space<vmem>>, vector<1x1x32xf32>
    %245 = vector.shape_cast %244 : vector<1x1x32xf32> to vector<1x32xf32>
    %246 = vector.broadcast %245 : vector<1x32xf32> to vector<2x32xf32>
    %247 = arith.addf %243, %246 : vector<2x32xf32>
    %248 = arith.negf %214 : vector<2x32xf32>
    %249 = math.exp %248 : vector<2x32xf32>
    %cst_174 = arith.constant 1.000000e+00 : f32
    %250 = vector.broadcast %cst_174 : f32 to vector<2x32xf32>
    %251 = arith.addf %250, %249 : vector<2x32xf32>
    %252 = arith.divf %250, %251 : vector<2x32xf32>
    %253 = arith.negf %225 : vector<2x32xf32>
    %254 = math.exp %253 : vector<2x32xf32>
    %cst_175 = arith.constant 1.000000e+00 : f32
    %255 = vector.broadcast %cst_175 : f32 to vector<2x32xf32>
    %256 = arith.addf %255, %254 : vector<2x32xf32>
    %257 = arith.divf %255, %256 : vector<2x32xf32>
    %258 = math.tanh %236 : vector<2x32xf32>
    %259 = arith.negf %247 : vector<2x32xf32>
    %260 = math.exp %259 : vector<2x32xf32>
    %cst_176 = arith.constant 1.000000e+00 : f32
    %261 = vector.broadcast %cst_176 : f32 to vector<2x32xf32>
    %262 = arith.addf %261, %260 : vector<2x32xf32>
    %263 = arith.divf %261, %262 : vector<2x32xf32>
    %264 = arith.mulf %257, %201 : vector<2x32xf32>
    %265 = arith.mulf %252, %258 : vector<2x32xf32>
    %266 = arith.addf %264, %265 : vector<2x32xf32>
    %267 = math.tanh %266 : vector<2x32xf32>
    %268 = arith.mulf %263, %267 : vector<2x32xf32>
    %c1_177 = arith.constant 1 : index
    %c0_178 = arith.constant 0 : index
    %c0_179 = arith.constant 0 : index
    %269 = vector.load %arg9[%c1_177, %c0_178, %c0_179] : memref<2x2x32xf32, #tpu.memory_space<vmem>>, vector<1x2x32xf32>
    %270 = vector.shape_cast %269 : vector<1x2x32xf32> to vector<2x32xf32>
    %271 = vector.shape_cast %268 : vector<2x32xf32> to vector<1x2x32xf32>
    tpu.vector_store %arg9[%c1_177, %c0_178, %c0_179], %271 {strides = array<i32>} : memref<2x2x32xf32, #tpu.memory_space<vmem>>, vector<1x2x32xf32>,
    %c1_180 = arith.constant 1 : index
    %c0_181 = arith.constant 0 : index
    %c0_182 = arith.constant 0 : index
    %272 = vector.load %arg10[%c1_180, %c0_181, %c0_182] : memref<2x2x32xf32, #tpu.memory_space<vmem>>, vector<1x2x32xf32>
    %273 = vector.shape_cast %272 : vector<1x2x32xf32> to vector<2x32xf32>
    %274 = vector.shape_cast %266 : vector<2x32xf32> to vector<1x2x32xf32>
    tpu.vector_store %arg10[%c1_180, %c0_181, %c0_182], %274 {strides = array<i32>} : memref<2x2x32xf32, #tpu.memory_space<vmem>>, vector<1x2x32xf32>,
    %c2_i32 = arith.constant 2 : i32
    %275 = arith.index_cast %c2_i32 : i32 to index
    %c0_183 = arith.constant 0 : index
    %c0_184 = arith.constant 0 : index
    %c0_185 = arith.constant 0 : index
    %276 = vector.load %arg1[%275, %c0_183, %c0_184, %c0_185] : memref<8x4x2x32xf32, #tpu.memory_space<vmem>>, vector<1x4x2x32xf32>
    %277 = vector.shape_cast %276 : vector<1x4x2x32xf32> to vector<4x2x32xf32>
    %c0_186 = arith.constant 0 : index
    %c0_187 = arith.constant 0 : index
    %c0_188 = arith.constant 0 : index
    %278 = vector.load %arg9[%c0_186, %c0_187, %c0_188] : memref<2x2x32xf32, #tpu.memory_space<vmem>>, vector<1x2x32xf32>
    %279 = vector.shape_cast %278 : vector<1x2x32xf32> to vector<2x32xf32>
    %c0_189 = arith.constant 0 : index
    %c0_190 = arith.constant 0 : index
    %c0_191 = arith.constant 0 : index
    %280 = vector.load %arg10[%c0_189, %c0_190, %c0_191] : memref<2x2x32xf32, #tpu.memory_space<vmem>>, vector<1x2x32xf32>
    %281 = vector.shape_cast %280 : vector<1x2x32xf32> to vector<2x32xf32>
    %282 = arith.truncf %279 : vector<2x32xf32> to vector<2x32xbf16>
    %283 = vector.extract_strided_slice %277 {offsets = [0, 0, 0], sizes = [1, 2, 32], strides = [1, 1, 1]} : vector<4x2x32xf32> to vector<1x2x32xf32>
    %284 = vector.shape_cast %283 : vector<1x2x32xf32> to vector<2x32xf32>
    %c0_192 = arith.constant 0 : index
    %c0_193 = arith.constant 0 : index
    %c0_194 = arith.constant 0 : index
    %285 = vector.load %arg2[%c0_192, %c0_193, %c0_194] : memref<4x32x32xbf16, #tpu.memory_space<vmem>>, vector<1x32x32xbf16>
    %286 = vector.shape_cast %285 : vector<1x32x32xbf16> to vector<32x32xbf16>
    %cst_195 = arith.constant dense<0.000000e+00> : vector<2x32xf32>
    %287 = tpu.matmul %282, %286, %cst_195 {dimension_numbers = #tpu.dot_dimension_numbers<[1], [0], [0], [1], [0, 0, 1, 1], [], []>} : vector<2x32xbf16>, vector<32x32xbf16>, vector<2x32xf32> -> vector<2x32xf32>
    %288 = arith.addf %284, %287 : vector<2x32xf32>
    %289 = vector.extract_strided_slice %277 {offsets = [1, 0, 0], sizes = [1, 2, 32], strides = [1, 1, 1]} : vector<4x2x32xf32> to vector<1x2x32xf32>
    %290 = vector.shape_cast %289 : vector<1x2x32xf32> to vector<2x32xf32>
    %c1_196 = arith.constant 1 : index
    %c0_197 = arith.constant 0 : index
    %c0_198 = arith.constant 0 : index
    %291 = vector.load %arg2[%c1_196, %c0_197, %c0_198] : memref<4x32x32xbf16, #tpu.memory_space<vmem>>, vector<1x32x32xbf16>
    %292 = vector.shape_cast %291 : vector<1x32x32xbf16> to vector<32x32xbf16>
    %cst_199 = arith.constant dense<0.000000e+00> : vector<2x32xf32>
    %293 = tpu.matmul %282, %292, %cst_199 {dimension_numbers = #tpu.dot_dimension_numbers<[1], [0], [0], [1], [0, 0, 1, 1], [], []>} : vector<2x32xbf16>, vector<32x32xbf16>, vector<2x32xf32> -> vector<2x32xf32>
    %294 = arith.addf %290, %293 : vector<2x32xf32>
    %295 = vector.extract_strided_slice %277 {offsets = [2, 0, 0], sizes = [1, 2, 32], strides = [1, 1, 1]} : vector<4x2x32xf32> to vector<1x2x32xf32>
    %296 = vector.shape_cast %295 : vector<1x2x32xf32> to vector<2x32xf32>
    %c2_200 = arith.constant 2 : index
    %c0_201 = arith.constant 0 : index
    %c0_202 = arith.constant 0 : index
    %297 = vector.load %arg2[%c2_200, %c0_201, %c0_202] : memref<4x32x32xbf16, #tpu.memory_space<vmem>>, vector<1x32x32xbf16>
    %298 = vector.shape_cast %297 : vector<1x32x32xbf16> to vector<32x32xbf16>
    %cst_203 = arith.constant dense<0.000000e+00> : vector<2x32xf32>
    %299 = tpu.matmul %282, %298, %cst_203 {dimension_numbers = #tpu.dot_dimension_numbers<[1], [0], [0], [1], [0, 0, 1, 1], [], []>} : vector<2x32xbf16>, vector<32x32xbf16>, vector<2x32xf32> -> vector<2x32xf32>
    %300 = arith.addf %296, %299 : vector<2x32xf32>
    %301 = vector.extract_strided_slice %277 {offsets = [3, 0, 0], sizes = [1, 2, 32], strides = [1, 1, 1]} : vector<4x2x32xf32> to vector<1x2x32xf32>
    %302 = vector.shape_cast %301 : vector<1x2x32xf32> to vector<2x32xf32>
    %c3_204 = arith.constant 3 : index
    %c0_205 = arith.constant 0 : index
    %c0_206 = arith.constant 0 : index
    %303 = vector.load %arg2[%c3_204, %c0_205, %c0_206] : memref<4x32x32xbf16, #tpu.memory_space<vmem>>, vector<1x32x32xbf16>
    %304 = vector.shape_cast %303 : vector<1x32x32xbf16> to vector<32x32xbf16>
    %cst_207 = arith.constant dense<0.000000e+00> : vector<2x32xf32>
    %305 = tpu.matmul %282, %304, %cst_207 {dimension_numbers = #tpu.dot_dimension_numbers<[1], [0], [0], [1], [0, 0, 1, 1], [], []>} : vector<2x32xbf16>, vector<32x32xbf16>, vector<2x32xf32> -> vector<2x32xf32>
    %306 = arith.addf %302, %305 : vector<2x32xf32>
    %307 = arith.negf %288 : vector<2x32xf32>
    %308 = math.exp %307 : vector<2x32xf32>
    %cst_208 = arith.constant 1.000000e+00 : f32
    %309 = vector.broadcast %cst_208 : f32 to vector<2x32xf32>
    %310 = arith.addf %309, %308 : vector<2x32xf32>
    %311 = arith.divf %309, %310 : vector<2x32xf32>
    %312 = arith.negf %294 : vector<2x32xf32>
    %313 = math.exp %312 : vector<2x32xf32>
    %cst_209 = arith.constant 1.000000e+00 : f32
    %314 = vector.broadcast %cst_209 : f32 to vector<2x32xf32>
    %315 = arith.addf %314, %313 : vector<2x32xf32>
    %316 = arith.divf %314, %315 : vector<2x32xf32>
    %317 = math.tanh %300 : vector<2x32xf32>
    %318 = arith.negf %306 : vector<2x32xf32>
    %319 = math.exp %318 : vector<2x32xf32>
    %cst_210 = arith.constant 1.000000e+00 : f32
    %320 = vector.broadcast %cst_210 : f32 to vector<2x32xf32>
    %321 = arith.addf %320, %319 : vector<2x32xf32>
    %322 = arith.divf %320, %321 : vector<2x32xf32>
    %323 = arith.mulf %316, %281 : vector<2x32xf32>
    %324 = arith.mulf %311, %317 : vector<2x32xf32>
    %325 = arith.addf %323, %324 : vector<2x32xf32>
    %326 = math.tanh %325 : vector<2x32xf32>
    %327 = arith.mulf %322, %326 : vector<2x32xf32>
    %c0_211 = arith.constant 0 : index
    %c0_212 = arith.constant 0 : index
    %c0_213 = arith.constant 0 : index
    %328 = vector.load %arg9[%c0_211, %c0_212, %c0_213] : memref<2x2x32xf32, #tpu.memory_space<vmem>>, vector<1x2x32xf32>
    %329 = vector.shape_cast %328 : vector<1x2x32xf32> to vector<2x32xf32>
    %330 = vector.shape_cast %327 : vector<2x32xf32> to vector<1x2x32xf32>
    tpu.vector_store %arg9[%c0_211, %c0_212, %c0_213], %330 {strides = array<i32>} : memref<2x2x32xf32, #tpu.memory_space<vmem>>, vector<1x2x32xf32>,
    %c0_214 = arith.constant 0 : index
    %c0_215 = arith.constant 0 : index
    %c0_216 = arith.constant 0 : index
    %331 = vector.load %arg10[%c0_214, %c0_215, %c0_216] : memref<2x2x32xf32, #tpu.memory_space<vmem>>, vector<1x2x32xf32>
    %332 = vector.shape_cast %331 : vector<1x2x32xf32> to vector<2x32xf32>
    %333 = vector.shape_cast %325 : vector<2x32xf32> to vector<1x2x32xf32>
    tpu.vector_store %arg10[%c0_214, %c0_215, %c0_216], %333 {strides = array<i32>} : memref<2x2x32xf32, #tpu.memory_space<vmem>>, vector<1x2x32xf32>,
    %c1_217 = arith.constant 1 : index
    %c0_218 = arith.constant 0 : index
    %c0_219 = arith.constant 0 : index
    %334 = vector.load %arg9[%c1_217, %c0_218, %c0_219] : memref<2x2x32xf32, #tpu.memory_space<vmem>>, vector<1x2x32xf32>
    %335 = vector.shape_cast %334 : vector<1x2x32xf32> to vector<2x32xf32>
    %c1_220 = arith.constant 1 : index
    %c0_221 = arith.constant 0 : index
    %c0_222 = arith.constant 0 : index
    %336 = vector.load %arg10[%c1_220, %c0_221, %c0_222] : memref<2x2x32xf32, #tpu.memory_space<vmem>>, vector<1x2x32xf32>
    %337 = vector.shape_cast %336 : vector<1x2x32xf32> to vector<2x32xf32>
    %338 = arith.truncf %327 : vector<2x32xf32> to vector<2x32xbf16>
    %339 = arith.truncf %335 : vector<2x32xf32> to vector<2x32xbf16>
    %c0_223 = arith.constant 0 : index
    %c0_224 = arith.constant 0 : index
    %c0_225 = arith.constant 0 : index
    %340 = vector.load %arg3[%c0_223, %c0_224, %c0_225] : memref<4x32x32xbf16, #tpu.memory_space<vmem>>, vector<1x32x32xbf16>
    %341 = vector.shape_cast %340 : vector<1x32x32xbf16> to vector<32x32xbf16>
    %cst_226 = arith.constant dense<0.000000e+00> : vector<2x32xf32>
    %342 = tpu.matmul %338, %341, %cst_226 {dimension_numbers = #tpu.dot_dimension_numbers<[1], [0], [0], [1], [0, 0, 1, 1], [], []>} : vector<2x32xbf16>, vector<32x32xbf16>, vector<2x32xf32> -> vector<2x32xf32>
    %c0_227 = arith.constant 0 : index
    %c0_228 = arith.constant 0 : index
    %c0_229 = arith.constant 0 : index
    %343 = vector.load %arg4[%c0_227, %c0_228, %c0_229] : memref<4x32x32xbf16, #tpu.memory_space<vmem>>, vector<1x32x32xbf16>
    %344 = vector.shape_cast %343 : vector<1x32x32xbf16> to vector<32x32xbf16>
    %cst_230 = arith.constant dense<0.000000e+00> : vector<2x32xf32>
    %345 = tpu.matmul %339, %344, %cst_230 {dimension_numbers = #tpu.dot_dimension_numbers<[1], [0], [0], [1], [0, 0, 1, 1], [], []>} : vector<2x32xbf16>, vector<32x32xbf16>, vector<2x32xf32> -> vector<2x32xf32>
    %346 = arith.addf %342, %345 : vector<2x32xf32>
    %c0_231 = arith.constant 0 : index
    %c0_232 = arith.constant 0 : index
    %c0_233 = arith.constant 0 : index
    %347 = vector.load %arg5[%c0_231, %c0_232, %c0_233] : memref<4x1x32xf32, #tpu.memory_space<vmem>>, vector<1x1x32xf32>
    %348 = vector.shape_cast %347 : vector<1x1x32xf32> to vector<1x32xf32>
    %349 = vector.broadcast %348 : vector<1x32xf32> to vector<2x32xf32>
    %350 = arith.addf %346, %349 : vector<2x32xf32>
    %c1_234 = arith.constant 1 : index
    %c0_235 = arith.constant 0 : index
    %c0_236 = arith.constant 0 : index
    %351 = vector.load %arg3[%c1_234, %c0_235, %c0_236] : memref<4x32x32xbf16, #tpu.memory_space<vmem>>, vector<1x32x32xbf16>
    %352 = vector.shape_cast %351 : vector<1x32x32xbf16> to vector<32x32xbf16>
    %cst_237 = arith.constant dense<0.000000e+00> : vector<2x32xf32>
    %353 = tpu.matmul %338, %352, %cst_237 {dimension_numbers = #tpu.dot_dimension_numbers<[1], [0], [0], [1], [0, 0, 1, 1], [], []>} : vector<2x32xbf16>, vector<32x32xbf16>, vector<2x32xf32> -> vector<2x32xf32>
    %c1_238 = arith.constant 1 : index
    %c0_239 = arith.constant 0 : index
    %c0_240 = arith.constant 0 : index
    %354 = vector.load %arg4[%c1_238, %c0_239, %c0_240] : memref<4x32x32xbf16, #tpu.memory_space<vmem>>, vector<1x32x32xbf16>
    %355 = vector.shape_cast %354 : vector<1x32x32xbf16> to vector<32x32xbf16>
    %cst_241 = arith.constant dense<0.000000e+00> : vector<2x32xf32>
    %356 = tpu.matmul %339, %355, %cst_241 {dimension_numbers = #tpu.dot_dimension_numbers<[1], [0], [0], [1], [0, 0, 1, 1], [], []>} : vector<2x32xbf16>, vector<32x32xbf16>, vector<2x32xf32> -> vector<2x32xf32>
    %357 = arith.addf %353, %356 : vector<2x32xf32>
    %c1_242 = arith.constant 1 : index
    %c0_243 = arith.constant 0 : index
    %c0_244 = arith.constant 0 : index
    %358 = vector.load %arg5[%c1_242, %c0_243, %c0_244] : memref<4x1x32xf32, #tpu.memory_space<vmem>>, vector<1x1x32xf32>
    %359 = vector.shape_cast %358 : vector<1x1x32xf32> to vector<1x32xf32>
    %360 = vector.broadcast %359 : vector<1x32xf32> to vector<2x32xf32>
    %361 = arith.addf %357, %360 : vector<2x32xf32>
    %c2_245 = arith.constant 2 : index
    %c0_246 = arith.constant 0 : index
    %c0_247 = arith.constant 0 : index
    %362 = vector.load %arg3[%c2_245, %c0_246, %c0_247] : memref<4x32x32xbf16, #tpu.memory_space<vmem>>, vector<1x32x32xbf16>
    %363 = vector.shape_cast %362 : vector<1x32x32xbf16> to vector<32x32xbf16>
    %cst_248 = arith.constant dense<0.000000e+00> : vector<2x32xf32>
    %364 = tpu.matmul %338, %363, %cst_248 {dimension_numbers = #tpu.dot_dimension_numbers<[1], [0], [0], [1], [0, 0, 1, 1], [], []>} : vector<2x32xbf16>, vector<32x32xbf16>, vector<2x32xf32> -> vector<2x32xf32>
    %c2_249 = arith.constant 2 : index
    %c0_250 = arith.constant 0 : index
    %c0_251 = arith.constant 0 : index
    %365 = vector.load %arg4[%c2_249, %c0_250, %c0_251] : memref<4x32x32xbf16, #tpu.memory_space<vmem>>, vector<1x32x32xbf16>
    %366 = vector.shape_cast %365 : vector<1x32x32xbf16> to vector<32x32xbf16>
    %cst_252 = arith.constant dense<0.000000e+00> : vector<2x32xf32>
    %367 = tpu.matmul %339, %366, %cst_252 {dimension_numbers = #tpu.dot_dimension_numbers<[1], [0], [0], [1], [0, 0, 1, 1], [], []>} : vector<2x32xbf16>, vector<32x32xbf16>, vector<2x32xf32> -> vector<2x32xf32>
    %368 = arith.addf %364, %367 : vector<2x32xf32>
    %c2_253 = arith.constant 2 : index
    %c0_254 = arith.constant 0 : index
    %c0_255 = arith.constant 0 : index
    %369 = vector.load %arg5[%c2_253, %c0_254, %c0_255] : memref<4x1x32xf32, #tpu.memory_space<vmem>>, vector<1x1x32xf32>
    %370 = vector.shape_cast %369 : vector<1x1x32xf32> to vector<1x32xf32>
    %371 = vector.broadcast %370 : vector<1x32xf32> to vector<2x32xf32>
    %372 = arith.addf %368, %371 : vector<2x32xf32>
    %c3_256 = arith.constant 3 : index
    %c0_257 = arith.constant 0 : index
    %c0_258 = arith.constant 0 : index
    %373 = vector.load %arg3[%c3_256, %c0_257, %c0_258] : memref<4x32x32xbf16, #tpu.memory_space<vmem>>, vector<1x32x32xbf16>
    %374 = vector.shape_cast %373 : vector<1x32x32xbf16> to vector<32x32xbf16>
    %cst_259 = arith.constant dense<0.000000e+00> : vector<2x32xf32>
    %375 = tpu.matmul %338, %374, %cst_259 {dimension_numbers = #tpu.dot_dimension_numbers<[1], [0], [0], [1], [0, 0, 1, 1], [], []>} : vector<2x32xbf16>, vector<32x32xbf16>, vector<2x32xf32> -> vector<2x32xf32>
    %c3_260 = arith.constant 3 : index
    %c0_261 = arith.constant 0 : index
    %c0_262 = arith.constant 0 : index
    %376 = vector.load %arg4[%c3_260, %c0_261, %c0_262] : memref<4x32x32xbf16, #tpu.memory_space<vmem>>, vector<1x32x32xbf16>
    %377 = vector.shape_cast %376 : vector<1x32x32xbf16> to vector<32x32xbf16>
    %cst_263 = arith.constant dense<0.000000e+00> : vector<2x32xf32>
    %378 = tpu.matmul %339, %377, %cst_263 {dimension_numbers = #tpu.dot_dimension_numbers<[1], [0], [0], [1], [0, 0, 1, 1], [], []>} : vector<2x32xbf16>, vector<32x32xbf16>, vector<2x32xf32> -> vector<2x32xf32>
    %379 = arith.addf %375, %378 : vector<2x32xf32>
    %c3_264 = arith.constant 3 : index
    %c0_265 = arith.constant 0 : index
    %c0_266 = arith.constant 0 : index
    %380 = vector.load %arg5[%c3_264, %c0_265, %c0_266] : memref<4x1x32xf32, #tpu.memory_space<vmem>>, vector<1x1x32xf32>
    %381 = vector.shape_cast %380 : vector<1x1x32xf32> to vector<1x32xf32>
    %382 = vector.broadcast %381 : vector<1x32xf32> to vector<2x32xf32>
    %383 = arith.addf %379, %382 : vector<2x32xf32>
    %384 = arith.negf %350 : vector<2x32xf32>
    %385 = math.exp %384 : vector<2x32xf32>
    %cst_267 = arith.constant 1.000000e+00 : f32
    %386 = vector.broadcast %cst_267 : f32 to vector<2x32xf32>
    %387 = arith.addf %386, %385 : vector<2x32xf32>
    %388 = arith.divf %386, %387 : vector<2x32xf32>
    %389 = arith.negf %361 : vector<2x32xf32>
    %390 = math.exp %389 : vector<2x32xf32>
    %cst_268 = arith.constant 1.000000e+00 : f32
    %391 = vector.broadcast %cst_268 : f32 to vector<2x32xf32>
    %392 = arith.addf %391, %390 : vector<2x32xf32>
    %393 = arith.divf %391, %392 : vector<2x32xf32>
    %394 = math.tanh %372 : vector<2x32xf32>
    %395 = arith.negf %383 : vector<2x32xf32>
    %396 = math.exp %395 : vector<2x32xf32>
    %cst_269 = arith.constant 1.000000e+00 : f32
    %397 = vector.broadcast %cst_269 : f32 to vector<2x32xf32>
    %398 = arith.addf %397, %396 : vector<2x32xf32>
    %399 = arith.divf %397, %398 : vector<2x32xf32>
    %400 = arith.mulf %393, %337 : vector<2x32xf32>
    %401 = arith.mulf %388, %394 : vector<2x32xf32>
    %402 = arith.addf %400, %401 : vector<2x32xf32>
    %403 = math.tanh %402 : vector<2x32xf32>
    %404 = arith.mulf %399, %403 : vector<2x32xf32>
    %c1_270 = arith.constant 1 : index
    %c0_271 = arith.constant 0 : index
    %c0_272 = arith.constant 0 : index
    %405 = vector.load %arg9[%c1_270, %c0_271, %c0_272] : memref<2x2x32xf32, #tpu.memory_space<vmem>>, vector<1x2x32xf32>
    %406 = vector.shape_cast %405 : vector<1x2x32xf32> to vector<2x32xf32>
    %407 = vector.shape_cast %404 : vector<2x32xf32> to vector<1x2x32xf32>
    tpu.vector_store %arg9[%c1_270, %c0_271, %c0_272], %407 {strides = array<i32>} : memref<2x2x32xf32, #tpu.memory_space<vmem>>, vector<1x2x32xf32>,
    %c1_273 = arith.constant 1 : index
    %c0_274 = arith.constant 0 : index
    %c0_275 = arith.constant 0 : index
    %408 = vector.load %arg10[%c1_273, %c0_274, %c0_275] : memref<2x2x32xf32, #tpu.memory_space<vmem>>, vector<1x2x32xf32>
    %409 = vector.shape_cast %408 : vector<1x2x32xf32> to vector<2x32xf32>
    %410 = vector.shape_cast %402 : vector<2x32xf32> to vector<1x2x32xf32>
    tpu.vector_store %arg10[%c1_273, %c0_274, %c0_275], %410 {strides = array<i32>} : memref<2x2x32xf32, #tpu.memory_space<vmem>>, vector<1x2x32xf32>,
    %c3_i32 = arith.constant 3 : i32
    %411 = arith.index_cast %c3_i32 : i32 to index
    %c0_276 = arith.constant 0 : index
    %c0_277 = arith.constant 0 : index
    %c0_278 = arith.constant 0 : index
    %412 = vector.load %arg1[%411, %c0_276, %c0_277, %c0_278] : memref<8x4x2x32xf32, #tpu.memory_space<vmem>>, vector<1x4x2x32xf32>
    %413 = vector.shape_cast %412 : vector<1x4x2x32xf32> to vector<4x2x32xf32>
    %c0_279 = arith.constant 0 : index
    %c0_280 = arith.constant 0 : index
    %c0_281 = arith.constant 0 : index
    %414 = vector.load %arg9[%c0_279, %c0_280, %c0_281] : memref<2x2x32xf32, #tpu.memory_space<vmem>>, vector<1x2x32xf32>
    %415 = vector.shape_cast %414 : vector<1x2x32xf32> to vector<2x32xf32>
    %c0_282 = arith.constant 0 : index
    %c0_283 = arith.constant 0 : index
    %c0_284 = arith.constant 0 : index
    %416 = vector.load %arg10[%c0_282, %c0_283, %c0_284] : memref<2x2x32xf32, #tpu.memory_space<vmem>>, vector<1x2x32xf32>
    %417 = vector.shape_cast %416 : vector<1x2x32xf32> to vector<2x32xf32>
    %418 = arith.truncf %415 : vector<2x32xf32> to vector<2x32xbf16>
    %419 = vector.extract_strided_slice %413 {offsets = [0, 0, 0], sizes = [1, 2, 32], strides = [1, 1, 1]} : vector<4x2x32xf32> to vector<1x2x32xf32>
    %420 = vector.shape_cast %419 : vector<1x2x32xf32> to vector<2x32xf32>
    %c0_285 = arith.constant 0 : index
    %c0_286 = arith.constant 0 : index
    %c0_287 = arith.constant 0 : index
    %421 = vector.load %arg2[%c0_285, %c0_286, %c0_287] : memref<4x32x32xbf16, #tpu.memory_space<vmem>>, vector<1x32x32xbf16>
    %422 = vector.shape_cast %421 : vector<1x32x32xbf16> to vector<32x32xbf16>
    %cst_288 = arith.constant dense<0.000000e+00> : vector<2x32xf32>
    %423 = tpu.matmul %418, %422, %cst_288 {dimension_numbers = #tpu.dot_dimension_numbers<[1], [0], [0], [1], [0, 0, 1, 1], [], []>} : vector<2x32xbf16>, vector<32x32xbf16>, vector<2x32xf32> -> vector<2x32xf32>
    %424 = arith.addf %420, %423 : vector<2x32xf32>
    %425 = vector.extract_strided_slice %413 {offsets = [1, 0, 0], sizes = [1, 2, 32], strides = [1, 1, 1]} : vector<4x2x32xf32> to vector<1x2x32xf32>
    %426 = vector.shape_cast %425 : vector<1x2x32xf32> to vector<2x32xf32>
    %c1_289 = arith.constant 1 : index
    %c0_290 = arith.constant 0 : index
    %c0_291 = arith.constant 0 : index
    %427 = vector.load %arg2[%c1_289, %c0_290, %c0_291] : memref<4x32x32xbf16, #tpu.memory_space<vmem>>, vector<1x32x32xbf16>
    %428 = vector.shape_cast %427 : vector<1x32x32xbf16> to vector<32x32xbf16>
    %cst_292 = arith.constant dense<0.000000e+00> : vector<2x32xf32>
    %429 = tpu.matmul %418, %428, %cst_292 {dimension_numbers = #tpu.dot_dimension_numbers<[1], [0], [0], [1], [0, 0, 1, 1], [], []>} : vector<2x32xbf16>, vector<32x32xbf16>, vector<2x32xf32> -> vector<2x32xf32>
    %430 = arith.addf %426, %429 : vector<2x32xf32>
    %431 = vector.extract_strided_slice %413 {offsets = [2, 0, 0], sizes = [1, 2, 32], strides = [1, 1, 1]} : vector<4x2x32xf32> to vector<1x2x32xf32>
    %432 = vector.shape_cast %431 : vector<1x2x32xf32> to vector<2x32xf32>
    %c2_293 = arith.constant 2 : index
    %c0_294 = arith.constant 0 : index
    %c0_295 = arith.constant 0 : index
    %433 = vector.load %arg2[%c2_293, %c0_294, %c0_295] : memref<4x32x32xbf16, #tpu.memory_space<vmem>>, vector<1x32x32xbf16>
    %434 = vector.shape_cast %433 : vector<1x32x32xbf16> to vector<32x32xbf16>
    %cst_296 = arith.constant dense<0.000000e+00> : vector<2x32xf32>
    %435 = tpu.matmul %418, %434, %cst_296 {dimension_numbers = #tpu.dot_dimension_numbers<[1], [0], [0], [1], [0, 0, 1, 1], [], []>} : vector<2x32xbf16>, vector<32x32xbf16>, vector<2x32xf32> -> vector<2x32xf32>
    %436 = arith.addf %432, %435 : vector<2x32xf32>
    %437 = vector.extract_strided_slice %413 {offsets = [3, 0, 0], sizes = [1, 2, 32], strides = [1, 1, 1]} : vector<4x2x32xf32> to vector<1x2x32xf32>
    %438 = vector.shape_cast %437 : vector<1x2x32xf32> to vector<2x32xf32>
    %c3_297 = arith.constant 3 : index
    %c0_298 = arith.constant 0 : index
    %c0_299 = arith.constant 0 : index
    %439 = vector.load %arg2[%c3_297, %c0_298, %c0_299] : memref<4x32x32xbf16, #tpu.memory_space<vmem>>, vector<1x32x32xbf16>
    %440 = vector.shape_cast %439 : vector<1x32x32xbf16> to vector<32x32xbf16>
    %cst_300 = arith.constant dense<0.000000e+00> : vector<2x32xf32>
    %441 = tpu.matmul %418, %440, %cst_300 {dimension_numbers = #tpu.dot_dimension_numbers<[1], [0], [0], [1], [0, 0, 1, 1], [], []>} : vector<2x32xbf16>, vector<32x32xbf16>, vector<2x32xf32> -> vector<2x32xf32>
    %442 = arith.addf %438, %441 : vector<2x32xf32>
    %443 = arith.negf %424 : vector<2x32xf32>
    %444 = math.exp %443 : vector<2x32xf32>
    %cst_301 = arith.constant 1.000000e+00 : f32
    %445 = vector.broadcast %cst_301 : f32 to vector<2x32xf32>
    %446 = arith.addf %445, %444 : vector<2x32xf32>
    %447 = arith.divf %445, %446 : vector<2x32xf32>
    %448 = arith.negf %430 : vector<2x32xf32>
    %449 = math.exp %448 : vector<2x32xf32>
    %cst_302 = arith.constant 1.000000e+00 : f32
    %450 = vector.broadcast %cst_302 : f32 to vector<2x32xf32>
    %451 = arith.addf %450, %449 : vector<2x32xf32>
    %452 = arith.divf %450, %451 : vector<2x32xf32>
    %453 = math.tanh %436 : vector<2x32xf32>
    %454 = arith.negf %442 : vector<2x32xf32>
    %455 = math.exp %454 : vector<2x32xf32>
    %cst_303 = arith.constant 1.000000e+00 : f32
    %456 = vector.broadcast %cst_303 : f32 to vector<2x32xf32>
    %457 = arith.addf %456, %455 : vector<2x32xf32>
    %458 = arith.divf %456, %457 : vector<2x32xf32>
    %459 = arith.mulf %452, %417 : vector<2x32xf32>
    %460 = arith.mulf %447, %453 : vector<2x32xf32>
    %461 = arith.addf %459, %460 : vector<2x32xf32>
    %462 = math.tanh %461 : vector<2x32xf32>
    %463 = arith.mulf %458, %462 : vector<2x32xf32>
    %c0_304 = arith.constant 0 : index
    %c0_305 = arith.constant 0 : index
    %c0_306 = arith.constant 0 : index
    %464 = vector.load %arg9[%c0_304, %c0_305, %c0_306] : memref<2x2x32xf32, #tpu.memory_space<vmem>>, vector<1x2x32xf32>
    %465 = vector.shape_cast %464 : vector<1x2x32xf32> to vector<2x32xf32>
    %466 = vector.shape_cast %463 : vector<2x32xf32> to vector<1x2x32xf32>
    tpu.vector_store %arg9[%c0_304, %c0_305, %c0_306], %466 {strides = array<i32>} : memref<2x2x32xf32, #tpu.memory_space<vmem>>, vector<1x2x32xf32>,
    %c0_307 = arith.constant 0 : index
    %c0_308 = arith.constant 0 : index
    %c0_309 = arith.constant 0 : index
    %467 = vector.load %arg10[%c0_307, %c0_308, %c0_309] : memref<2x2x32xf32, #tpu.memory_space<vmem>>, vector<1x2x32xf32>
    %468 = vector.shape_cast %467 : vector<1x2x32xf32> to vector<2x32xf32>
    %469 = vector.shape_cast %461 : vector<2x32xf32> to vector<1x2x32xf32>
    tpu.vector_store %arg10[%c0_307, %c0_308, %c0_309], %469 {strides = array<i32>} : memref<2x2x32xf32, #tpu.memory_space<vmem>>, vector<1x2x32xf32>,
    %c1_310 = arith.constant 1 : index
    %c0_311 = arith.constant 0 : index
    %c0_312 = arith.constant 0 : index
    %470 = vector.load %arg9[%c1_310, %c0_311, %c0_312] : memref<2x2x32xf32, #tpu.memory_space<vmem>>, vector<1x2x32xf32>
    %471 = vector.shape_cast %470 : vector<1x2x32xf32> to vector<2x32xf32>
    %c1_313 = arith.constant 1 : index
    %c0_314 = arith.constant 0 : index
    %c0_315 = arith.constant 0 : index
    %472 = vector.load %arg10[%c1_313, %c0_314, %c0_315] : memref<2x2x32xf32, #tpu.memory_space<vmem>>, vector<1x2x32xf32>
    %473 = vector.shape_cast %472 : vector<1x2x32xf32> to vector<2x32xf32>
    %474 = arith.truncf %463 : vector<2x32xf32> to vector<2x32xbf16>
    %475 = arith.truncf %471 : vector<2x32xf32> to vector<2x32xbf16>
    %c0_316 = arith.constant 0 : index
    %c0_317 = arith.constant 0 : index
    %c0_318 = arith.constant 0 : index
    %476 = vector.load %arg3[%c0_316, %c0_317, %c0_318] : memref<4x32x32xbf16, #tpu.memory_space<vmem>>, vector<1x32x32xbf16>
    %477 = vector.shape_cast %476 : vector<1x32x32xbf16> to vector<32x32xbf16>
    %cst_319 = arith.constant dense<0.000000e+00> : vector<2x32xf32>
    %478 = tpu.matmul %474, %477, %cst_319 {dimension_numbers = #tpu.dot_dimension_numbers<[1], [0], [0], [1], [0, 0, 1, 1], [], []>} : vector<2x32xbf16>, vector<32x32xbf16>, vector<2x32xf32> -> vector<2x32xf32>
    %c0_320 = arith.constant 0 : index
    %c0_321 = arith.constant 0 : index
    %c0_322 = arith.constant 0 : index
    %479 = vector.load %arg4[%c0_320, %c0_321, %c0_322] : memref<4x32x32xbf16, #tpu.memory_space<vmem>>, vector<1x32x32xbf16>
    %480 = vector.shape_cast %479 : vector<1x32x32xbf16> to vector<32x32xbf16>
    %cst_323 = arith.constant dense<0.000000e+00> : vector<2x32xf32>
    %481 = tpu.matmul %475, %480, %cst_323 {dimension_numbers = #tpu.dot_dimension_numbers<[1], [0], [0], [1], [0, 0, 1, 1], [], []>} : vector<2x32xbf16>, vector<32x32xbf16>, vector<2x32xf32> -> vector<2x32xf32>
    %482 = arith.addf %478, %481 : vector<2x32xf32>
    %c0_324 = arith.constant 0 : index
    %c0_325 = arith.constant 0 : index
    %c0_326 = arith.constant 0 : index
    %483 = vector.load %arg5[%c0_324, %c0_325, %c0_326] : memref<4x1x32xf32, #tpu.memory_space<vmem>>, vector<1x1x32xf32>
    %484 = vector.shape_cast %483 : vector<1x1x32xf32> to vector<1x32xf32>
    %485 = vector.broadcast %484 : vector<1x32xf32> to vector<2x32xf32>
    %486 = arith.addf %482, %485 : vector<2x32xf32>
    %c1_327 = arith.constant 1 : index
    %c0_328 = arith.constant 0 : index
    %c0_329 = arith.constant 0 : index
    %487 = vector.load %arg3[%c1_327, %c0_328, %c0_329] : memref<4x32x32xbf16, #tpu.memory_space<vmem>>, vector<1x32x32xbf16>
    %488 = vector.shape_cast %487 : vector<1x32x32xbf16> to vector<32x32xbf16>
    %cst_330 = arith.constant dense<0.000000e+00> : vector<2x32xf32>
    %489 = tpu.matmul %474, %488, %cst_330 {dimension_numbers = #tpu.dot_dimension_numbers<[1], [0], [0], [1], [0, 0, 1, 1], [], []>} : vector<2x32xbf16>, vector<32x32xbf16>, vector<2x32xf32> -> vector<2x32xf32>
    %c1_331 = arith.constant 1 : index
    %c0_332 = arith.constant 0 : index
    %c0_333 = arith.constant 0 : index
    %490 = vector.load %arg4[%c1_331, %c0_332, %c0_333] : memref<4x32x32xbf16, #tpu.memory_space<vmem>>, vector<1x32x32xbf16>
    %491 = vector.shape_cast %490 : vector<1x32x32xbf16> to vector<32x32xbf16>
    %cst_334 = arith.constant dense<0.000000e+00> : vector<2x32xf32>
    %492 = tpu.matmul %475, %491, %cst_334 {dimension_numbers = #tpu.dot_dimension_numbers<[1], [0], [0], [1], [0, 0, 1, 1], [], []>} : vector<2x32xbf16>, vector<32x32xbf16>, vector<2x32xf32> -> vector<2x32xf32>
    %493 = arith.addf %489, %492 : vector<2x32xf32>
    %c1_335 = arith.constant 1 : index
    %c0_336 = arith.constant 0 : index
    %c0_337 = arith.constant 0 : index
    %494 = vector.load %arg5[%c1_335, %c0_336, %c0_337] : memref<4x1x32xf32, #tpu.memory_space<vmem>>, vector<1x1x32xf32>
    %495 = vector.shape_cast %494 : vector<1x1x32xf32> to vector<1x32xf32>
    %496 = vector.broadcast %495 : vector<1x32xf32> to vector<2x32xf32>
    %497 = arith.addf %493, %496 : vector<2x32xf32>
    %c2_338 = arith.constant 2 : index
    %c0_339 = arith.constant 0 : index
    %c0_340 = arith.constant 0 : index
    %498 = vector.load %arg3[%c2_338, %c0_339, %c0_340] : memref<4x32x32xbf16, #tpu.memory_space<vmem>>, vector<1x32x32xbf16>
    %499 = vector.shape_cast %498 : vector<1x32x32xbf16> to vector<32x32xbf16>
    %cst_341 = arith.constant dense<0.000000e+00> : vector<2x32xf32>
    %500 = tpu.matmul %474, %499, %cst_341 {dimension_numbers = #tpu.dot_dimension_numbers<[1], [0], [0], [1], [0, 0, 1, 1], [], []>} : vector<2x32xbf16>, vector<32x32xbf16>, vector<2x32xf32> -> vector<2x32xf32>
    %c2_342 = arith.constant 2 : index
    %c0_343 = arith.constant 0 : index
    %c0_344 = arith.constant 0 : index
    %501 = vector.load %arg4[%c2_342, %c0_343, %c0_344] : memref<4x32x32xbf16, #tpu.memory_space<vmem>>, vector<1x32x32xbf16>
    %502 = vector.shape_cast %501 : vector<1x32x32xbf16> to vector<32x32xbf16>
    %cst_345 = arith.constant dense<0.000000e+00> : vector<2x32xf32>
    %503 = tpu.matmul %475, %502, %cst_345 {dimension_numbers = #tpu.dot_dimension_numbers<[1], [0], [0], [1], [0, 0, 1, 1], [], []>} : vector<2x32xbf16>, vector<32x32xbf16>, vector<2x32xf32> -> vector<2x32xf32>
    %504 = arith.addf %500, %503 : vector<2x32xf32>
    %c2_346 = arith.constant 2 : index
    %c0_347 = arith.constant 0 : index
    %c0_348 = arith.constant 0 : index
    %505 = vector.load %arg5[%c2_346, %c0_347, %c0_348] : memref<4x1x32xf32, #tpu.memory_space<vmem>>, vector<1x1x32xf32>
    %506 = vector.shape_cast %505 : vector<1x1x32xf32> to vector<1x32xf32>
    %507 = vector.broadcast %506 : vector<1x32xf32> to vector<2x32xf32>
    %508 = arith.addf %504, %507 : vector<2x32xf32>
    %c3_349 = arith.constant 3 : index
    %c0_350 = arith.constant 0 : index
    %c0_351 = arith.constant 0 : index
    %509 = vector.load %arg3[%c3_349, %c0_350, %c0_351] : memref<4x32x32xbf16, #tpu.memory_space<vmem>>, vector<1x32x32xbf16>
    %510 = vector.shape_cast %509 : vector<1x32x32xbf16> to vector<32x32xbf16>
    %cst_352 = arith.constant dense<0.000000e+00> : vector<2x32xf32>
    %511 = tpu.matmul %474, %510, %cst_352 {dimension_numbers = #tpu.dot_dimension_numbers<[1], [0], [0], [1], [0, 0, 1, 1], [], []>} : vector<2x32xbf16>, vector<32x32xbf16>, vector<2x32xf32> -> vector<2x32xf32>
    %c3_353 = arith.constant 3 : index
    %c0_354 = arith.constant 0 : index
    %c0_355 = arith.constant 0 : index
    %512 = vector.load %arg4[%c3_353, %c0_354, %c0_355] : memref<4x32x32xbf16, #tpu.memory_space<vmem>>, vector<1x32x32xbf16>
    %513 = vector.shape_cast %512 : vector<1x32x32xbf16> to vector<32x32xbf16>
    %cst_356 = arith.constant dense<0.000000e+00> : vector<2x32xf32>
    %514 = tpu.matmul %475, %513, %cst_356 {dimension_numbers = #tpu.dot_dimension_numbers<[1], [0], [0], [1], [0, 0, 1, 1], [], []>} : vector<2x32xbf16>, vector<32x32xbf16>, vector<2x32xf32> -> vector<2x32xf32>
    %515 = arith.addf %511, %514 : vector<2x32xf32>
    %c3_357 = arith.constant 3 : index
    %c0_358 = arith.constant 0 : index
    %c0_359 = arith.constant 0 : index
    %516 = vector.load %arg5[%c3_357, %c0_358, %c0_359] : memref<4x1x32xf32, #tpu.memory_space<vmem>>, vector<1x1x32xf32>
    %517 = vector.shape_cast %516 : vector<1x1x32xf32> to vector<1x32xf32>
    %518 = vector.broadcast %517 : vector<1x32xf32> to vector<2x32xf32>
    %519 = arith.addf %515, %518 : vector<2x32xf32>
    %520 = arith.negf %486 : vector<2x32xf32>
    %521 = math.exp %520 : vector<2x32xf32>
    %cst_360 = arith.constant 1.000000e+00 : f32
    %522 = vector.broadcast %cst_360 : f32 to vector<2x32xf32>
    %523 = arith.addf %522, %521 : vector<2x32xf32>
    %524 = arith.divf %522, %523 : vector<2x32xf32>
    %525 = arith.negf %497 : vector<2x32xf32>
    %526 = math.exp %525 : vector<2x32xf32>
    %cst_361 = arith.constant 1.000000e+00 : f32
    %527 = vector.broadcast %cst_361 : f32 to vector<2x32xf32>
    %528 = arith.addf %527, %526 : vector<2x32xf32>
    %529 = arith.divf %527, %528 : vector<2x32xf32>
    %530 = math.tanh %508 : vector<2x32xf32>
    %531 = arith.negf %519 : vector<2x32xf32>
    %532 = math.exp %531 : vector<2x32xf32>
    %cst_362 = arith.constant 1.000000e+00 : f32
    %533 = vector.broadcast %cst_362 : f32 to vector<2x32xf32>
    %534 = arith.addf %533, %532 : vector<2x32xf32>
    %535 = arith.divf %533, %534 : vector<2x32xf32>
    %536 = arith.mulf %529, %473 : vector<2x32xf32>
    %537 = arith.mulf %524, %530 : vector<2x32xf32>
    %538 = arith.addf %536, %537 : vector<2x32xf32>
    %539 = math.tanh %538 : vector<2x32xf32>
    %540 = arith.mulf %535, %539 : vector<2x32xf32>
    %c1_363 = arith.constant 1 : index
    %c0_364 = arith.constant 0 : index
    %c0_365 = arith.constant 0 : index
    %541 = vector.load %arg9[%c1_363, %c0_364, %c0_365] : memref<2x2x32xf32, #tpu.memory_space<vmem>>, vector<1x2x32xf32>
    %542 = vector.shape_cast %541 : vector<1x2x32xf32> to vector<2x32xf32>
    %543 = vector.shape_cast %540 : vector<2x32xf32> to vector<1x2x32xf32>
    tpu.vector_store %arg9[%c1_363, %c0_364, %c0_365], %543 {strides = array<i32>} : memref<2x2x32xf32, #tpu.memory_space<vmem>>, vector<1x2x32xf32>,
    %c1_366 = arith.constant 1 : index
    %c0_367 = arith.constant 0 : index
    %c0_368 = arith.constant 0 : index
    %544 = vector.load %arg10[%c1_366, %c0_367, %c0_368] : memref<2x2x32xf32, #tpu.memory_space<vmem>>, vector<1x2x32xf32>
    %545 = vector.shape_cast %544 : vector<1x2x32xf32> to vector<2x32xf32>
    %546 = vector.shape_cast %538 : vector<2x32xf32> to vector<1x2x32xf32>
    tpu.vector_store %arg10[%c1_366, %c0_367, %c0_368], %546 {strides = array<i32>} : memref<2x2x32xf32, #tpu.memory_space<vmem>>, vector<1x2x32xf32>,
    %c4_i32 = arith.constant 4 : i32
    %547 = arith.index_cast %c4_i32 : i32 to index
    %c0_369 = arith.constant 0 : index
    %c0_370 = arith.constant 0 : index
    %c0_371 = arith.constant 0 : index
    %548 = vector.load %arg1[%547, %c0_369, %c0_370, %c0_371] : memref<8x4x2x32xf32, #tpu.memory_space<vmem>>, vector<1x4x2x32xf32>
    %549 = vector.shape_cast %548 : vector<1x4x2x32xf32> to vector<4x2x32xf32>
    %c0_372 = arith.constant 0 : index
    %c0_373 = arith.constant 0 : index
    %c0_374 = arith.constant 0 : index
    %550 = vector.load %arg9[%c0_372, %c0_373, %c0_374] : memref<2x2x32xf32, #tpu.memory_space<vmem>>, vector<1x2x32xf32>
    %551 = vector.shape_cast %550 : vector<1x2x32xf32> to vector<2x32xf32>
    %c0_375 = arith.constant 0 : index
    %c0_376 = arith.constant 0 : index
    %c0_377 = arith.constant 0 : index
    %552 = vector.load %arg10[%c0_375, %c0_376, %c0_377] : memref<2x2x32xf32, #tpu.memory_space<vmem>>, vector<1x2x32xf32>
    %553 = vector.shape_cast %552 : vector<1x2x32xf32> to vector<2x32xf32>
    %554 = arith.truncf %551 : vector<2x32xf32> to vector<2x32xbf16>
    %555 = vector.extract_strided_slice %549 {offsets = [0, 0, 0], sizes = [1, 2, 32], strides = [1, 1, 1]} : vector<4x2x32xf32> to vector<1x2x32xf32>
    %556 = vector.shape_cast %555 : vector<1x2x32xf32> to vector<2x32xf32>
    %c0_378 = arith.constant 0 : index
    %c0_379 = arith.constant 0 : index
    %c0_380 = arith.constant 0 : index
    %557 = vector.load %arg2[%c0_378, %c0_379, %c0_380] : memref<4x32x32xbf16, #tpu.memory_space<vmem>>, vector<1x32x32xbf16>
    %558 = vector.shape_cast %557 : vector<1x32x32xbf16> to vector<32x32xbf16>
    %cst_381 = arith.constant dense<0.000000e+00> : vector<2x32xf32>
    %559 = tpu.matmul %554, %558, %cst_381 {dimension_numbers = #tpu.dot_dimension_numbers<[1], [0], [0], [1], [0, 0, 1, 1], [], []>} : vector<2x32xbf16>, vector<32x32xbf16>, vector<2x32xf32> -> vector<2x32xf32>
    %560 = arith.addf %556, %559 : vector<2x32xf32>
    %561 = vector.extract_strided_slice %549 {offsets = [1, 0, 0], sizes = [1, 2, 32], strides = [1, 1, 1]} : vector<4x2x32xf32> to vector<1x2x32xf32>
    %562 = vector.shape_cast %561 : vector<1x2x32xf32> to vector<2x32xf32>
    %c1_382 = arith.constant 1 : index
    %c0_383 = arith.constant 0 : index
    %c0_384 = arith.constant 0 : index
    %563 = vector.load %arg2[%c1_382, %c0_383, %c0_384] : memref<4x32x32xbf16, #tpu.memory_space<vmem>>, vector<1x32x32xbf16>
    %564 = vector.shape_cast %563 : vector<1x32x32xbf16> to vector<32x32xbf16>
    %cst_385 = arith.constant dense<0.000000e+00> : vector<2x32xf32>
    %565 = tpu.matmul %554, %564, %cst_385 {dimension_numbers = #tpu.dot_dimension_numbers<[1], [0], [0], [1], [0, 0, 1, 1], [], []>} : vector<2x32xbf16>, vector<32x32xbf16>, vector<2x32xf32> -> vector<2x32xf32>
    %566 = arith.addf %562, %565 : vector<2x32xf32>
    %567 = vector.extract_strided_slice %549 {offsets = [2, 0, 0], sizes = [1, 2, 32], strides = [1, 1, 1]} : vector<4x2x32xf32> to vector<1x2x32xf32>
    %568 = vector.shape_cast %567 : vector<1x2x32xf32> to vector<2x32xf32>
    %c2_386 = arith.constant 2 : index
    %c0_387 = arith.constant 0 : index
    %c0_388 = arith.constant 0 : index
    %569 = vector.load %arg2[%c2_386, %c0_387, %c0_388] : memref<4x32x32xbf16, #tpu.memory_space<vmem>>, vector<1x32x32xbf16>
    %570 = vector.shape_cast %569 : vector<1x32x32xbf16> to vector<32x32xbf16>
    %cst_389 = arith.constant dense<0.000000e+00> : vector<2x32xf32>
    %571 = tpu.matmul %554, %570, %cst_389 {dimension_numbers = #tpu.dot_dimension_numbers<[1], [0], [0], [1], [0, 0, 1, 1], [], []>} : vector<2x32xbf16>, vector<32x32xbf16>, vector<2x32xf32> -> vector<2x32xf32>
    %572 = arith.addf %568, %571 : vector<2x32xf32>
    %573 = vector.extract_strided_slice %549 {offsets = [3, 0, 0], sizes = [1, 2, 32], strides = [1, 1, 1]} : vector<4x2x32xf32> to vector<1x2x32xf32>
    %574 = vector.shape_cast %573 : vector<1x2x32xf32> to vector<2x32xf32>
    %c3_390 = arith.constant 3 : index
    %c0_391 = arith.constant 0 : index
    %c0_392 = arith.constant 0 : index
    %575 = vector.load %arg2[%c3_390, %c0_391, %c0_392] : memref<4x32x32xbf16, #tpu.memory_space<vmem>>, vector<1x32x32xbf16>
    %576 = vector.shape_cast %575 : vector<1x32x32xbf16> to vector<32x32xbf16>
    %cst_393 = arith.constant dense<0.000000e+00> : vector<2x32xf32>
    %577 = tpu.matmul %554, %576, %cst_393 {dimension_numbers = #tpu.dot_dimension_numbers<[1], [0], [0], [1], [0, 0, 1, 1], [], []>} : vector<2x32xbf16>, vector<32x32xbf16>, vector<2x32xf32> -> vector<2x32xf32>
    %578 = arith.addf %574, %577 : vector<2x32xf32>
    %579 = arith.negf %560 : vector<2x32xf32>
    %580 = math.exp %579 : vector<2x32xf32>
    %cst_394 = arith.constant 1.000000e+00 : f32
    %581 = vector.broadcast %cst_394 : f32 to vector<2x32xf32>
    %582 = arith.addf %581, %580 : vector<2x32xf32>
    %583 = arith.divf %581, %582 : vector<2x32xf32>
    %584 = arith.negf %566 : vector<2x32xf32>
    %585 = math.exp %584 : vector<2x32xf32>
    %cst_395 = arith.constant 1.000000e+00 : f32
    %586 = vector.broadcast %cst_395 : f32 to vector<2x32xf32>
    %587 = arith.addf %586, %585 : vector<2x32xf32>
    %588 = arith.divf %586, %587 : vector<2x32xf32>
    %589 = math.tanh %572 : vector<2x32xf32>
    %590 = arith.negf %578 : vector<2x32xf32>
    %591 = math.exp %590 : vector<2x32xf32>
    %cst_396 = arith.constant 1.000000e+00 : f32
    %592 = vector.broadcast %cst_396 : f32 to vector<2x32xf32>
    %593 = arith.addf %592, %591 : vector<2x32xf32>
    %594 = arith.divf %592, %593 : vector<2x32xf32>
    %595 = arith.mulf %588, %553 : vector<2x32xf32>
    %596 = arith.mulf %583, %589 : vector<2x32xf32>
    %597 = arith.addf %595, %596 : vector<2x32xf32>
    %598 = math.tanh %597 : vector<2x32xf32>
    %599 = arith.mulf %594, %598 : vector<2x32xf32>
    %c0_397 = arith.constant 0 : index
    %c0_398 = arith.constant 0 : index
    %c0_399 = arith.constant 0 : index
    %600 = vector.load %arg9[%c0_397, %c0_398, %c0_399] : memref<2x2x32xf32, #tpu.memory_space<vmem>>, vector<1x2x32xf32>
    %601 = vector.shape_cast %600 : vector<1x2x32xf32> to vector<2x32xf32>
    %602 = vector.shape_cast %599 : vector<2x32xf32> to vector<1x2x32xf32>
    tpu.vector_store %arg9[%c0_397, %c0_398, %c0_399], %602 {strides = array<i32>} : memref<2x2x32xf32, #tpu.memory_space<vmem>>, vector<1x2x32xf32>,
    %c0_400 = arith.constant 0 : index
    %c0_401 = arith.constant 0 : index
    %c0_402 = arith.constant 0 : index
    %603 = vector.load %arg10[%c0_400, %c0_401, %c0_402] : memref<2x2x32xf32, #tpu.memory_space<vmem>>, vector<1x2x32xf32>
    %604 = vector.shape_cast %603 : vector<1x2x32xf32> to vector<2x32xf32>
    %605 = vector.shape_cast %597 : vector<2x32xf32> to vector<1x2x32xf32>
    tpu.vector_store %arg10[%c0_400, %c0_401, %c0_402], %605 {strides = array<i32>} : memref<2x2x32xf32, #tpu.memory_space<vmem>>, vector<1x2x32xf32>,
    %c1_403 = arith.constant 1 : index
    %c0_404 = arith.constant 0 : index
    %c0_405 = arith.constant 0 : index
    %606 = vector.load %arg9[%c1_403, %c0_404, %c0_405] : memref<2x2x32xf32, #tpu.memory_space<vmem>>, vector<1x2x32xf32>
    %607 = vector.shape_cast %606 : vector<1x2x32xf32> to vector<2x32xf32>
    %c1_406 = arith.constant 1 : index
    %c0_407 = arith.constant 0 : index
    %c0_408 = arith.constant 0 : index
    %608 = vector.load %arg10[%c1_406, %c0_407, %c0_408] : memref<2x2x32xf32, #tpu.memory_space<vmem>>, vector<1x2x32xf32>
    %609 = vector.shape_cast %608 : vector<1x2x32xf32> to vector<2x32xf32>
    %610 = arith.truncf %599 : vector<2x32xf32> to vector<2x32xbf16>
    %611 = arith.truncf %607 : vector<2x32xf32> to vector<2x32xbf16>
    %c0_409 = arith.constant 0 : index
    %c0_410 = arith.constant 0 : index
    %c0_411 = arith.constant 0 : index
    %612 = vector.load %arg3[%c0_409, %c0_410, %c0_411] : memref<4x32x32xbf16, #tpu.memory_space<vmem>>, vector<1x32x32xbf16>
    %613 = vector.shape_cast %612 : vector<1x32x32xbf16> to vector<32x32xbf16>
    %cst_412 = arith.constant dense<0.000000e+00> : vector<2x32xf32>
    %614 = tpu.matmul %610, %613, %cst_412 {dimension_numbers = #tpu.dot_dimension_numbers<[1], [0], [0], [1], [0, 0, 1, 1], [], []>} : vector<2x32xbf16>, vector<32x32xbf16>, vector<2x32xf32> -> vector<2x32xf32>
    %c0_413 = arith.constant 0 : index
    %c0_414 = arith.constant 0 : index
    %c0_415 = arith.constant 0 : index
    %615 = vector.load %arg4[%c0_413, %c0_414, %c0_415] : memref<4x32x32xbf16, #tpu.memory_space<vmem>>, vector<1x32x32xbf16>
    %616 = vector.shape_cast %615 : vector<1x32x32xbf16> to vector<32x32xbf16>
    %cst_416 = arith.constant dense<0.000000e+00> : vector<2x32xf32>
    %617 = tpu.matmul %611, %616, %cst_416 {dimension_numbers = #tpu.dot_dimension_numbers<[1], [0], [0], [1], [0, 0, 1, 1], [], []>} : vector<2x32xbf16>, vector<32x32xbf16>, vector<2x32xf32> -> vector<2x32xf32>
    %618 = arith.addf %614, %617 : vector<2x32xf32>
    %c0_417 = arith.constant 0 : index
    %c0_418 = arith.constant 0 : index
    %c0_419 = arith.constant 0 : index
    %619 = vector.load %arg5[%c0_417, %c0_418, %c0_419] : memref<4x1x32xf32, #tpu.memory_space<vmem>>, vector<1x1x32xf32>
    %620 = vector.shape_cast %619 : vector<1x1x32xf32> to vector<1x32xf32>
    %621 = vector.broadcast %620 : vector<1x32xf32> to vector<2x32xf32>
    %622 = arith.addf %618, %621 : vector<2x32xf32>
    %c1_420 = arith.constant 1 : index
    %c0_421 = arith.constant 0 : index
    %c0_422 = arith.constant 0 : index
    %623 = vector.load %arg3[%c1_420, %c0_421, %c0_422] : memref<4x32x32xbf16, #tpu.memory_space<vmem>>, vector<1x32x32xbf16>
    %624 = vector.shape_cast %623 : vector<1x32x32xbf16> to vector<32x32xbf16>
    %cst_423 = arith.constant dense<0.000000e+00> : vector<2x32xf32>
    %625 = tpu.matmul %610, %624, %cst_423 {dimension_numbers = #tpu.dot_dimension_numbers<[1], [0], [0], [1], [0, 0, 1, 1], [], []>} : vector<2x32xbf16>, vector<32x32xbf16>, vector<2x32xf32> -> vector<2x32xf32>
    %c1_424 = arith.constant 1 : index
    %c0_425 = arith.constant 0 : index
    %c0_426 = arith.constant 0 : index
    %626 = vector.load %arg4[%c1_424, %c0_425, %c0_426] : memref<4x32x32xbf16, #tpu.memory_space<vmem>>, vector<1x32x32xbf16>
    %627 = vector.shape_cast %626 : vector<1x32x32xbf16> to vector<32x32xbf16>
    %cst_427 = arith.constant dense<0.000000e+00> : vector<2x32xf32>
    %628 = tpu.matmul %611, %627, %cst_427 {dimension_numbers = #tpu.dot_dimension_numbers<[1], [0], [0], [1], [0, 0, 1, 1], [], []>} : vector<2x32xbf16>, vector<32x32xbf16>, vector<2x32xf32> -> vector<2x32xf32>
    %629 = arith.addf %625, %628 : vector<2x32xf32>
    %c1_428 = arith.constant 1 : index
    %c0_429 = arith.constant 0 : index
    %c0_430 = arith.constant 0 : index
    %630 = vector.load %arg5[%c1_428, %c0_429, %c0_430] : memref<4x1x32xf32, #tpu.memory_space<vmem>>, vector<1x1x32xf32>
    %631 = vector.shape_cast %630 : vector<1x1x32xf32> to vector<1x32xf32>
    %632 = vector.broadcast %631 : vector<1x32xf32> to vector<2x32xf32>
    %633 = arith.addf %629, %632 : vector<2x32xf32>
    %c2_431 = arith.constant 2 : index
    %c0_432 = arith.constant 0 : index
    %c0_433 = arith.constant 0 : index
    %634 = vector.load %arg3[%c2_431, %c0_432, %c0_433] : memref<4x32x32xbf16, #tpu.memory_space<vmem>>, vector<1x32x32xbf16>
    %635 = vector.shape_cast %634 : vector<1x32x32xbf16> to vector<32x32xbf16>
    %cst_434 = arith.constant dense<0.000000e+00> : vector<2x32xf32>
    %636 = tpu.matmul %610, %635, %cst_434 {dimension_numbers = #tpu.dot_dimension_numbers<[1], [0], [0], [1], [0, 0, 1, 1], [], []>} : vector<2x32xbf16>, vector<32x32xbf16>, vector<2x32xf32> -> vector<2x32xf32>
    %c2_435 = arith.constant 2 : index
    %c0_436 = arith.constant 0 : index
    %c0_437 = arith.constant 0 : index
    %637 = vector.load %arg4[%c2_435, %c0_436, %c0_437] : memref<4x32x32xbf16, #tpu.memory_space<vmem>>, vector<1x32x32xbf16>
    %638 = vector.shape_cast %637 : vector<1x32x32xbf16> to vector<32x32xbf16>
    %cst_438 = arith.constant dense<0.000000e+00> : vector<2x32xf32>
    %639 = tpu.matmul %611, %638, %cst_438 {dimension_numbers = #tpu.dot_dimension_numbers<[1], [0], [0], [1], [0, 0, 1, 1], [], []>} : vector<2x32xbf16>, vector<32x32xbf16>, vector<2x32xf32> -> vector<2x32xf32>
    %640 = arith.addf %636, %639 : vector<2x32xf32>
    %c2_439 = arith.constant 2 : index
    %c0_440 = arith.constant 0 : index
    %c0_441 = arith.constant 0 : index
    %641 = vector.load %arg5[%c2_439, %c0_440, %c0_441] : memref<4x1x32xf32, #tpu.memory_space<vmem>>, vector<1x1x32xf32>
    %642 = vector.shape_cast %641 : vector<1x1x32xf32> to vector<1x32xf32>
    %643 = vector.broadcast %642 : vector<1x32xf32> to vector<2x32xf32>
    %644 = arith.addf %640, %643 : vector<2x32xf32>
    %c3_442 = arith.constant 3 : index
    %c0_443 = arith.constant 0 : index
    %c0_444 = arith.constant 0 : index
    %645 = vector.load %arg3[%c3_442, %c0_443, %c0_444] : memref<4x32x32xbf16, #tpu.memory_space<vmem>>, vector<1x32x32xbf16>
    %646 = vector.shape_cast %645 : vector<1x32x32xbf16> to vector<32x32xbf16>
    %cst_445 = arith.constant dense<0.000000e+00> : vector<2x32xf32>
    %647 = tpu.matmul %610, %646, %cst_445 {dimension_numbers = #tpu.dot_dimension_numbers<[1], [0], [0], [1], [0, 0, 1, 1], [], []>} : vector<2x32xbf16>, vector<32x32xbf16>, vector<2x32xf32> -> vector<2x32xf32>
    %c3_446 = arith.constant 3 : index
    %c0_447 = arith.constant 0 : index
    %c0_448 = arith.constant 0 : index
    %648 = vector.load %arg4[%c3_446, %c0_447, %c0_448] : memref<4x32x32xbf16, #tpu.memory_space<vmem>>, vector<1x32x32xbf16>
    %649 = vector.shape_cast %648 : vector<1x32x32xbf16> to vector<32x32xbf16>
    %cst_449 = arith.constant dense<0.000000e+00> : vector<2x32xf32>
    %650 = tpu.matmul %611, %649, %cst_449 {dimension_numbers = #tpu.dot_dimension_numbers<[1], [0], [0], [1], [0, 0, 1, 1], [], []>} : vector<2x32xbf16>, vector<32x32xbf16>, vector<2x32xf32> -> vector<2x32xf32>
    %651 = arith.addf %647, %650 : vector<2x32xf32>
    %c3_450 = arith.constant 3 : index
    %c0_451 = arith.constant 0 : index
    %c0_452 = arith.constant 0 : index
    %652 = vector.load %arg5[%c3_450, %c0_451, %c0_452] : memref<4x1x32xf32, #tpu.memory_space<vmem>>, vector<1x1x32xf32>
    %653 = vector.shape_cast %652 : vector<1x1x32xf32> to vector<1x32xf32>
    %654 = vector.broadcast %653 : vector<1x32xf32> to vector<2x32xf32>
    %655 = arith.addf %651, %654 : vector<2x32xf32>
    %656 = arith.negf %622 : vector<2x32xf32>
    %657 = math.exp %656 : vector<2x32xf32>
    %cst_453 = arith.constant 1.000000e+00 : f32
    %658 = vector.broadcast %cst_453 : f32 to vector<2x32xf32>
    %659 = arith.addf %658, %657 : vector<2x32xf32>
    %660 = arith.divf %658, %659 : vector<2x32xf32>
    %661 = arith.negf %633 : vector<2x32xf32>
    %662 = math.exp %661 : vector<2x32xf32>
    %cst_454 = arith.constant 1.000000e+00 : f32
    %663 = vector.broadcast %cst_454 : f32 to vector<2x32xf32>
    %664 = arith.addf %663, %662 : vector<2x32xf32>
    %665 = arith.divf %663, %664 : vector<2x32xf32>
    %666 = math.tanh %644 : vector<2x32xf32>
    %667 = arith.negf %655 : vector<2x32xf32>
    %668 = math.exp %667 : vector<2x32xf32>
    %cst_455 = arith.constant 1.000000e+00 : f32
    %669 = vector.broadcast %cst_455 : f32 to vector<2x32xf32>
    %670 = arith.addf %669, %668 : vector<2x32xf32>
    %671 = arith.divf %669, %670 : vector<2x32xf32>
    %672 = arith.mulf %665, %609 : vector<2x32xf32>
    %673 = arith.mulf %660, %666 : vector<2x32xf32>
    %674 = arith.addf %672, %673 : vector<2x32xf32>
    %675 = math.tanh %674 : vector<2x32xf32>
    %676 = arith.mulf %671, %675 : vector<2x32xf32>
    %c1_456 = arith.constant 1 : index
    %c0_457 = arith.constant 0 : index
    %c0_458 = arith.constant 0 : index
    %677 = vector.load %arg9[%c1_456, %c0_457, %c0_458] : memref<2x2x32xf32, #tpu.memory_space<vmem>>, vector<1x2x32xf32>
    %678 = vector.shape_cast %677 : vector<1x2x32xf32> to vector<2x32xf32>
    %679 = vector.shape_cast %676 : vector<2x32xf32> to vector<1x2x32xf32>
    tpu.vector_store %arg9[%c1_456, %c0_457, %c0_458], %679 {strides = array<i32>} : memref<2x2x32xf32, #tpu.memory_space<vmem>>, vector<1x2x32xf32>,
    %c1_459 = arith.constant 1 : index
    %c0_460 = arith.constant 0 : index
    %c0_461 = arith.constant 0 : index
    %680 = vector.load %arg10[%c1_459, %c0_460, %c0_461] : memref<2x2x32xf32, #tpu.memory_space<vmem>>, vector<1x2x32xf32>
    %681 = vector.shape_cast %680 : vector<1x2x32xf32> to vector<2x32xf32>
    %682 = vector.shape_cast %674 : vector<2x32xf32> to vector<1x2x32xf32>
    tpu.vector_store %arg10[%c1_459, %c0_460, %c0_461], %682 {strides = array<i32>} : memref<2x2x32xf32, #tpu.memory_space<vmem>>, vector<1x2x32xf32>,
    %c5_i32 = arith.constant 5 : i32
    %683 = arith.index_cast %c5_i32 : i32 to index
    %c0_462 = arith.constant 0 : index
    %c0_463 = arith.constant 0 : index
    %c0_464 = arith.constant 0 : index
    %684 = vector.load %arg1[%683, %c0_462, %c0_463, %c0_464] : memref<8x4x2x32xf32, #tpu.memory_space<vmem>>, vector<1x4x2x32xf32>
    %685 = vector.shape_cast %684 : vector<1x4x2x32xf32> to vector<4x2x32xf32>
    %c0_465 = arith.constant 0 : index
    %c0_466 = arith.constant 0 : index
    %c0_467 = arith.constant 0 : index
    %686 = vector.load %arg9[%c0_465, %c0_466, %c0_467] : memref<2x2x32xf32, #tpu.memory_space<vmem>>, vector<1x2x32xf32>
    %687 = vector.shape_cast %686 : vector<1x2x32xf32> to vector<2x32xf32>
    %c0_468 = arith.constant 0 : index
    %c0_469 = arith.constant 0 : index
    %c0_470 = arith.constant 0 : index
    %688 = vector.load %arg10[%c0_468, %c0_469, %c0_470] : memref<2x2x32xf32, #tpu.memory_space<vmem>>, vector<1x2x32xf32>
    %689 = vector.shape_cast %688 : vector<1x2x32xf32> to vector<2x32xf32>
    %690 = arith.truncf %687 : vector<2x32xf32> to vector<2x32xbf16>
    %691 = vector.extract_strided_slice %685 {offsets = [0, 0, 0], sizes = [1, 2, 32], strides = [1, 1, 1]} : vector<4x2x32xf32> to vector<1x2x32xf32>
    %692 = vector.shape_cast %691 : vector<1x2x32xf32> to vector<2x32xf32>
    %c0_471 = arith.constant 0 : index
    %c0_472 = arith.constant 0 : index
    %c0_473 = arith.constant 0 : index
    %693 = vector.load %arg2[%c0_471, %c0_472, %c0_473] : memref<4x32x32xbf16, #tpu.memory_space<vmem>>, vector<1x32x32xbf16>
    %694 = vector.shape_cast %693 : vector<1x32x32xbf16> to vector<32x32xbf16>
    %cst_474 = arith.constant dense<0.000000e+00> : vector<2x32xf32>
    %695 = tpu.matmul %690, %694, %cst_474 {dimension_numbers = #tpu.dot_dimension_numbers<[1], [0], [0], [1], [0, 0, 1, 1], [], []>} : vector<2x32xbf16>, vector<32x32xbf16>, vector<2x32xf32> -> vector<2x32xf32>
    %696 = arith.addf %692, %695 : vector<2x32xf32>
    %697 = vector.extract_strided_slice %685 {offsets = [1, 0, 0], sizes = [1, 2, 32], strides = [1, 1, 1]} : vector<4x2x32xf32> to vector<1x2x32xf32>
    %698 = vector.shape_cast %697 : vector<1x2x32xf32> to vector<2x32xf32>
    %c1_475 = arith.constant 1 : index
    %c0_476 = arith.constant 0 : index
    %c0_477 = arith.constant 0 : index
    %699 = vector.load %arg2[%c1_475, %c0_476, %c0_477] : memref<4x32x32xbf16, #tpu.memory_space<vmem>>, vector<1x32x32xbf16>
    %700 = vector.shape_cast %699 : vector<1x32x32xbf16> to vector<32x32xbf16>
    %cst_478 = arith.constant dense<0.000000e+00> : vector<2x32xf32>
    %701 = tpu.matmul %690, %700, %cst_478 {dimension_numbers = #tpu.dot_dimension_numbers<[1], [0], [0], [1], [0, 0, 1, 1], [], []>} : vector<2x32xbf16>, vector<32x32xbf16>, vector<2x32xf32> -> vector<2x32xf32>
    %702 = arith.addf %698, %701 : vector<2x32xf32>
    %703 = vector.extract_strided_slice %685 {offsets = [2, 0, 0], sizes = [1, 2, 32], strides = [1, 1, 1]} : vector<4x2x32xf32> to vector<1x2x32xf32>
    %704 = vector.shape_cast %703 : vector<1x2x32xf32> to vector<2x32xf32>
    %c2_479 = arith.constant 2 : index
    %c0_480 = arith.constant 0 : index
    %c0_481 = arith.constant 0 : index
    %705 = vector.load %arg2[%c2_479, %c0_480, %c0_481] : memref<4x32x32xbf16, #tpu.memory_space<vmem>>, vector<1x32x32xbf16>
    %706 = vector.shape_cast %705 : vector<1x32x32xbf16> to vector<32x32xbf16>
    %cst_482 = arith.constant dense<0.000000e+00> : vector<2x32xf32>
    %707 = tpu.matmul %690, %706, %cst_482 {dimension_numbers = #tpu.dot_dimension_numbers<[1], [0], [0], [1], [0, 0, 1, 1], [], []>} : vector<2x32xbf16>, vector<32x32xbf16>, vector<2x32xf32> -> vector<2x32xf32>
    %708 = arith.addf %704, %707 : vector<2x32xf32>
    %709 = vector.extract_strided_slice %685 {offsets = [3, 0, 0], sizes = [1, 2, 32], strides = [1, 1, 1]} : vector<4x2x32xf32> to vector<1x2x32xf32>
    %710 = vector.shape_cast %709 : vector<1x2x32xf32> to vector<2x32xf32>
    %c3_483 = arith.constant 3 : index
    %c0_484 = arith.constant 0 : index
    %c0_485 = arith.constant 0 : index
    %711 = vector.load %arg2[%c3_483, %c0_484, %c0_485] : memref<4x32x32xbf16, #tpu.memory_space<vmem>>, vector<1x32x32xbf16>
    %712 = vector.shape_cast %711 : vector<1x32x32xbf16> to vector<32x32xbf16>
    %cst_486 = arith.constant dense<0.000000e+00> : vector<2x32xf32>
    %713 = tpu.matmul %690, %712, %cst_486 {dimension_numbers = #tpu.dot_dimension_numbers<[1], [0], [0], [1], [0, 0, 1, 1], [], []>} : vector<2x32xbf16>, vector<32x32xbf16>, vector<2x32xf32> -> vector<2x32xf32>
    %714 = arith.addf %710, %713 : vector<2x32xf32>
    %715 = arith.negf %696 : vector<2x32xf32>
    %716 = math.exp %715 : vector<2x32xf32>
    %cst_487 = arith.constant 1.000000e+00 : f32
    %717 = vector.broadcast %cst_487 : f32 to vector<2x32xf32>
    %718 = arith.addf %717, %716 : vector<2x32xf32>
    %719 = arith.divf %717, %718 : vector<2x32xf32>
    %720 = arith.negf %702 : vector<2x32xf32>
    %721 = math.exp %720 : vector<2x32xf32>
    %cst_488 = arith.constant 1.000000e+00 : f32
    %722 = vector.broadcast %cst_488 : f32 to vector<2x32xf32>
    %723 = arith.addf %722, %721 : vector<2x32xf32>
    %724 = arith.divf %722, %723 : vector<2x32xf32>
    %725 = math.tanh %708 : vector<2x32xf32>
    %726 = arith.negf %714 : vector<2x32xf32>
    %727 = math.exp %726 : vector<2x32xf32>
    %cst_489 = arith.constant 1.000000e+00 : f32
    %728 = vector.broadcast %cst_489 : f32 to vector<2x32xf32>
    %729 = arith.addf %728, %727 : vector<2x32xf32>
    %730 = arith.divf %728, %729 : vector<2x32xf32>
    %731 = arith.mulf %724, %689 : vector<2x32xf32>
    %732 = arith.mulf %719, %725 : vector<2x32xf32>
    %733 = arith.addf %731, %732 : vector<2x32xf32>
    %734 = math.tanh %733 : vector<2x32xf32>
    %735 = arith.mulf %730, %734 : vector<2x32xf32>
    %c0_490 = arith.constant 0 : index
    %c0_491 = arith.constant 0 : index
    %c0_492 = arith.constant 0 : index
    %736 = vector.load %arg9[%c0_490, %c0_491, %c0_492] : memref<2x2x32xf32, #tpu.memory_space<vmem>>, vector<1x2x32xf32>
    %737 = vector.shape_cast %736 : vector<1x2x32xf32> to vector<2x32xf32>
    %738 = vector.shape_cast %735 : vector<2x32xf32> to vector<1x2x32xf32>
    tpu.vector_store %arg9[%c0_490, %c0_491, %c0_492], %738 {strides = array<i32>} : memref<2x2x32xf32, #tpu.memory_space<vmem>>, vector<1x2x32xf32>,
    %c0_493 = arith.constant 0 : index
    %c0_494 = arith.constant 0 : index
    %c0_495 = arith.constant 0 : index
    %739 = vector.load %arg10[%c0_493, %c0_494, %c0_495] : memref<2x2x32xf32, #tpu.memory_space<vmem>>, vector<1x2x32xf32>
    %740 = vector.shape_cast %739 : vector<1x2x32xf32> to vector<2x32xf32>
    %741 = vector.shape_cast %733 : vector<2x32xf32> to vector<1x2x32xf32>
    tpu.vector_store %arg10[%c0_493, %c0_494, %c0_495], %741 {strides = array<i32>} : memref<2x2x32xf32, #tpu.memory_space<vmem>>, vector<1x2x32xf32>,
    %c1_496 = arith.constant 1 : index
    %c0_497 = arith.constant 0 : index
    %c0_498 = arith.constant 0 : index
    %742 = vector.load %arg9[%c1_496, %c0_497, %c0_498] : memref<2x2x32xf32, #tpu.memory_space<vmem>>, vector<1x2x32xf32>
    %743 = vector.shape_cast %742 : vector<1x2x32xf32> to vector<2x32xf32>
    %c1_499 = arith.constant 1 : index
    %c0_500 = arith.constant 0 : index
    %c0_501 = arith.constant 0 : index
    %744 = vector.load %arg10[%c1_499, %c0_500, %c0_501] : memref<2x2x32xf32, #tpu.memory_space<vmem>>, vector<1x2x32xf32>
    %745 = vector.shape_cast %744 : vector<1x2x32xf32> to vector<2x32xf32>
    %746 = arith.truncf %735 : vector<2x32xf32> to vector<2x32xbf16>
    %747 = arith.truncf %743 : vector<2x32xf32> to vector<2x32xbf16>
    %c0_502 = arith.constant 0 : index
    %c0_503 = arith.constant 0 : index
    %c0_504 = arith.constant 0 : index
    %748 = vector.load %arg3[%c0_502, %c0_503, %c0_504] : memref<4x32x32xbf16, #tpu.memory_space<vmem>>, vector<1x32x32xbf16>
    %749 = vector.shape_cast %748 : vector<1x32x32xbf16> to vector<32x32xbf16>
    %cst_505 = arith.constant dense<0.000000e+00> : vector<2x32xf32>
    %750 = tpu.matmul %746, %749, %cst_505 {dimension_numbers = #tpu.dot_dimension_numbers<[1], [0], [0], [1], [0, 0, 1, 1], [], []>} : vector<2x32xbf16>, vector<32x32xbf16>, vector<2x32xf32> -> vector<2x32xf32>
    %c0_506 = arith.constant 0 : index
    %c0_507 = arith.constant 0 : index
    %c0_508 = arith.constant 0 : index
    %751 = vector.load %arg4[%c0_506, %c0_507, %c0_508] : memref<4x32x32xbf16, #tpu.memory_space<vmem>>, vector<1x32x32xbf16>
    %752 = vector.shape_cast %751 : vector<1x32x32xbf16> to vector<32x32xbf16>
    %cst_509 = arith.constant dense<0.000000e+00> : vector<2x32xf32>
    %753 = tpu.matmul %747, %752, %cst_509 {dimension_numbers = #tpu.dot_dimension_numbers<[1], [0], [0], [1], [0, 0, 1, 1], [], []>} : vector<2x32xbf16>, vector<32x32xbf16>, vector<2x32xf32> -> vector<2x32xf32>
    %754 = arith.addf %750, %753 : vector<2x32xf32>
    %c0_510 = arith.constant 0 : index
    %c0_511 = arith.constant 0 : index
    %c0_512 = arith.constant 0 : index
    %755 = vector.load %arg5[%c0_510, %c0_511, %c0_512] : memref<4x1x32xf32, #tpu.memory_space<vmem>>, vector<1x1x32xf32>
    %756 = vector.shape_cast %755 : vector<1x1x32xf32> to vector<1x32xf32>
    %757 = vector.broadcast %756 : vector<1x32xf32> to vector<2x32xf32>
    %758 = arith.addf %754, %757 : vector<2x32xf32>
    %c1_513 = arith.constant 1 : index
    %c0_514 = arith.constant 0 : index
    %c0_515 = arith.constant 0 : index
    %759 = vector.load %arg3[%c1_513, %c0_514, %c0_515] : memref<4x32x32xbf16, #tpu.memory_space<vmem>>, vector<1x32x32xbf16>
    %760 = vector.shape_cast %759 : vector<1x32x32xbf16> to vector<32x32xbf16>
    %cst_516 = arith.constant dense<0.000000e+00> : vector<2x32xf32>
    %761 = tpu.matmul %746, %760, %cst_516 {dimension_numbers = #tpu.dot_dimension_numbers<[1], [0], [0], [1], [0, 0, 1, 1], [], []>} : vector<2x32xbf16>, vector<32x32xbf16>, vector<2x32xf32> -> vector<2x32xf32>
    %c1_517 = arith.constant 1 : index
    %c0_518 = arith.constant 0 : index
    %c0_519 = arith.constant 0 : index
    %762 = vector.load %arg4[%c1_517, %c0_518, %c0_519] : memref<4x32x32xbf16, #tpu.memory_space<vmem>>, vector<1x32x32xbf16>
    %763 = vector.shape_cast %762 : vector<1x32x32xbf16> to vector<32x32xbf16>
    %cst_520 = arith.constant dense<0.000000e+00> : vector<2x32xf32>
    %764 = tpu.matmul %747, %763, %cst_520 {dimension_numbers = #tpu.dot_dimension_numbers<[1], [0], [0], [1], [0, 0, 1, 1], [], []>} : vector<2x32xbf16>, vector<32x32xbf16>, vector<2x32xf32> -> vector<2x32xf32>
    %765 = arith.addf %761, %764 : vector<2x32xf32>
    %c1_521 = arith.constant 1 : index
    %c0_522 = arith.constant 0 : index
    %c0_523 = arith.constant 0 : index
    %766 = vector.load %arg5[%c1_521, %c0_522, %c0_523] : memref<4x1x32xf32, #tpu.memory_space<vmem>>, vector<1x1x32xf32>
    %767 = vector.shape_cast %766 : vector<1x1x32xf32> to vector<1x32xf32>
    %768 = vector.broadcast %767 : vector<1x32xf32> to vector<2x32xf32>
    %769 = arith.addf %765, %768 : vector<2x32xf32>
    %c2_524 = arith.constant 2 : index
    %c0_525 = arith.constant 0 : index
    %c0_526 = arith.constant 0 : index
    %770 = vector.load %arg3[%c2_524, %c0_525, %c0_526] : memref<4x32x32xbf16, #tpu.memory_space<vmem>>, vector<1x32x32xbf16>
    %771 = vector.shape_cast %770 : vector<1x32x32xbf16> to vector<32x32xbf16>
    %cst_527 = arith.constant dense<0.000000e+00> : vector<2x32xf32>
    %772 = tpu.matmul %746, %771, %cst_527 {dimension_numbers = #tpu.dot_dimension_numbers<[1], [0], [0], [1], [0, 0, 1, 1], [], []>} : vector<2x32xbf16>, vector<32x32xbf16>, vector<2x32xf32> -> vector<2x32xf32>
    %c2_528 = arith.constant 2 : index
    %c0_529 = arith.constant 0 : index
    %c0_530 = arith.constant 0 : index
    %773 = vector.load %arg4[%c2_528, %c0_529, %c0_530] : memref<4x32x32xbf16, #tpu.memory_space<vmem>>, vector<1x32x32xbf16>
    %774 = vector.shape_cast %773 : vector<1x32x32xbf16> to vector<32x32xbf16>
    %cst_531 = arith.constant dense<0.000000e+00> : vector<2x32xf32>
    %775 = tpu.matmul %747, %774, %cst_531 {dimension_numbers = #tpu.dot_dimension_numbers<[1], [0], [0], [1], [0, 0, 1, 1], [], []>} : vector<2x32xbf16>, vector<32x32xbf16>, vector<2x32xf32> -> vector<2x32xf32>
    %776 = arith.addf %772, %775 : vector<2x32xf32>
    %c2_532 = arith.constant 2 : index
    %c0_533 = arith.constant 0 : index
    %c0_534 = arith.constant 0 : index
    %777 = vector.load %arg5[%c2_532, %c0_533, %c0_534] : memref<4x1x32xf32, #tpu.memory_space<vmem>>, vector<1x1x32xf32>
    %778 = vector.shape_cast %777 : vector<1x1x32xf32> to vector<1x32xf32>
    %779 = vector.broadcast %778 : vector<1x32xf32> to vector<2x32xf32>
    %780 = arith.addf %776, %779 : vector<2x32xf32>
    %c3_535 = arith.constant 3 : index
    %c0_536 = arith.constant 0 : index
    %c0_537 = arith.constant 0 : index
    %781 = vector.load %arg3[%c3_535, %c0_536, %c0_537] : memref<4x32x32xbf16, #tpu.memory_space<vmem>>, vector<1x32x32xbf16>
    %782 = vector.shape_cast %781 : vector<1x32x32xbf16> to vector<32x32xbf16>
    %cst_538 = arith.constant dense<0.000000e+00> : vector<2x32xf32>
    %783 = tpu.matmul %746, %782, %cst_538 {dimension_numbers = #tpu.dot_dimension_numbers<[1], [0], [0], [1], [0, 0, 1, 1], [], []>} : vector<2x32xbf16>, vector<32x32xbf16>, vector<2x32xf32> -> vector<2x32xf32>
    %c3_539 = arith.constant 3 : index
    %c0_540 = arith.constant 0 : index
    %c0_541 = arith.constant 0 : index
    %784 = vector.load %arg4[%c3_539, %c0_540, %c0_541] : memref<4x32x32xbf16, #tpu.memory_space<vmem>>, vector<1x32x32xbf16>
    %785 = vector.shape_cast %784 : vector<1x32x32xbf16> to vector<32x32xbf16>
    %cst_542 = arith.constant dense<0.000000e+00> : vector<2x32xf32>
    %786 = tpu.matmul %747, %785, %cst_542 {dimension_numbers = #tpu.dot_dimension_numbers<[1], [0], [0], [1], [0, 0, 1, 1], [], []>} : vector<2x32xbf16>, vector<32x32xbf16>, vector<2x32xf32> -> vector<2x32xf32>
    %787 = arith.addf %783, %786 : vector<2x32xf32>
    %c3_543 = arith.constant 3 : index
    %c0_544 = arith.constant 0 : index
    %c0_545 = arith.constant 0 : index
    %788 = vector.load %arg5[%c3_543, %c0_544, %c0_545] : memref<4x1x32xf32, #tpu.memory_space<vmem>>, vector<1x1x32xf32>
    %789 = vector.shape_cast %788 : vector<1x1x32xf32> to vector<1x32xf32>
    %790 = vector.broadcast %789 : vector<1x32xf32> to vector<2x32xf32>
    %791 = arith.addf %787, %790 : vector<2x32xf32>
    %792 = arith.negf %758 : vector<2x32xf32>
    %793 = math.exp %792 : vector<2x32xf32>
    %cst_546 = arith.constant 1.000000e+00 : f32
    %794 = vector.broadcast %cst_546 : f32 to vector<2x32xf32>
    %795 = arith.addf %794, %793 : vector<2x32xf32>
    %796 = arith.divf %794, %795 : vector<2x32xf32>
    %797 = arith.negf %769 : vector<2x32xf32>
    %798 = math.exp %797 : vector<2x32xf32>
    %cst_547 = arith.constant 1.000000e+00 : f32
    %799 = vector.broadcast %cst_547 : f32 to vector<2x32xf32>
    %800 = arith.addf %799, %798 : vector<2x32xf32>
    %801 = arith.divf %799, %800 : vector<2x32xf32>
    %802 = math.tanh %780 : vector<2x32xf32>
    %803 = arith.negf %791 : vector<2x32xf32>
    %804 = math.exp %803 : vector<2x32xf32>
    %cst_548 = arith.constant 1.000000e+00 : f32
    %805 = vector.broadcast %cst_548 : f32 to vector<2x32xf32>
    %806 = arith.addf %805, %804 : vector<2x32xf32>
    %807 = arith.divf %805, %806 : vector<2x32xf32>
    %808 = arith.mulf %801, %745 : vector<2x32xf32>
    %809 = arith.mulf %796, %802 : vector<2x32xf32>
    %810 = arith.addf %808, %809 : vector<2x32xf32>
    %811 = math.tanh %810 : vector<2x32xf32>
    %812 = arith.mulf %807, %811 : vector<2x32xf32>
    %c1_549 = arith.constant 1 : index
    %c0_550 = arith.constant 0 : index
    %c0_551 = arith.constant 0 : index
    %813 = vector.load %arg9[%c1_549, %c0_550, %c0_551] : memref<2x2x32xf32, #tpu.memory_space<vmem>>, vector<1x2x32xf32>
    %814 = vector.shape_cast %813 : vector<1x2x32xf32> to vector<2x32xf32>
    %815 = vector.shape_cast %812 : vector<2x32xf32> to vector<1x2x32xf32>
    tpu.vector_store %arg9[%c1_549, %c0_550, %c0_551], %815 {strides = array<i32>} : memref<2x2x32xf32, #tpu.memory_space<vmem>>, vector<1x2x32xf32>,
    %c1_552 = arith.constant 1 : index
    %c0_553 = arith.constant 0 : index
    %c0_554 = arith.constant 0 : index
    %816 = vector.load %arg10[%c1_552, %c0_553, %c0_554] : memref<2x2x32xf32, #tpu.memory_space<vmem>>, vector<1x2x32xf32>
    %817 = vector.shape_cast %816 : vector<1x2x32xf32> to vector<2x32xf32>
    %818 = vector.shape_cast %810 : vector<2x32xf32> to vector<1x2x32xf32>
    tpu.vector_store %arg10[%c1_552, %c0_553, %c0_554], %818 {strides = array<i32>} : memref<2x2x32xf32, #tpu.memory_space<vmem>>, vector<1x2x32xf32>,
    %c6_i32 = arith.constant 6 : i32
    %819 = arith.index_cast %c6_i32 : i32 to index
    %c0_555 = arith.constant 0 : index
    %c0_556 = arith.constant 0 : index
    %c0_557 = arith.constant 0 : index
    %820 = vector.load %arg1[%819, %c0_555, %c0_556, %c0_557] : memref<8x4x2x32xf32, #tpu.memory_space<vmem>>, vector<1x4x2x32xf32>
    %821 = vector.shape_cast %820 : vector<1x4x2x32xf32> to vector<4x2x32xf32>
    %c0_558 = arith.constant 0 : index
    %c0_559 = arith.constant 0 : index
    %c0_560 = arith.constant 0 : index
    %822 = vector.load %arg9[%c0_558, %c0_559, %c0_560] : memref<2x2x32xf32, #tpu.memory_space<vmem>>, vector<1x2x32xf32>
    %823 = vector.shape_cast %822 : vector<1x2x32xf32> to vector<2x32xf32>
    %c0_561 = arith.constant 0 : index
    %c0_562 = arith.constant 0 : index
    %c0_563 = arith.constant 0 : index
    %824 = vector.load %arg10[%c0_561, %c0_562, %c0_563] : memref<2x2x32xf32, #tpu.memory_space<vmem>>, vector<1x2x32xf32>
    %825 = vector.shape_cast %824 : vector<1x2x32xf32> to vector<2x32xf32>
    %826 = arith.truncf %823 : vector<2x32xf32> to vector<2x32xbf16>
    %827 = vector.extract_strided_slice %821 {offsets = [0, 0, 0], sizes = [1, 2, 32], strides = [1, 1, 1]} : vector<4x2x32xf32> to vector<1x2x32xf32>
    %828 = vector.shape_cast %827 : vector<1x2x32xf32> to vector<2x32xf32>
    %c0_564 = arith.constant 0 : index
    %c0_565 = arith.constant 0 : index
    %c0_566 = arith.constant 0 : index
    %829 = vector.load %arg2[%c0_564, %c0_565, %c0_566] : memref<4x32x32xbf16, #tpu.memory_space<vmem>>, vector<1x32x32xbf16>
    %830 = vector.shape_cast %829 : vector<1x32x32xbf16> to vector<32x32xbf16>
    %cst_567 = arith.constant dense<0.000000e+00> : vector<2x32xf32>
    %831 = tpu.matmul %826, %830, %cst_567 {dimension_numbers = #tpu.dot_dimension_numbers<[1], [0], [0], [1], [0, 0, 1, 1], [], []>} : vector<2x32xbf16>, vector<32x32xbf16>, vector<2x32xf32> -> vector<2x32xf32>
    %832 = arith.addf %828, %831 : vector<2x32xf32>
    %833 = vector.extract_strided_slice %821 {offsets = [1, 0, 0], sizes = [1, 2, 32], strides = [1, 1, 1]} : vector<4x2x32xf32> to vector<1x2x32xf32>
    %834 = vector.shape_cast %833 : vector<1x2x32xf32> to vector<2x32xf32>
    %c1_568 = arith.constant 1 : index
    %c0_569 = arith.constant 0 : index
    %c0_570 = arith.constant 0 : index
    %835 = vector.load %arg2[%c1_568, %c0_569, %c0_570] : memref<4x32x32xbf16, #tpu.memory_space<vmem>>, vector<1x32x32xbf16>
    %836 = vector.shape_cast %835 : vector<1x32x32xbf16> to vector<32x32xbf16>
    %cst_571 = arith.constant dense<0.000000e+00> : vector<2x32xf32>
    %837 = tpu.matmul %826, %836, %cst_571 {dimension_numbers = #tpu.dot_dimension_numbers<[1], [0], [0], [1], [0, 0, 1, 1], [], []>} : vector<2x32xbf16>, vector<32x32xbf16>, vector<2x32xf32> -> vector<2x32xf32>
    %838 = arith.addf %834, %837 : vector<2x32xf32>
    %839 = vector.extract_strided_slice %821 {offsets = [2, 0, 0], sizes = [1, 2, 32], strides = [1, 1, 1]} : vector<4x2x32xf32> to vector<1x2x32xf32>
    %840 = vector.shape_cast %839 : vector<1x2x32xf32> to vector<2x32xf32>
    %c2_572 = arith.constant 2 : index
    %c0_573 = arith.constant 0 : index
    %c0_574 = arith.constant 0 : index
    %841 = vector.load %arg2[%c2_572, %c0_573, %c0_574] : memref<4x32x32xbf16, #tpu.memory_space<vmem>>, vector<1x32x32xbf16>
    %842 = vector.shape_cast %841 : vector<1x32x32xbf16> to vector<32x32xbf16>
    %cst_575 = arith.constant dense<0.000000e+00> : vector<2x32xf32>
    %843 = tpu.matmul %826, %842, %cst_575 {dimension_numbers = #tpu.dot_dimension_numbers<[1], [0], [0], [1], [0, 0, 1, 1], [], []>} : vector<2x32xbf16>, vector<32x32xbf16>, vector<2x32xf32> -> vector<2x32xf32>
    %844 = arith.addf %840, %843 : vector<2x32xf32>
    %845 = vector.extract_strided_slice %821 {offsets = [3, 0, 0], sizes = [1, 2, 32], strides = [1, 1, 1]} : vector<4x2x32xf32> to vector<1x2x32xf32>
    %846 = vector.shape_cast %845 : vector<1x2x32xf32> to vector<2x32xf32>
    %c3_576 = arith.constant 3 : index
    %c0_577 = arith.constant 0 : index
    %c0_578 = arith.constant 0 : index
    %847 = vector.load %arg2[%c3_576, %c0_577, %c0_578] : memref<4x32x32xbf16, #tpu.memory_space<vmem>>, vector<1x32x32xbf16>
    %848 = vector.shape_cast %847 : vector<1x32x32xbf16> to vector<32x32xbf16>
    %cst_579 = arith.constant dense<0.000000e+00> : vector<2x32xf32>
    %849 = tpu.matmul %826, %848, %cst_579 {dimension_numbers = #tpu.dot_dimension_numbers<[1], [0], [0], [1], [0, 0, 1, 1], [], []>} : vector<2x32xbf16>, vector<32x32xbf16>, vector<2x32xf32> -> vector<2x32xf32>
    %850 = arith.addf %846, %849 : vector<2x32xf32>
    %851 = arith.negf %832 : vector<2x32xf32>
    %852 = math.exp %851 : vector<2x32xf32>
    %cst_580 = arith.constant 1.000000e+00 : f32
    %853 = vector.broadcast %cst_580 : f32 to vector<2x32xf32>
    %854 = arith.addf %853, %852 : vector<2x32xf32>
    %855 = arith.divf %853, %854 : vector<2x32xf32>
    %856 = arith.negf %838 : vector<2x32xf32>
    %857 = math.exp %856 : vector<2x32xf32>
    %cst_581 = arith.constant 1.000000e+00 : f32
    %858 = vector.broadcast %cst_581 : f32 to vector<2x32xf32>
    %859 = arith.addf %858, %857 : vector<2x32xf32>
    %860 = arith.divf %858, %859 : vector<2x32xf32>
    %861 = math.tanh %844 : vector<2x32xf32>
    %862 = arith.negf %850 : vector<2x32xf32>
    %863 = math.exp %862 : vector<2x32xf32>
    %cst_582 = arith.constant 1.000000e+00 : f32
    %864 = vector.broadcast %cst_582 : f32 to vector<2x32xf32>
    %865 = arith.addf %864, %863 : vector<2x32xf32>
    %866 = arith.divf %864, %865 : vector<2x32xf32>
    %867 = arith.mulf %860, %825 : vector<2x32xf32>
    %868 = arith.mulf %855, %861 : vector<2x32xf32>
    %869 = arith.addf %867, %868 : vector<2x32xf32>
    %870 = math.tanh %869 : vector<2x32xf32>
    %871 = arith.mulf %866, %870 : vector<2x32xf32>
    %c0_583 = arith.constant 0 : index
    %c0_584 = arith.constant 0 : index
    %c0_585 = arith.constant 0 : index
    %872 = vector.load %arg9[%c0_583, %c0_584, %c0_585] : memref<2x2x32xf32, #tpu.memory_space<vmem>>, vector<1x2x32xf32>
    %873 = vector.shape_cast %872 : vector<1x2x32xf32> to vector<2x32xf32>
    %874 = vector.shape_cast %871 : vector<2x32xf32> to vector<1x2x32xf32>
    tpu.vector_store %arg9[%c0_583, %c0_584, %c0_585], %874 {strides = array<i32>} : memref<2x2x32xf32, #tpu.memory_space<vmem>>, vector<1x2x32xf32>,
    %c0_586 = arith.constant 0 : index
    %c0_587 = arith.constant 0 : index
    %c0_588 = arith.constant 0 : index
    %875 = vector.load %arg10[%c0_586, %c0_587, %c0_588] : memref<2x2x32xf32, #tpu.memory_space<vmem>>, vector<1x2x32xf32>
    %876 = vector.shape_cast %875 : vector<1x2x32xf32> to vector<2x32xf32>
    %877 = vector.shape_cast %869 : vector<2x32xf32> to vector<1x2x32xf32>
    tpu.vector_store %arg10[%c0_586, %c0_587, %c0_588], %877 {strides = array<i32>} : memref<2x2x32xf32, #tpu.memory_space<vmem>>, vector<1x2x32xf32>,
    %c1_589 = arith.constant 1 : index
    %c0_590 = arith.constant 0 : index
    %c0_591 = arith.constant 0 : index
    %878 = vector.load %arg9[%c1_589, %c0_590, %c0_591] : memref<2x2x32xf32, #tpu.memory_space<vmem>>, vector<1x2x32xf32>
    %879 = vector.shape_cast %878 : vector<1x2x32xf32> to vector<2x32xf32>
    %c1_592 = arith.constant 1 : index
    %c0_593 = arith.constant 0 : index
    %c0_594 = arith.constant 0 : index
    %880 = vector.load %arg10[%c1_592, %c0_593, %c0_594] : memref<2x2x32xf32, #tpu.memory_space<vmem>>, vector<1x2x32xf32>
    %881 = vector.shape_cast %880 : vector<1x2x32xf32> to vector<2x32xf32>
    %882 = arith.truncf %871 : vector<2x32xf32> to vector<2x32xbf16>
    %883 = arith.truncf %879 : vector<2x32xf32> to vector<2x32xbf16>
    %c0_595 = arith.constant 0 : index
    %c0_596 = arith.constant 0 : index
    %c0_597 = arith.constant 0 : index
    %884 = vector.load %arg3[%c0_595, %c0_596, %c0_597] : memref<4x32x32xbf16, #tpu.memory_space<vmem>>, vector<1x32x32xbf16>
    %885 = vector.shape_cast %884 : vector<1x32x32xbf16> to vector<32x32xbf16>
    %cst_598 = arith.constant dense<0.000000e+00> : vector<2x32xf32>
    %886 = tpu.matmul %882, %885, %cst_598 {dimension_numbers = #tpu.dot_dimension_numbers<[1], [0], [0], [1], [0, 0, 1, 1], [], []>} : vector<2x32xbf16>, vector<32x32xbf16>, vector<2x32xf32> -> vector<2x32xf32>
    %c0_599 = arith.constant 0 : index
    %c0_600 = arith.constant 0 : index
    %c0_601 = arith.constant 0 : index
    %887 = vector.load %arg4[%c0_599, %c0_600, %c0_601] : memref<4x32x32xbf16, #tpu.memory_space<vmem>>, vector<1x32x32xbf16>
    %888 = vector.shape_cast %887 : vector<1x32x32xbf16> to vector<32x32xbf16>
    %cst_602 = arith.constant dense<0.000000e+00> : vector<2x32xf32>
    %889 = tpu.matmul %883, %888, %cst_602 {dimension_numbers = #tpu.dot_dimension_numbers<[1], [0], [0], [1], [0, 0, 1, 1], [], []>} : vector<2x32xbf16>, vector<32x32xbf16>, vector<2x32xf32> -> vector<2x32xf32>
    %890 = arith.addf %886, %889 : vector<2x32xf32>
    %c0_603 = arith.constant 0 : index
    %c0_604 = arith.constant 0 : index
    %c0_605 = arith.constant 0 : index
    %891 = vector.load %arg5[%c0_603, %c0_604, %c0_605] : memref<4x1x32xf32, #tpu.memory_space<vmem>>, vector<1x1x32xf32>
    %892 = vector.shape_cast %891 : vector<1x1x32xf32> to vector<1x32xf32>
    %893 = vector.broadcast %892 : vector<1x32xf32> to vector<2x32xf32>
    %894 = arith.addf %890, %893 : vector<2x32xf32>
    %c1_606 = arith.constant 1 : index
    %c0_607 = arith.constant 0 : index
    %c0_608 = arith.constant 0 : index
    %895 = vector.load %arg3[%c1_606, %c0_607, %c0_608] : memref<4x32x32xbf16, #tpu.memory_space<vmem>>, vector<1x32x32xbf16>
    %896 = vector.shape_cast %895 : vector<1x32x32xbf16> to vector<32x32xbf16>
    %cst_609 = arith.constant dense<0.000000e+00> : vector<2x32xf32>
    %897 = tpu.matmul %882, %896, %cst_609 {dimension_numbers = #tpu.dot_dimension_numbers<[1], [0], [0], [1], [0, 0, 1, 1], [], []>} : vector<2x32xbf16>, vector<32x32xbf16>, vector<2x32xf32> -> vector<2x32xf32>
    %c1_610 = arith.constant 1 : index
    %c0_611 = arith.constant 0 : index
    %c0_612 = arith.constant 0 : index
    %898 = vector.load %arg4[%c1_610, %c0_611, %c0_612] : memref<4x32x32xbf16, #tpu.memory_space<vmem>>, vector<1x32x32xbf16>
    %899 = vector.shape_cast %898 : vector<1x32x32xbf16> to vector<32x32xbf16>
    %cst_613 = arith.constant dense<0.000000e+00> : vector<2x32xf32>
    %900 = tpu.matmul %883, %899, %cst_613 {dimension_numbers = #tpu.dot_dimension_numbers<[1], [0], [0], [1], [0, 0, 1, 1], [], []>} : vector<2x32xbf16>, vector<32x32xbf16>, vector<2x32xf32> -> vector<2x32xf32>
    %901 = arith.addf %897, %900 : vector<2x32xf32>
    %c1_614 = arith.constant 1 : index
    %c0_615 = arith.constant 0 : index
    %c0_616 = arith.constant 0 : index
    %902 = vector.load %arg5[%c1_614, %c0_615, %c0_616] : memref<4x1x32xf32, #tpu.memory_space<vmem>>, vector<1x1x32xf32>
    %903 = vector.shape_cast %902 : vector<1x1x32xf32> to vector<1x32xf32>
    %904 = vector.broadcast %903 : vector<1x32xf32> to vector<2x32xf32>
    %905 = arith.addf %901, %904 : vector<2x32xf32>
    %c2_617 = arith.constant 2 : index
    %c0_618 = arith.constant 0 : index
    %c0_619 = arith.constant 0 : index
    %906 = vector.load %arg3[%c2_617, %c0_618, %c0_619] : memref<4x32x32xbf16, #tpu.memory_space<vmem>>, vector<1x32x32xbf16>
    %907 = vector.shape_cast %906 : vector<1x32x32xbf16> to vector<32x32xbf16>
    %cst_620 = arith.constant dense<0.000000e+00> : vector<2x32xf32>
    %908 = tpu.matmul %882, %907, %cst_620 {dimension_numbers = #tpu.dot_dimension_numbers<[1], [0], [0], [1], [0, 0, 1, 1], [], []>} : vector<2x32xbf16>, vector<32x32xbf16>, vector<2x32xf32> -> vector<2x32xf32>
    %c2_621 = arith.constant 2 : index
    %c0_622 = arith.constant 0 : index
    %c0_623 = arith.constant 0 : index
    %909 = vector.load %arg4[%c2_621, %c0_622, %c0_623] : memref<4x32x32xbf16, #tpu.memory_space<vmem>>, vector<1x32x32xbf16>
    %910 = vector.shape_cast %909 : vector<1x32x32xbf16> to vector<32x32xbf16>
    %cst_624 = arith.constant dense<0.000000e+00> : vector<2x32xf32>
    %911 = tpu.matmul %883, %910, %cst_624 {dimension_numbers = #tpu.dot_dimension_numbers<[1], [0], [0], [1], [0, 0, 1, 1], [], []>} : vector<2x32xbf16>, vector<32x32xbf16>, vector<2x32xf32> -> vector<2x32xf32>
    %912 = arith.addf %908, %911 : vector<2x32xf32>
    %c2_625 = arith.constant 2 : index
    %c0_626 = arith.constant 0 : index
    %c0_627 = arith.constant 0 : index
    %913 = vector.load %arg5[%c2_625, %c0_626, %c0_627] : memref<4x1x32xf32, #tpu.memory_space<vmem>>, vector<1x1x32xf32>
    %914 = vector.shape_cast %913 : vector<1x1x32xf32> to vector<1x32xf32>
    %915 = vector.broadcast %914 : vector<1x32xf32> to vector<2x32xf32>
    %916 = arith.addf %912, %915 : vector<2x32xf32>
    %c3_628 = arith.constant 3 : index
    %c0_629 = arith.constant 0 : index
    %c0_630 = arith.constant 0 : index
    %917 = vector.load %arg3[%c3_628, %c0_629, %c0_630] : memref<4x32x32xbf16, #tpu.memory_space<vmem>>, vector<1x32x32xbf16>
    %918 = vector.shape_cast %917 : vector<1x32x32xbf16> to vector<32x32xbf16>
    %cst_631 = arith.constant dense<0.000000e+00> : vector<2x32xf32>
    %919 = tpu.matmul %882, %918, %cst_631 {dimension_numbers = #tpu.dot_dimension_numbers<[1], [0], [0], [1], [0, 0, 1, 1], [], []>} : vector<2x32xbf16>, vector<32x32xbf16>, vector<2x32xf32> -> vector<2x32xf32>
    %c3_632 = arith.constant 3 : index
    %c0_633 = arith.constant 0 : index
    %c0_634 = arith.constant 0 : index
    %920 = vector.load %arg4[%c3_632, %c0_633, %c0_634] : memref<4x32x32xbf16, #tpu.memory_space<vmem>>, vector<1x32x32xbf16>
    %921 = vector.shape_cast %920 : vector<1x32x32xbf16> to vector<32x32xbf16>
    %cst_635 = arith.constant dense<0.000000e+00> : vector<2x32xf32>
    %922 = tpu.matmul %883, %921, %cst_635 {dimension_numbers = #tpu.dot_dimension_numbers<[1], [0], [0], [1], [0, 0, 1, 1], [], []>} : vector<2x32xbf16>, vector<32x32xbf16>, vector<2x32xf32> -> vector<2x32xf32>
    %923 = arith.addf %919, %922 : vector<2x32xf32>
    %c3_636 = arith.constant 3 : index
    %c0_637 = arith.constant 0 : index
    %c0_638 = arith.constant 0 : index
    %924 = vector.load %arg5[%c3_636, %c0_637, %c0_638] : memref<4x1x32xf32, #tpu.memory_space<vmem>>, vector<1x1x32xf32>
    %925 = vector.shape_cast %924 : vector<1x1x32xf32> to vector<1x32xf32>
    %926 = vector.broadcast %925 : vector<1x32xf32> to vector<2x32xf32>
    %927 = arith.addf %923, %926 : vector<2x32xf32>
    %928 = arith.negf %894 : vector<2x32xf32>
    %929 = math.exp %928 : vector<2x32xf32>
    %cst_639 = arith.constant 1.000000e+00 : f32
    %930 = vector.broadcast %cst_639 : f32 to vector<2x32xf32>
    %931 = arith.addf %930, %929 : vector<2x32xf32>
    %932 = arith.divf %930, %931 : vector<2x32xf32>
    %933 = arith.negf %905 : vector<2x32xf32>
    %934 = math.exp %933 : vector<2x32xf32>
    %cst_640 = arith.constant 1.000000e+00 : f32
    %935 = vector.broadcast %cst_640 : f32 to vector<2x32xf32>
    %936 = arith.addf %935, %934 : vector<2x32xf32>
    %937 = arith.divf %935, %936 : vector<2x32xf32>
    %938 = math.tanh %916 : vector<2x32xf32>
    %939 = arith.negf %927 : vector<2x32xf32>
    %940 = math.exp %939 : vector<2x32xf32>
    %cst_641 = arith.constant 1.000000e+00 : f32
    %941 = vector.broadcast %cst_641 : f32 to vector<2x32xf32>
    %942 = arith.addf %941, %940 : vector<2x32xf32>
    %943 = arith.divf %941, %942 : vector<2x32xf32>
    %944 = arith.mulf %937, %881 : vector<2x32xf32>
    %945 = arith.mulf %932, %938 : vector<2x32xf32>
    %946 = arith.addf %944, %945 : vector<2x32xf32>
    %947 = math.tanh %946 : vector<2x32xf32>
    %948 = arith.mulf %943, %947 : vector<2x32xf32>
    %c1_642 = arith.constant 1 : index
    %c0_643 = arith.constant 0 : index
    %c0_644 = arith.constant 0 : index
    %949 = vector.load %arg9[%c1_642, %c0_643, %c0_644] : memref<2x2x32xf32, #tpu.memory_space<vmem>>, vector<1x2x32xf32>
    %950 = vector.shape_cast %949 : vector<1x2x32xf32> to vector<2x32xf32>
    %951 = vector.shape_cast %948 : vector<2x32xf32> to vector<1x2x32xf32>
    tpu.vector_store %arg9[%c1_642, %c0_643, %c0_644], %951 {strides = array<i32>} : memref<2x2x32xf32, #tpu.memory_space<vmem>>, vector<1x2x32xf32>,
    %c1_645 = arith.constant 1 : index
    %c0_646 = arith.constant 0 : index
    %c0_647 = arith.constant 0 : index
    %952 = vector.load %arg10[%c1_645, %c0_646, %c0_647] : memref<2x2x32xf32, #tpu.memory_space<vmem>>, vector<1x2x32xf32>
    %953 = vector.shape_cast %952 : vector<1x2x32xf32> to vector<2x32xf32>
    %954 = vector.shape_cast %946 : vector<2x32xf32> to vector<1x2x32xf32>
    tpu.vector_store %arg10[%c1_645, %c0_646, %c0_647], %954 {strides = array<i32>} : memref<2x2x32xf32, #tpu.memory_space<vmem>>, vector<1x2x32xf32>,
    %c7_i32 = arith.constant 7 : i32
    %955 = arith.index_cast %c7_i32 : i32 to index
    %c0_648 = arith.constant 0 : index
    %c0_649 = arith.constant 0 : index
    %c0_650 = arith.constant 0 : index
    %956 = vector.load %arg1[%955, %c0_648, %c0_649, %c0_650] : memref<8x4x2x32xf32, #tpu.memory_space<vmem>>, vector<1x4x2x32xf32>
    %957 = vector.shape_cast %956 : vector<1x4x2x32xf32> to vector<4x2x32xf32>
    %c0_651 = arith.constant 0 : index
    %c0_652 = arith.constant 0 : index
    %c0_653 = arith.constant 0 : index
    %958 = vector.load %arg9[%c0_651, %c0_652, %c0_653] : memref<2x2x32xf32, #tpu.memory_space<vmem>>, vector<1x2x32xf32>
    %959 = vector.shape_cast %958 : vector<1x2x32xf32> to vector<2x32xf32>
    %c0_654 = arith.constant 0 : index
    %c0_655 = arith.constant 0 : index
    %c0_656 = arith.constant 0 : index
    %960 = vector.load %arg10[%c0_654, %c0_655, %c0_656] : memref<2x2x32xf32, #tpu.memory_space<vmem>>, vector<1x2x32xf32>
    %961 = vector.shape_cast %960 : vector<1x2x32xf32> to vector<2x32xf32>
    %962 = arith.truncf %959 : vector<2x32xf32> to vector<2x32xbf16>
    %963 = vector.extract_strided_slice %957 {offsets = [0, 0, 0], sizes = [1, 2, 32], strides = [1, 1, 1]} : vector<4x2x32xf32> to vector<1x2x32xf32>
    %964 = vector.shape_cast %963 : vector<1x2x32xf32> to vector<2x32xf32>
    %c0_657 = arith.constant 0 : index
    %c0_658 = arith.constant 0 : index
    %c0_659 = arith.constant 0 : index
    %965 = vector.load %arg2[%c0_657, %c0_658, %c0_659] : memref<4x32x32xbf16, #tpu.memory_space<vmem>>, vector<1x32x32xbf16>
    %966 = vector.shape_cast %965 : vector<1x32x32xbf16> to vector<32x32xbf16>
    %cst_660 = arith.constant dense<0.000000e+00> : vector<2x32xf32>
    %967 = tpu.matmul %962, %966, %cst_660 {dimension_numbers = #tpu.dot_dimension_numbers<[1], [0], [0], [1], [0, 0, 1, 1], [], []>} : vector<2x32xbf16>, vector<32x32xbf16>, vector<2x32xf32> -> vector<2x32xf32>
    %968 = arith.addf %964, %967 : vector<2x32xf32>
    %969 = vector.extract_strided_slice %957 {offsets = [1, 0, 0], sizes = [1, 2, 32], strides = [1, 1, 1]} : vector<4x2x32xf32> to vector<1x2x32xf32>
    %970 = vector.shape_cast %969 : vector<1x2x32xf32> to vector<2x32xf32>
    %c1_661 = arith.constant 1 : index
    %c0_662 = arith.constant 0 : index
    %c0_663 = arith.constant 0 : index
    %971 = vector.load %arg2[%c1_661, %c0_662, %c0_663] : memref<4x32x32xbf16, #tpu.memory_space<vmem>>, vector<1x32x32xbf16>
    %972 = vector.shape_cast %971 : vector<1x32x32xbf16> to vector<32x32xbf16>
    %cst_664 = arith.constant dense<0.000000e+00> : vector<2x32xf32>
    %973 = tpu.matmul %962, %972, %cst_664 {dimension_numbers = #tpu.dot_dimension_numbers<[1], [0], [0], [1], [0, 0, 1, 1], [], []>} : vector<2x32xbf16>, vector<32x32xbf16>, vector<2x32xf32> -> vector<2x32xf32>
    %974 = arith.addf %970, %973 : vector<2x32xf32>
    %975 = vector.extract_strided_slice %957 {offsets = [2, 0, 0], sizes = [1, 2, 32], strides = [1, 1, 1]} : vector<4x2x32xf32> to vector<1x2x32xf32>
    %976 = vector.shape_cast %975 : vector<1x2x32xf32> to vector<2x32xf32>
    %c2_665 = arith.constant 2 : index
    %c0_666 = arith.constant 0 : index
    %c0_667 = arith.constant 0 : index
    %977 = vector.load %arg2[%c2_665, %c0_666, %c0_667] : memref<4x32x32xbf16, #tpu.memory_space<vmem>>, vector<1x32x32xbf16>
    %978 = vector.shape_cast %977 : vector<1x32x32xbf16> to vector<32x32xbf16>
    %cst_668 = arith.constant dense<0.000000e+00> : vector<2x32xf32>
    %979 = tpu.matmul %962, %978, %cst_668 {dimension_numbers = #tpu.dot_dimension_numbers<[1], [0], [0], [1], [0, 0, 1, 1], [], []>} : vector<2x32xbf16>, vector<32x32xbf16>, vector<2x32xf32> -> vector<2x32xf32>
    %980 = arith.addf %976, %979 : vector<2x32xf32>
    %981 = vector.extract_strided_slice %957 {offsets = [3, 0, 0], sizes = [1, 2, 32], strides = [1, 1, 1]} : vector<4x2x32xf32> to vector<1x2x32xf32>
    %982 = vector.shape_cast %981 : vector<1x2x32xf32> to vector<2x32xf32>
    %c3_669 = arith.constant 3 : index
    %c0_670 = arith.constant 0 : index
    %c0_671 = arith.constant 0 : index
    %983 = vector.load %arg2[%c3_669, %c0_670, %c0_671] : memref<4x32x32xbf16, #tpu.memory_space<vmem>>, vector<1x32x32xbf16>
    %984 = vector.shape_cast %983 : vector<1x32x32xbf16> to vector<32x32xbf16>
    %cst_672 = arith.constant dense<0.000000e+00> : vector<2x32xf32>
    %985 = tpu.matmul %962, %984, %cst_672 {dimension_numbers = #tpu.dot_dimension_numbers<[1], [0], [0], [1], [0, 0, 1, 1], [], []>} : vector<2x32xbf16>, vector<32x32xbf16>, vector<2x32xf32> -> vector<2x32xf32>
    %986 = arith.addf %982, %985 : vector<2x32xf32>
    %987 = arith.negf %968 : vector<2x32xf32>
    %988 = math.exp %987 : vector<2x32xf32>
    %cst_673 = arith.constant 1.000000e+00 : f32
    %989 = vector.broadcast %cst_673 : f32 to vector<2x32xf32>
    %990 = arith.addf %989, %988 : vector<2x32xf32>
    %991 = arith.divf %989, %990 : vector<2x32xf32>
    %992 = arith.negf %974 : vector<2x32xf32>
    %993 = math.exp %992 : vector<2x32xf32>
    %cst_674 = arith.constant 1.000000e+00 : f32
    %994 = vector.broadcast %cst_674 : f32 to vector<2x32xf32>
    %995 = arith.addf %994, %993 : vector<2x32xf32>
    %996 = arith.divf %994, %995 : vector<2x32xf32>
    %997 = math.tanh %980 : vector<2x32xf32>
    %998 = arith.negf %986 : vector<2x32xf32>
    %999 = math.exp %998 : vector<2x32xf32>
    %cst_675 = arith.constant 1.000000e+00 : f32
    %1000 = vector.broadcast %cst_675 : f32 to vector<2x32xf32>
    %1001 = arith.addf %1000, %999 : vector<2x32xf32>
    %1002 = arith.divf %1000, %1001 : vector<2x32xf32>
    %1003 = arith.mulf %996, %961 : vector<2x32xf32>
    %1004 = arith.mulf %991, %997 : vector<2x32xf32>
    %1005 = arith.addf %1003, %1004 : vector<2x32xf32>
    %1006 = math.tanh %1005 : vector<2x32xf32>
    %1007 = arith.mulf %1002, %1006 : vector<2x32xf32>
    %c0_676 = arith.constant 0 : index
    %c0_677 = arith.constant 0 : index
    %c0_678 = arith.constant 0 : index
    %1008 = vector.load %arg9[%c0_676, %c0_677, %c0_678] : memref<2x2x32xf32, #tpu.memory_space<vmem>>, vector<1x2x32xf32>
    %1009 = vector.shape_cast %1008 : vector<1x2x32xf32> to vector<2x32xf32>
    %1010 = vector.shape_cast %1007 : vector<2x32xf32> to vector<1x2x32xf32>
    tpu.vector_store %arg9[%c0_676, %c0_677, %c0_678], %1010 {strides = array<i32>} : memref<2x2x32xf32, #tpu.memory_space<vmem>>, vector<1x2x32xf32>,
    %c0_679 = arith.constant 0 : index
    %c0_680 = arith.constant 0 : index
    %c0_681 = arith.constant 0 : index
    %1011 = vector.load %arg10[%c0_679, %c0_680, %c0_681] : memref<2x2x32xf32, #tpu.memory_space<vmem>>, vector<1x2x32xf32>
    %1012 = vector.shape_cast %1011 : vector<1x2x32xf32> to vector<2x32xf32>
    %1013 = vector.shape_cast %1005 : vector<2x32xf32> to vector<1x2x32xf32>
    tpu.vector_store %arg10[%c0_679, %c0_680, %c0_681], %1013 {strides = array<i32>} : memref<2x2x32xf32, #tpu.memory_space<vmem>>, vector<1x2x32xf32>,
    %c1_682 = arith.constant 1 : index
    %c0_683 = arith.constant 0 : index
    %c0_684 = arith.constant 0 : index
    %1014 = vector.load %arg9[%c1_682, %c0_683, %c0_684] : memref<2x2x32xf32, #tpu.memory_space<vmem>>, vector<1x2x32xf32>
    %1015 = vector.shape_cast %1014 : vector<1x2x32xf32> to vector<2x32xf32>
    %c1_685 = arith.constant 1 : index
    %c0_686 = arith.constant 0 : index
    %c0_687 = arith.constant 0 : index
    %1016 = vector.load %arg10[%c1_685, %c0_686, %c0_687] : memref<2x2x32xf32, #tpu.memory_space<vmem>>, vector<1x2x32xf32>
    %1017 = vector.shape_cast %1016 : vector<1x2x32xf32> to vector<2x32xf32>
    %1018 = arith.truncf %1007 : vector<2x32xf32> to vector<2x32xbf16>
    %1019 = arith.truncf %1015 : vector<2x32xf32> to vector<2x32xbf16>
    %c0_688 = arith.constant 0 : index
    %c0_689 = arith.constant 0 : index
    %c0_690 = arith.constant 0 : index
    %1020 = vector.load %arg3[%c0_688, %c0_689, %c0_690] : memref<4x32x32xbf16, #tpu.memory_space<vmem>>, vector<1x32x32xbf16>
    %1021 = vector.shape_cast %1020 : vector<1x32x32xbf16> to vector<32x32xbf16>
    %cst_691 = arith.constant dense<0.000000e+00> : vector<2x32xf32>
    %1022 = tpu.matmul %1018, %1021, %cst_691 {dimension_numbers = #tpu.dot_dimension_numbers<[1], [0], [0], [1], [0, 0, 1, 1], [], []>} : vector<2x32xbf16>, vector<32x32xbf16>, vector<2x32xf32> -> vector<2x32xf32>
    %c0_692 = arith.constant 0 : index
    %c0_693 = arith.constant 0 : index
    %c0_694 = arith.constant 0 : index
    %1023 = vector.load %arg4[%c0_692, %c0_693, %c0_694] : memref<4x32x32xbf16, #tpu.memory_space<vmem>>, vector<1x32x32xbf16>
    %1024 = vector.shape_cast %1023 : vector<1x32x32xbf16> to vector<32x32xbf16>
    %cst_695 = arith.constant dense<0.000000e+00> : vector<2x32xf32>
    %1025 = tpu.matmul %1019, %1024, %cst_695 {dimension_numbers = #tpu.dot_dimension_numbers<[1], [0], [0], [1], [0, 0, 1, 1], [], []>} : vector<2x32xbf16>, vector<32x32xbf16>, vector<2x32xf32> -> vector<2x32xf32>
    %1026 = arith.addf %1022, %1025 : vector<2x32xf32>
    %c0_696 = arith.constant 0 : index
    %c0_697 = arith.constant 0 : index
    %c0_698 = arith.constant 0 : index
    %1027 = vector.load %arg5[%c0_696, %c0_697, %c0_698] : memref<4x1x32xf32, #tpu.memory_space<vmem>>, vector<1x1x32xf32>
    %1028 = vector.shape_cast %1027 : vector<1x1x32xf32> to vector<1x32xf32>
    %1029 = vector.broadcast %1028 : vector<1x32xf32> to vector<2x32xf32>
    %1030 = arith.addf %1026, %1029 : vector<2x32xf32>
    %c1_699 = arith.constant 1 : index
    %c0_700 = arith.constant 0 : index
    %c0_701 = arith.constant 0 : index
    %1031 = vector.load %arg3[%c1_699, %c0_700, %c0_701] : memref<4x32x32xbf16, #tpu.memory_space<vmem>>, vector<1x32x32xbf16>
    %1032 = vector.shape_cast %1031 : vector<1x32x32xbf16> to vector<32x32xbf16>
    %cst_702 = arith.constant dense<0.000000e+00> : vector<2x32xf32>
    %1033 = tpu.matmul %1018, %1032, %cst_702 {dimension_numbers = #tpu.dot_dimension_numbers<[1], [0], [0], [1], [0, 0, 1, 1], [], []>} : vector<2x32xbf16>, vector<32x32xbf16>, vector<2x32xf32> -> vector<2x32xf32>
    %c1_703 = arith.constant 1 : index
    %c0_704 = arith.constant 0 : index
    %c0_705 = arith.constant 0 : index
    %1034 = vector.load %arg4[%c1_703, %c0_704, %c0_705] : memref<4x32x32xbf16, #tpu.memory_space<vmem>>, vector<1x32x32xbf16>
    %1035 = vector.shape_cast %1034 : vector<1x32x32xbf16> to vector<32x32xbf16>
    %cst_706 = arith.constant dense<0.000000e+00> : vector<2x32xf32>
    %1036 = tpu.matmul %1019, %1035, %cst_706 {dimension_numbers = #tpu.dot_dimension_numbers<[1], [0], [0], [1], [0, 0, 1, 1], [], []>} : vector<2x32xbf16>, vector<32x32xbf16>, vector<2x32xf32> -> vector<2x32xf32>
    %1037 = arith.addf %1033, %1036 : vector<2x32xf32>
    %c1_707 = arith.constant 1 : index
    %c0_708 = arith.constant 0 : index
    %c0_709 = arith.constant 0 : index
    %1038 = vector.load %arg5[%c1_707, %c0_708, %c0_709] : memref<4x1x32xf32, #tpu.memory_space<vmem>>, vector<1x1x32xf32>
    %1039 = vector.shape_cast %1038 : vector<1x1x32xf32> to vector<1x32xf32>
    %1040 = vector.broadcast %1039 : vector<1x32xf32> to vector<2x32xf32>
    %1041 = arith.addf %1037, %1040 : vector<2x32xf32>
    %c2_710 = arith.constant 2 : index
    %c0_711 = arith.constant 0 : index
    %c0_712 = arith.constant 0 : index
    %1042 = vector.load %arg3[%c2_710, %c0_711, %c0_712] : memref<4x32x32xbf16, #tpu.memory_space<vmem>>, vector<1x32x32xbf16>
    %1043 = vector.shape_cast %1042 : vector<1x32x32xbf16> to vector<32x32xbf16>
    %cst_713 = arith.constant dense<0.000000e+00> : vector<2x32xf32>
    %1044 = tpu.matmul %1018, %1043, %cst_713 {dimension_numbers = #tpu.dot_dimension_numbers<[1], [0], [0], [1], [0, 0, 1, 1], [], []>} : vector<2x32xbf16>, vector<32x32xbf16>, vector<2x32xf32> -> vector<2x32xf32>
    %c2_714 = arith.constant 2 : index
    %c0_715 = arith.constant 0 : index
    %c0_716 = arith.constant 0 : index
    %1045 = vector.load %arg4[%c2_714, %c0_715, %c0_716] : memref<4x32x32xbf16, #tpu.memory_space<vmem>>, vector<1x32x32xbf16>
    %1046 = vector.shape_cast %1045 : vector<1x32x32xbf16> to vector<32x32xbf16>
    %cst_717 = arith.constant dense<0.000000e+00> : vector<2x32xf32>
    %1047 = tpu.matmul %1019, %1046, %cst_717 {dimension_numbers = #tpu.dot_dimension_numbers<[1], [0], [0], [1], [0, 0, 1, 1], [], []>} : vector<2x32xbf16>, vector<32x32xbf16>, vector<2x32xf32> -> vector<2x32xf32>
    %1048 = arith.addf %1044, %1047 : vector<2x32xf32>
    %c2_718 = arith.constant 2 : index
    %c0_719 = arith.constant 0 : index
    %c0_720 = arith.constant 0 : index
    %1049 = vector.load %arg5[%c2_718, %c0_719, %c0_720] : memref<4x1x32xf32, #tpu.memory_space<vmem>>, vector<1x1x32xf32>
    %1050 = vector.shape_cast %1049 : vector<1x1x32xf32> to vector<1x32xf32>
    %1051 = vector.broadcast %1050 : vector<1x32xf32> to vector<2x32xf32>
    %1052 = arith.addf %1048, %1051 : vector<2x32xf32>
    %c3_721 = arith.constant 3 : index
    %c0_722 = arith.constant 0 : index
    %c0_723 = arith.constant 0 : index
    %1053 = vector.load %arg3[%c3_721, %c0_722, %c0_723] : memref<4x32x32xbf16, #tpu.memory_space<vmem>>, vector<1x32x32xbf16>
    %1054 = vector.shape_cast %1053 : vector<1x32x32xbf16> to vector<32x32xbf16>
    %cst_724 = arith.constant dense<0.000000e+00> : vector<2x32xf32>
    %1055 = tpu.matmul %1018, %1054, %cst_724 {dimension_numbers = #tpu.dot_dimension_numbers<[1], [0], [0], [1], [0, 0, 1, 1], [], []>} : vector<2x32xbf16>, vector<32x32xbf16>, vector<2x32xf32> -> vector<2x32xf32>
    %c3_725 = arith.constant 3 : index
    %c0_726 = arith.constant 0 : index
    %c0_727 = arith.constant 0 : index
    %1056 = vector.load %arg4[%c3_725, %c0_726, %c0_727] : memref<4x32x32xbf16, #tpu.memory_space<vmem>>, vector<1x32x32xbf16>
    %1057 = vector.shape_cast %1056 : vector<1x32x32xbf16> to vector<32x32xbf16>
    %cst_728 = arith.constant dense<0.000000e+00> : vector<2x32xf32>
    %1058 = tpu.matmul %1019, %1057, %cst_728 {dimension_numbers = #tpu.dot_dimension_numbers<[1], [0], [0], [1], [0, 0, 1, 1], [], []>} : vector<2x32xbf16>, vector<32x32xbf16>, vector<2x32xf32> -> vector<2x32xf32>
    %1059 = arith.addf %1055, %1058 : vector<2x32xf32>
    %c3_729 = arith.constant 3 : index
    %c0_730 = arith.constant 0 : index
    %c0_731 = arith.constant 0 : index
    %1060 = vector.load %arg5[%c3_729, %c0_730, %c0_731] : memref<4x1x32xf32, #tpu.memory_space<vmem>>, vector<1x1x32xf32>
    %1061 = vector.shape_cast %1060 : vector<1x1x32xf32> to vector<1x32xf32>
    %1062 = vector.broadcast %1061 : vector<1x32xf32> to vector<2x32xf32>
    %1063 = arith.addf %1059, %1062 : vector<2x32xf32>
    %1064 = arith.negf %1030 : vector<2x32xf32>
    %1065 = math.exp %1064 : vector<2x32xf32>
    %cst_732 = arith.constant 1.000000e+00 : f32
    %1066 = vector.broadcast %cst_732 : f32 to vector<2x32xf32>
    %1067 = arith.addf %1066, %1065 : vector<2x32xf32>
    %1068 = arith.divf %1066, %1067 : vector<2x32xf32>
    %1069 = arith.negf %1041 : vector<2x32xf32>
    %1070 = math.exp %1069 : vector<2x32xf32>
    %cst_733 = arith.constant 1.000000e+00 : f32
    %1071 = vector.broadcast %cst_733 : f32 to vector<2x32xf32>
    %1072 = arith.addf %1071, %1070 : vector<2x32xf32>
    %1073 = arith.divf %1071, %1072 : vector<2x32xf32>
    %1074 = math.tanh %1052 : vector<2x32xf32>
    %1075 = arith.negf %1063 : vector<2x32xf32>
    %1076 = math.exp %1075 : vector<2x32xf32>
    %cst_734 = arith.constant 1.000000e+00 : f32
    %1077 = vector.broadcast %cst_734 : f32 to vector<2x32xf32>
    %1078 = arith.addf %1077, %1076 : vector<2x32xf32>
    %1079 = arith.divf %1077, %1078 : vector<2x32xf32>
    %1080 = arith.mulf %1073, %1017 : vector<2x32xf32>
    %1081 = arith.mulf %1068, %1074 : vector<2x32xf32>
    %1082 = arith.addf %1080, %1081 : vector<2x32xf32>
    %1083 = math.tanh %1082 : vector<2x32xf32>
    %1084 = arith.mulf %1079, %1083 : vector<2x32xf32>
    %c1_735 = arith.constant 1 : index
    %c0_736 = arith.constant 0 : index
    %c0_737 = arith.constant 0 : index
    %1085 = vector.load %arg9[%c1_735, %c0_736, %c0_737] : memref<2x2x32xf32, #tpu.memory_space<vmem>>, vector<1x2x32xf32>
    %1086 = vector.shape_cast %1085 : vector<1x2x32xf32> to vector<2x32xf32>
    %1087 = vector.shape_cast %1084 : vector<2x32xf32> to vector<1x2x32xf32>
    tpu.vector_store %arg9[%c1_735, %c0_736, %c0_737], %1087 {strides = array<i32>} : memref<2x2x32xf32, #tpu.memory_space<vmem>>, vector<1x2x32xf32>,
    %c1_738 = arith.constant 1 : index
    %c0_739 = arith.constant 0 : index
    %c0_740 = arith.constant 0 : index
    %1088 = vector.load %arg10[%c1_738, %c0_739, %c0_740] : memref<2x2x32xf32, #tpu.memory_space<vmem>>, vector<1x2x32xf32>
    %1089 = vector.shape_cast %1088 : vector<1x2x32xf32> to vector<2x32xf32>
    %1090 = vector.shape_cast %1082 : vector<2x32xf32> to vector<1x2x32xf32>
    tpu.vector_store %arg10[%c1_738, %c0_739, %c0_740], %1090 {strides = array<i32>} : memref<2x2x32xf32, #tpu.memory_space<vmem>>, vector<1x2x32xf32>,
    %c8_i32 = arith.constant 8 : i32
    %c0_i32_741 = arith.constant 0 : i32
    %1091 = arith.cmpi eq, %arg0, %c0_i32_741 : i32
    %1092 = arith.extui %1091 : i1 to i32
    %c0_i32_742 = arith.constant 0 : i32
    %1093 = arith.cmpi ne, %1092, %c0_i32_742 : i32
    scf.if %1093 {
      %c1_743 = arith.constant 1 : index
      %c0_744 = arith.constant 0 : index
      %c0_745 = arith.constant 0 : index
      %1094 = vector.load %arg9[%c1_743, %c0_744, %c0_745] : memref<2x2x32xf32, #tpu.memory_space<vmem>>, vector<1x2x32xf32>
      %1095 = vector.shape_cast %1094 : vector<1x2x32xf32> to vector<2x32xf32>
      %1096 = arith.truncf %1095 : vector<2x32xf32> to vector<2x32xbf16>
      %c0_746 = arith.constant 0 : index
      %c0_747 = arith.constant 0 : index
      %1097 = vector.load %arg6[%c0_746, %c0_747] : memref<32x4xbf16, #tpu.memory_space<vmem>>, vector<32x4xbf16>
      %cst_748 = arith.constant dense<0.000000e+00> : vector<2x4xf32>
      %1098 = tpu.matmul %1096, %1097, %cst_748 {dimension_numbers = #tpu.dot_dimension_numbers<[1], [0], [0], [1], [0, 0, 1, 1], [], []>} : vector<2x32xbf16>, vector<32x4xbf16>, vector<2x4xf32> -> vector<2x4xf32>
      %c0_749 = arith.constant 0 : index
      %c0_750 = arith.constant 0 : index
      %1099 = vector.load %arg7[%c0_749, %c0_750] : memref<1x4xf32, #tpu.memory_space<vmem>>, vector<1x4xf32>
      %1100 = vector.broadcast %1099 : vector<1x4xf32> to vector<2x4xf32>
      %1101 = arith.addf %1098, %1100 : vector<2x4xf32>
      %c0_751 = arith.constant 0 : index
      %c0_752 = arith.constant 0 : index
      %1102 = vector.load %arg8[%c0_751, %c0_752] : memref<2x4xf32, #tpu.memory_space<vmem>>, vector<2x4xf32>
      tpu.vector_store %arg8[%c0_751, %c0_752], %1101 {strides = array<i32>} : memref<2x4xf32, #tpu.memory_space<vmem>>, vector<2x4xf32>,
    } else {
    }
    return
  }
  func.func @transform_0(%arg0: i32) -> (i32, i32, i32, i32) {
    %c0_i32 = arith.constant 0 : i32
    %c0_i32_0 = arith.constant 0 : i32
    %c0_i32_1 = arith.constant 0 : i32
    %c0_i32_2 = arith.constant 0 : i32
    return %arg0, %c0_i32, %c0_i32_0, %c0_i32_1 : i32, i32, i32, i32
  }
  func.func @transform_1(%arg0: i32) -> (i32, i32, i32) {
    %c0_i32 = arith.constant 0 : i32
    %c0_i32_0 = arith.constant 0 : i32
    %c0_i32_1 = arith.constant 0 : i32
    %c0_i32_2 = arith.constant 0 : i32
    return %c0_i32, %c0_i32_0, %c0_i32_1 : i32, i32, i32
  }
  func.func @transform_2(%arg0: i32) -> (i32, i32, i32) {
    %c0_i32 = arith.constant 0 : i32
    %c0_i32_0 = arith.constant 0 : i32
    %c0_i32_1 = arith.constant 0 : i32
    %c0_i32_2 = arith.constant 0 : i32
    return %c0_i32, %c0_i32_0, %c0_i32_1 : i32, i32, i32
  }
  func.func @transform_3(%arg0: i32) -> (i32, i32, i32) {
    %c0_i32 = arith.constant 0 : i32
    %c0_i32_0 = arith.constant 0 : i32
    %c0_i32_1 = arith.constant 0 : i32
    %c0_i32_2 = arith.constant 0 : i32
    return %c0_i32, %c0_i32_0, %c0_i32_1 : i32, i32, i32
  }
  func.func @transform_4(%arg0: i32) -> (i32, i32, i32) {
    %c0_i32 = arith.constant 0 : i32
    %c0_i32_0 = arith.constant 0 : i32
    %c0_i32_1 = arith.constant 0 : i32
    %c0_i32_2 = arith.constant 0 : i32
    return %c0_i32, %c0_i32_0, %c0_i32_1 : i32, i32, i32
  }
  func.func @transform_5(%arg0: i32) -> (i32, i32) {
    %c0_i32 = arith.constant 0 : i32
    %c0_i32_0 = arith.constant 0 : i32
    %c0_i32_1 = arith.constant 0 : i32
    return %c0_i32, %c0_i32_0 : i32, i32
  }
  func.func @transform_6(%arg0: i32) -> (i32, i32) {
    %c0_i32 = arith.constant 0 : i32
    %c0_i32_0 = arith.constant 0 : i32
    %c0_i32_1 = arith.constant 0 : i32
    return %c0_i32, %c0_i32_0 : i32, i32
  }
  func.func @transform_7(%arg0: i32) -> (i32, i32) {
    %c0_i32 = arith.constant 0 : i32
    %c0_i32_0 = arith.constant 0 : i32
    %c0_i32_1 = arith.constant 0 : i32
    return %c0_i32, %c0_i32_0 : i32, i32
  }
}

</mosaic_0001>

<bundles_post_ra>
// kernel: lstm_model_forward.2
= control target key start
LH: loop header
LB: loop body
LE: loop exit
PB: predicated region body
PF: predicated region fallthrough
CT: control target
= control target key end

     0   :  { %v98_v0 = vmov 0.0   ;;  %vm99_vm0 = vmmov 0   ;;  %vm33_vm1 = vcmask 130048   ;;  %s138_s1 = inlined_call_operand.vmem [shape: bf16[16,128], index: 1, kind: input, shape index: {}]   ;;  %s139_s0 = inlined_call_operand.vmem [shape: f32[16,16], index: 0, kind: input, shape index: {}]   ;;  %s140_s2 = inlined_call_operand.vmem [shape: f32[1,128], index: 2, kind: input, shape index: {}]   ;;  %s141_s3 = inlined_call_operand.vmem [shape: f32[16,128], index: 3, kind: output, shape index: {}]  }
   0x1   :  { %89 = vmatprep.subr.bf16.mxu0 %v98_v0  ;;  %v97_v1 = vld [vmem:[%s138_s1] sm:$0xff]   ;;  %91 = vmatprep.mubr.msk.bf16.mxu0 %vm99_vm0, %v98_v0  ;;  %v16_v3 = vld [vmem:[%s139_s0 + $0x8] sm:$0xff] }
   0x2   :  { %v15_v2 = vld [vmem:[%s139_s0] sm:$0xff]  ;;  %90 = vmatpush3.bf16.msra.mxu0 %v97_v1 }
   0x3   :  { %v17_v4 = vpack.c.bf16 %v16_v3, %v15_v2  ;;  %v84_v5 = vld [vmem:[%s140_s2] ss:$0 sm:$0xff] }
   0x5   :  { %92 = vmatmul.mubr.msk.bf16.vlgmr.msra.gmra.mxu0 %vm33_vm1, %v17_v4 }
  0xc5   :  { %v71_v6 = vpop.f32.mrf.mxu0 }
  0xc6   :  { %v72_v7 = vadd.f32 %v84_v5, %v71_v6 }
  0xc7   :  { %v93_v8 = vpop.f32.mrf.mxu0 }
  0xc8   :  { %78 = vst [vmem:[%s141_s3] sm:$0xff] %v72_v7 }
  0xc9   :  { %v74_v9 = vpop.f32.mrf.mxu0 }
  0xca   :  { %v75_v10 = vadd.f32 %v84_v5, %v74_v9 }
  0xcb   :  { %v94_v11 = vpop.f32.mrf.mxu0 }
  0xcc   :  { %79 = vst [vmem:[%s141_s3 + $0x8] sm:$0xff] %v75_v10 }

// kernel: lstm_model_forward.3
= control target key start
LH: loop header
LB: loop body
LE: loop exit
PB: predicated region body
PF: predicated region fallthrough
CT: control target
= control target key end

     0   :  { %v8641_v1 = vmov 0.0   ;;  %vm8642_vm0 = vmmov 0   ;;  %vm32_vm1 = vcmask 254976   ;;  %vm60_vm2 = vcmask 261120   ;;  %s9995_s0 = inlined_call_operand.vmem [shape: f32[8,4,2,32], index: 0, kind: input, shape index: {}]   ;;  %s9996_s1 = inlined_call_operand.vmem [shape: bf16[4,32,32], index: 1, kind: input, shape index: {}]   ;;  %s9997_s2 = inlined_call_operand.vmem [shape: bf16[4,32,32], index: 2, kind: input, shape index: {}]   ;;  %s9998_s3 = inlined_call_operand.vmem [shape: bf16[4,32,32], index: 3, kind: input, shape index: {}]   ;;  %s9999_s4 = inlined_call_operand.vmem [shape: f32[4,1,32], index: 4, kind: input, shape index: {}]   ;;  %s10000_s5 = inlined_call_operand.vmem [shape: bf16[32,4], index: 5, kind: input, shape index: {}]   ;;  %s10001_s6 = inlined_call_operand.vmem [shape: f32[1,4], index: 6, kind: input, shape index: {}]   ;;  %s10002_s7 = inlined_call_operand.hbm [shape: f32[2,4], index: 7, kind: output, shape index: {}]  }
   0x1   :  { %v8169_v0 = vld [vmem:[%s9996_s1 + $0x8] sm:$0xff]   ;;  %7390 = vmatprep.subr.bf16.mxu0 %v8641_v1  ;;  %7398 = vmatprep.subr.bf16.mxu1 %v8641_v1  ;;  %v8170_v2 = vld [vmem:[%s9996_s1 + $0x18] sm:$0xff]   ;;  %v8171_v3 = vld [vmem:[%s9996_s1] sm:$0xff]   ;;  %33 = vst.msk [vmem:[#allocation2] sm:$0x3] %vm32_vm1, %v8641_v1 }
   0x2   :  { %7391 = vmatpush3.bf16.msra.mxu0 %v8169_v0  ;;  %7394 = vmatprep.mubr.msk.bf16.mxu0 %vm8642_vm0, %v8641_v1  ;;  %v8172_v4 = vld [vmem:[%s9996_s1 + $0x10] sm:$0xff]   ;;  %34 = vst.msk [vmem:[#allocation2 + $0x2] sm:$0x3] %vm32_vm1, %v8641_v1  ;;  %35 = vst.msk [vmem:[#allocation3] sm:$0x3] %vm32_vm1, %v8641_v1  ;;  %v8173_v5 = vld [vmem:[%s9996_s1 + $0x28] sm:$0xff]  }
   0x3   :  { %7399 = vmatpush3.bf16.msra.mxu1 %v8170_v2  ;;  %7392 = vmatprep.subr.bf16.mxu0 %v8641_v1  ;;  %36 = vst.msk [vmem:[#allocation3 + $0x2] sm:$0x3] %vm32_vm1, %v8641_v1  ;;  %v8174_v6 = vld [vmem:[%s9996_s1 + $0x38] sm:$0xff]   ;;  %v8175_v9 = vld [vmem:[%s9996_s1 + $0x20] sm:$0xff]   ;;  %v8176_v10 = vld [vmem:[%s9996_s1 + $0x30] sm:$0xff]  }
   0x4   :  { %7400 = vmatprep.subr.bf16.mxu1 %v8641_v1  ;;  %7402 = vmatprep.mubr.msk.bf16.mxu1 %vm8642_vm0, %v8641_v1  ;;  %v8177_v11 = vld [vmem:[%s9998_s3 + $0x8] sm:$0xff]   ;;  %v8178_v12 = vld [vmem:[%s9998_s3] sm:$0xff]   ;;  %v8179_v15 = vld [vmem:[%s9998_s3 + $0x18] sm:$0xff]  }
   0x5   :  { %v8180_v16 = vld [vmem:[%s9998_s3 + $0x10] sm:$0xff]   ;;  %v8181_v17 = vld [vmem:[%s9998_s3 + $0x28] sm:$0xff]   ;;  %v8182_v19 = vld [vmem:[%s9998_s3 + $0x20] sm:$0xff]  }
   0x6   :  { %7393 = vmatpush3.bf16.msra.mxu0 %v8171_v3  ;;  %v8183_v18 = vld [vmem:[%s9997_s2 + $0x8] sm:$0xff]   ;;  %v8185_v20 = vld [vmem:[%s9997_s2] sm:$0xff]   ;;  %v8184_v21 = vld [vmem:[%s9998_s3 + $0x38] sm:$0xff]  }
   0x7   :  { %7401 = vmatpush3.bf16.msra.mxu1 %v8172_v4  ;;  %7406 = vmatprep.subr.bf16.mxu0 %v8641_v1  ;;  %v8186_v22 = vld [vmem:[%s9998_s3 + $0x30] sm:$0xff]   ;;  %v8188_v23 = vld [vmem:[%s9996_s1 + $0x8] sm:$0xff]   ;;  %v8190_v24 = vld [vmem:[%s9996_s1] sm:$0xff]  }
   0x8   :  { %7414 = vmatprep.subr.bf16.mxu1 %v8641_v1  ;;  %v41_v7 = vld [vmem:[#allocation2] sm:$0x3] }
   0x9   :  { %v43_v8 = vpack.c.bf16 %v41_v7, %v41_v7  ;;  %v307_v13 = vld [vmem:[#allocation2 + $0x2] sm:$0x3] }
   0xa   :  { %v311_v14 = vpack.c.bf16 %v307_v13, %v307_v13 }
   0xb   :  { %7395 = vmatmul.mubr.msk.bf16.vlgmr.msra.gmra.mxu0 %vm60_vm2, %v43_v8  ;;  %7403 = vmatmul.mubr.msk.bf16.vlgmr.msra.gmra.mxu1 %vm60_vm2, %v43_v8 }
   0xc   :  { %7407 = vmatpush3.bf16.msra.mxu0 %v8173_v5  ;;  %7415 = vmatpush3.bf16.msra.mxu1 %v8174_v6 }
   0xd   :  { %7408 = vmatprep.subr.bf16.mxu0 %v8641_v1  ;;  %7416 = vmatprep.subr.bf16.mxu1 %v8641_v1 }
   0xe   :  { %7410 = vmatprep.mubr.msk.bf16.mxu0 %vm8642_vm0, %v8641_v1  ;;  %7418 = vmatprep.mubr.msk.bf16.mxu1 %vm8642_vm0, %v8641_v1 }
  0x10   :  { %7409 = vmatpush3.bf16.msra.mxu0 %v8175_v9  ;;  %7417 = vmatpush3.bf16.msra.mxu1 %v8176_v10 }
  0x11   :  { %7422 = vmatprep.subr.bf16.mxu0 %v8641_v1  ;;  %7430 = vmatprep.subr.bf16.mxu1 %v8641_v1 }
  0x13   :  { %7411 = vmatmul.mubr.msk.bf16.vlgmr.msra.gmra.mxu0 %vm60_vm2, %v43_v8  ;;  %7419 = vmatmul.mubr.msk.bf16.vlgmr.msra.gmra.mxu1 %vm60_vm2, %v43_v8 }
  0x14   :  { %7426 = vmatprep.mubr.msk.bf16.mxu0 %vm8642_vm0, %v8641_v1  ;;  %7434 = vmatprep.mubr.msk.bf16.mxu1 %vm8642_vm0, %v8641_v1 }
  0x15   :  { %7423 = vmatpush3.bf16.msra.mxu0 %v8177_v11  ;;  %7431 = vmatpush3.bf16.msra.mxu1 %v8183_v18 }
  0x16   :  { %7424 = vmatprep.subr.bf16.mxu0 %v8641_v1  ;;  %7432 = vmatprep.subr.bf16.mxu1 %v8641_v1 }
  0x19   :  { %7425 = vmatpush3.bf16.msra.mxu0 %v8178_v12  ;;  %7433 = vmatpush3.bf16.msra.mxu1 %v8185_v20 }
  0x1a   :  { %7438 = vmatprep.subr.bf16.mxu0 %v8641_v1  ;;  %7446 = vmatprep.subr.bf16.mxu1 %v8641_v1 }
  0x1c   :  { %7427 = vmatmul.mubr.msk.bf16.vlgmr.msra.gmra.mxu0 %vm60_vm2, %v311_v14 }
  0x1d   :  { %7439 = vmatpush3.bf16.msra.mxu0 %v8179_v15  ;;  %7442 = vmatprep.mubr.msk.bf16.mxu0 %vm8642_vm0, %v8641_v1 }
  0x1e   :  { %7440 = vmatprep.subr.bf16.mxu0 %v8641_v1 }
  0x21   :  { %7441 = vmatpush3.bf16.msra.mxu0 %v8180_v16 }
  0x22   :  { %7454 = vmatprep.subr.bf16.mxu0 %v8641_v1 }
  0x24   :  { %7443 = vmatmul.mubr.msk.bf16.vlgmr.msra.gmra.mxu0 %vm60_vm2, %v311_v14 }
  0x25   :  { %7455 = vmatpush3.bf16.msra.mxu0 %v8181_v17  ;;  %7458 = vmatprep.mubr.msk.bf16.mxu0 %vm8642_vm0, %v8641_v1 }
  0x26   :  { %7456 = vmatprep.subr.bf16.mxu0 %v8641_v1 }
  0x29   :  { %7457 = vmatpush3.bf16.msra.mxu0 %v8182_v19 }
  0x2a   :  { %7470 = vmatprep.subr.bf16.mxu0 %v8641_v1 }
  0x2c   :  { %7459 = vmatmul.mubr.msk.bf16.vlgmr.msra.gmra.mxu0 %vm60_vm2, %v311_v14 }
  0x2d   :  { %7471 = vmatpush3.bf16.msra.mxu0 %v8184_v21  ;;  %7474 = vmatprep.mubr.msk.bf16.mxu0 %vm8642_vm0, %v8641_v1 }
  0x2e   :  { %7472 = vmatprep.subr.bf16.mxu0 %v8641_v1 }
  0x31   :  { %7473 = vmatpush3.bf16.msra.mxu0 %v8186_v22 }
  0x32   :  { %7486 = vmatprep.subr.bf16.mxu0 %v8641_v1 }
  0x34   :  { %7475 = vmatmul.mubr.msk.bf16.vlgmr.msra.gmra.mxu0 %vm60_vm2, %v311_v14 }
  0x35   :  { %7487 = vmatpush3.bf16.msra.mxu0 %v8188_v23  ;;  %7490 = vmatprep.mubr.msk.bf16.mxu0 %vm8642_vm0, %v8641_v1 }
  0x36   :  { %7488 = vmatprep.subr.bf16.mxu0 %v8641_v1 }
  0x37   :  { %12 = vsyncpa [#allocation5], 0  ;;  %v37_v25 = vld [vmem:[%s9995_s0] sm:$0x3]  ;;  %v38_v26 = vld [vmem:[%s9995_s0 + $0x2] sm:$0x3] }
  0x38   :  { %v40_v39 = vld [vmem:[%s9995_s0 + $0x6] sm:$0x3]  ;;  %v39_v45 = vld [vmem:[%s9995_s0 + $0x4] sm:$0x3]  ;;  %v8187_v5 = vld [vmem:[%s9997_s2 + $0x18] sm:$0xff]   ;;  %s8643_s14 = smov [#allocation4]  }
  0x39   :  { %7489 = vmatpush3.bf16.msra.mxu0 %v8190_v24  ;;  %v42_v58 = vld [vmem:[#allocation3] sm:$0x3]  ;;  %v8189_v7 = vld [vmem:[%s9997_s2 + $0x10] sm:$0xff]   ;;  %v8191_v8 = vld [vmem:[%s9997_s2 + $0x28] sm:$0xff]   ;;  %s6379_s15 = sshll.u32 %s8643_s14, 4  ;;  %vm6371_vm3 = vcmask 25600   ;;  %s6380_s15 = int_to_ptr.vmem [resolvable:$true] %s6379_s15 }
  0x3a   :  { %7502 = vmatprep.subr.bf16.mxu0 %v8641_v1  ;;  %v8192_v10 = vld [vmem:[%s9996_s1 + $0x28] sm:$0xff]   ;;  %v8193_v12 = vld [vmem:[%s9997_s2 + $0x20] sm:$0xff]   ;;  %v8195_v14 = vld [vmem:[%s9997_s2 + $0x38] sm:$0xff]   ;;  %s8619_s16 = scalar_lea.vmem %s6380_s15, 32  ;;  %p8624_p1 = scmp.lt.s32.totalorder %s6380_s15, %s6380_s15 }
  0x3b   :  { %v8194_v13 = vld [vmem:[%s9996_s1 + $0x20] sm:$0xff]   ;;  %v8196_v15 = vld [vmem:[%s9997_s2 + $0x30] sm:$0xff]   ;;  %v8197_v16 = vld [vmem:[%s9996_s1 + $0x18] sm:$0xff]   ;;  %p8620_p0 = scmp.ne.s32.totalorder %s6380_s15, %s8619_s16  ;;  %p8625_p2 = scmp.lt.s32.totalorder %s8619_s16, %s8619_s16 }
  0x3c   :  { %v8198_v17 = vld [vmem:[%s9996_s1 + $0x10] sm:$0xff]   ;;  %v8199_v18 = vld [vmem:[%s9996_s1 + $0x38] sm:$0xff]  }
  0x3d   :  { %v8200_v19 = vld [vmem:[%s9996_s1 + $0x30] sm:$0xff]   ;;  %p8626_p3 = por %p8625_p2, %p8624_p1 }
  0x3f   :  { %p8627_p4 = pnand %p8626_p3, %p8620_p0 }
  0xcb   :  { %v98_v27 = vpop.f32.mrf.mxu0  ;;  %v156_v28 = vpop.f32.mrf.mxu1 }
  0xcc   :  { %v104_v29 = vadd.f32 %v98_v27, %v37_v25  ;;  %v162_v30 = vadd.f32 %v156_v28, %v38_v26 }
  0xcd   :  { %v7396_v31 = vpop.f32.mrf.mxu0  ;;  %v7404_v32 = vpop.f32.mrf.mxu1 }
  0xce   :  { %v6411_v33 = vmul.f32 -1.442695, %v104_v29  ;;  %v6412_v34 = vmul.f32 -1.442695, %v162_v30 }
  0xcf   :  { %v101_v35 = vpop.f32.mrf.mxu0  ;;  %v159_v36 = vpop.f32.mrf.mxu1 }
  0xd0   :  { %8363 = vpow2.f32 %v6411_v33  ;;  %v8201_v36 = vld [vmem:[%s9998_s3 + $0x8] sm:$0xff]  }
  0xd1   :  { %8365 = vpow2.f32 %v6412_v34  ;;  %v7397_v37 = vpop.f32.mrf.mxu0  ;;  %v7405_v38 = vpop.f32.mrf.mxu1 }
  0xd2   :  { %v8202_v37 = vld [vmem:[%s9998_s3] sm:$0xff]   ;;  %v8205_v38 = vld [vmem:[%s9997_s2 + $0x8] sm:$0xff]  }
  0xd3   :  { %v214_v40 = vpop.f32.mrf.mxu0  ;;  %v272_v41 = vpop.f32.mrf.mxu1 }
  0xd4   :  { %v278_v42 = vadd.f32 %v272_v41, %v40_v39  ;;  %v220_v51 = vadd.f32 %v214_v40, %v39_v45  ;;  %v8207_v39 = vld [vmem:[%s9997_s2] sm:$0xff]  }
  0xd5   :  { %v7412_v43 = vpop.f32.mrf.mxu0  ;;  %v7420_v44 = vpop.f32.mrf.mxu1  ;;  %v8907_v41 = vld [vmem:[%s9999_s4] ss:$0 sm:$0xff] }
  0xd6   :  { %v6413_v48 = vmul.f32 -1.442695, %v278_v42 }
  0xd7   :  { %v217_v46 = vpop.f32.mrf.mxu0  ;;  %v275_v47 = vpop.f32.mrf.mxu1 }
  0xd8   :  { %8367 = vpow2.f32 %v6413_v48 }
  0xd9   :  { %v7413_v49 = vpop.f32.mrf.mxu0  ;;  %v7421_v50 = vpop.f32.mrf.mxu1  ;;  %8369 = vtanh.f32 %v220_v51 }
  0xda   :  { %v8913_v49 = vld [vmem:[%s9999_s4 + $0x1] ss:$0 sm:$0xff] }
  0xdc   :  { %v369_v20 = vpop.f32.mrf.mxu0 }
  0xdd   :  { %v8364_v52 = vpop.eup %8363 }
  0xde   :  { %v8366_v53 = vpop.eup %8365  ;;  %v282_v54 = vadd.f32 1.0, %v8364_v52  ;;  %v7428_v21 = vpop.f32.mrf.mxu0 }
  0xdf   :  { %v288_v55 = vadd.f32 1.0, %v8366_v53 }
  0xe0   :  { %8371 = vrcp.f32 %v282_v54  ;;  %v372_v22 = vpop.f32.mrf.mxu0 }
  0xe1   :  { %8373 = vrcp.f32 %v288_v55 }
  0xe2   :  { %v7429_v23 = vpop.f32.mrf.mxu0 }
  0xe3   :  { %v6473_v23 = vld [vmem:[%s9995_s0 + $0xa] sm:$0x3] }
  0xe4   :  { %v494_v24 = vpop.f32.mrf.mxu0 }
  0xe5   :  { %v8368_v56 = vpop.eup %8367 }
  0xe6   :  { %v8370_v57 = vpop.eup %8369  ;;  %v295_v60 = vadd.f32 1.0, %v8368_v56  ;;  %v7444_v25 = vpop.f32.mrf.mxu0 }
  0xe8   :  { %8375 = vrcp.f32 %v295_v60  ;;  %v497_v26 = vpop.f32.mrf.mxu0 }
  0xea   :  { %v7445_v27 = vpop.f32.mrf.mxu0 }
  0xec   :  { %v617_v28 = vpop.f32.mrf.mxu0 }
  0xed   :  { %v8372_v59 = vpop.eup %8371 }
  0xee   :  { %v8374_v61 = vpop.eup %8373  ;;  %v299_v62 = vmul.f32 %v8372_v59, %v8370_v57  ;;  %v7460_v29 = vpop.f32.mrf.mxu0 }
  0xef   :  { %v298_v63 = vmul.f32 %v8374_v61, %v42_v58 }
  0xf0   :  { %v620_v30 = vpop.f32.mrf.mxu0 }
  0xf1   :  { %v300_v0 = vadd.f32 %v299_v62, %v298_v63  ;;  %v6472_v62 = vld [vmem:[%s9995_s0 + $0x8] sm:$0x3]  ;;  %v6475_v30 = vld [vmem:[%s9995_s0 + $0xe] sm:$0x3] }
  0xf2   :  { %v7461_v31 = vpop.f32.mrf.mxu0 }
  0xf3   :  { %8377 = vtanh.f32 %v300_v0  ;;  %305 = vst.msk [vmem:[#allocation3] sm:$0x3] %vm32_vm1, %v300_v0 }
  0xf4   :  { %v740_v32 = vpop.f32.mrf.mxu0 }
  0xf5   :  { %v8376_v2 = vpop.eup %8375 }
  0xf6   :  { %v7476_v33 = vpop.f32.mrf.mxu0 }
  0xf8   :  { %v743_v34 = vpop.f32.mrf.mxu0 }
  0xf9   :  { %v309_v34 = vld [vmem:[#allocation3 + $0x2] sm:$0x3] }
  0xfa   :  { %v7477_v35 = vpop.f32.mrf.mxu0 }
 0x100   :  { %v8378_v3 = vpop.eup %8377 }
 0x101   :  { %v302_v4 = vmul.f32 %v8378_v3, %v8376_v2 }
 0x103   :  { %304 = vst.msk [vmem:[#allocation2] sm:$0x3] %vm32_vm1, %v302_v4  ;;  %v310_v6 = vpack.c.bf16 %v302_v4, %v302_v4 }
 0x105   :  { %7435 = vmatmul.mubr.msk.bf16.vlgmr.msra.gmra.mxu1 %vm60_vm2, %v310_v6 }
 0x106   :  { %7447 = vmatpush3.bf16.msra.mxu1 %v8187_v5  ;;  %7450 = vmatprep.mubr.msk.bf16.mxu1 %vm8642_vm0, %v8641_v1 }
 0x107   :  { %7448 = vmatprep.subr.bf16.mxu1 %v8641_v1 }
 0x10a   :  { %7449 = vmatpush3.bf16.msra.mxu1 %v8189_v7  ;;  %v838_v9 = vld [vmem:[#allocation2] sm:$0x3] }
 0x10b   :  { %7462 = vmatprep.subr.bf16.mxu1 %v8641_v1  ;;  %v840_v11 = vpack.c.bf16 %v838_v9, %v838_v9  ;;  %v8922_v9 = vld [vmem:[%s9999_s4 + $0x2] ss:$0 sm:$0xff] }
 0x10d   :  { %7451 = vmatmul.mubr.msk.bf16.vlgmr.msra.gmra.mxu1 %vm60_vm2, %v310_v6  ;;  %7491 = vmatmul.mubr.msk.bf16.vlgmr.msra.gmra.mxu0 %vm60_vm2, %v840_v11 }
 0x10e   :  { %7463 = vmatpush3.bf16.msra.mxu1 %v8191_v8  ;;  %7503 = vmatpush3.bf16.msra.mxu0 %v8192_v10 }
 0x10f   :  { %7464 = vmatprep.subr.bf16.mxu1 %v8641_v1  ;;  %7504 = vmatprep.subr.bf16.mxu0 %v8641_v1 }
 0x110   :  { %7466 = vmatprep.mubr.msk.bf16.mxu1 %vm8642_vm0, %v8641_v1  ;;  %7506 = vmatprep.mubr.msk.bf16.mxu0 %vm8642_vm0, %v8641_v1 }
 0x112   :  { %7465 = vmatpush3.bf16.msra.mxu1 %v8193_v12  ;;  %7505 = vmatpush3.bf16.msra.mxu0 %v8194_v13  ;;  %v8927_v12 = vld [vmem:[%s9999_s4 + $0x3] ss:$0 sm:$0xff] }
 0x113   :  { %7478 = vmatprep.subr.bf16.mxu1 %v8641_v1  ;;  %7518 = vmatprep.subr.bf16.mxu0 %v8641_v1 }
 0x115   :  { %7467 = vmatmul.mubr.msk.bf16.vlgmr.msra.gmra.mxu1 %vm60_vm2, %v310_v6  ;;  %7507 = vmatmul.mubr.msk.bf16.vlgmr.msra.gmra.mxu0 %vm60_vm2, %v840_v11 }
 0x116   :  { %7479 = vmatpush3.bf16.msra.mxu1 %v8195_v14  ;;  %7482 = vmatprep.mubr.msk.bf16.mxu1 %vm8642_vm0, %v8641_v1 }
 0x117   :  { %7480 = vmatprep.subr.bf16.mxu1 %v8641_v1  ;;  %7522 = vmatprep.mubr.msk.bf16.mxu0 %vm8642_vm0, %v8641_v1 }
 0x118   :  { %7519 = vmatpush3.bf16.msra.mxu0 %v8201_v36 }
 0x119   :  { %7520 = vmatprep.subr.bf16.mxu0 %v8641_v1 }
 0x11a   :  { %7481 = vmatpush3.bf16.msra.mxu1 %v8196_v15 }
 0x11b   :  { %7494 = vmatprep.subr.bf16.mxu1 %v8641_v1 }
 0x11c   :  { %7521 = vmatpush3.bf16.msra.mxu0 %v8202_v37 }
 0x11d   :  { %7483 = vmatmul.mubr.msk.bf16.vlgmr.msra.gmra.mxu1 %vm60_vm2, %v310_v6  ;;  %7534 = vmatprep.subr.bf16.mxu0 %v8641_v1 }
 0x11e   :  { %7495 = vmatpush3.bf16.msra.mxu1 %v8197_v16  ;;  %7498 = vmatprep.mubr.msk.bf16.mxu1 %vm8642_vm0, %v8641_v1 }
 0x11f   :  { %7496 = vmatprep.subr.bf16.mxu1 %v8641_v1 }
 0x122   :  { %7497 = vmatpush3.bf16.msra.mxu1 %v8198_v17 }
 0x123   :  { %7510 = vmatprep.subr.bf16.mxu1 %v8641_v1 }
 0x125   :  { %7499 = vmatmul.mubr.msk.bf16.vlgmr.msra.gmra.mxu1 %vm60_vm2, %v840_v11 }
 0x126   :  { %7511 = vmatpush3.bf16.msra.mxu1 %v8199_v18  ;;  %7514 = vmatprep.mubr.msk.bf16.mxu1 %vm8642_vm0, %v8641_v1 }
 0x127   :  { %7512 = vmatprep.subr.bf16.mxu1 %v8641_v1 }
 0x12a   :  { %7513 = vmatpush3.bf16.msra.mxu1 %v8200_v19 }
 0x12b   :  { %7526 = vmatprep.subr.bf16.mxu1 %v8641_v1 }
 0x12d   :  { %7515 = vmatmul.mubr.msk.bf16.vlgmr.msra.gmra.mxu1 %vm60_vm2, %v840_v11 }
 0x12e   :  { %7530 = vmatprep.mubr.msk.bf16.mxu1 %vm8642_vm0, %v8641_v1  ;;  %7527 = vmatpush3.bf16.msra.mxu1 %v8205_v38 }
 0x12f   :  { %7528 = vmatprep.subr.bf16.mxu1 %v8641_v1 }
 0x132   :  { %7529 = vmatpush3.bf16.msra.mxu1 %v8207_v39 }
 0x133   :  { %7542 = vmatprep.subr.bf16.mxu1 %v8641_v1 }
 0x1c5   :  { %v424_v40 = vpop.f32.mrf.mxu1 }
 0x1c6   :  { %v425_v42 = vadd.f32 %v424_v40, %v369_v20 }
 0x1c7   :  { %v7436_v43 = vpop.f32.mrf.mxu1 }
 0x1c8   :  { %v437_v44 = vadd.f32 %v8907_v41, %v425_v42 }
 0x1c9   :  { %v427_v45 = vpop.f32.mrf.mxu1 }
 0x1ca   :  { %v6469_v46 = vmul.f32 -1.442695, %v437_v44  ;;  %v6474_v44 = vld [vmem:[%s9995_s0 + $0xc] sm:$0x3] }
 0x1cb   :  { %v7437_v47 = vpop.f32.mrf.mxu1 }
 0x1cc   :  { %8379 = vpow2.f32 %v6469_v46 }
 0x1cd   :  { %v546_v48 = vpop.f32.mrf.mxu1  ;;  %v894_v50 = vpop.f32.mrf.mxu0 }
 0x1ce   :  { %v547_v51 = vadd.f32 %v546_v48, %v494_v24  ;;  %v900_v2 = vadd.f32 %v6472_v62, %v894_v50 }
 0x1cf   :  { %v7452_v52 = vpop.f32.mrf.mxu1  ;;  %v7492_v53 = vpop.f32.mrf.mxu0 }
 0x1d0   :  { %v560_v54 = vadd.f32 %v8913_v49, %v547_v51  ;;  %v6500_v10 = vmul.f32 -1.442695, %v900_v2 }
 0x1d1   :  { %v549_v55 = vpop.f32.mrf.mxu1  ;;  %v897_v56 = vpop.f32.mrf.mxu0 }
 0x1d2   :  { %v6470_v57 = vmul.f32 -1.442695, %v560_v54 }
 0x1d3   :  { %v7453_v58 = vpop.f32.mrf.mxu1  ;;  %v7493_v59 = vpop.f32.mrf.mxu0 }
 0x1d4   :  { %8381 = vpow2.f32 %v6470_v57 }
 0x1d5   :  { %v669_v60 = vpop.f32.mrf.mxu1  ;;  %v1008_v61 = vpop.f32.mrf.mxu0  ;;  %8383 = vpow2.f32 %v6500_v10 }
 0x1d6   :  { %v670_v6 = vadd.f32 %v669_v60, %v617_v28  ;;  %v1014_v51 = vadd.f32 %v6474_v44, %v1008_v61  ;;  %v839_v61 = vld [vmem:[#allocation3] sm:$0x3] }
 0x1d7   :  { %v7468_v63 = vpop.f32.mrf.mxu1  ;;  %v7508_v0 = vpop.f32.mrf.mxu0 }
 0x1d8   :  { %v683_v15 = vadd.f32 %v8922_v9, %v670_v6  ;;  %v8204_v6 = vld [vmem:[%s9998_s3 + $0x10] sm:$0xff]  }
 0x1d9   :  { %v672_v3 = vpop.f32.mrf.mxu1  ;;  %v1011_v4 = vpop.f32.mrf.mxu0 }
 0x1da   :  { %v8380_v5 = vpop.eup %8379  ;;  %v8203_v4 = vld [vmem:[%s9998_s3 + $0x18] sm:$0xff]  }
 0x1db   :  { %v7469_v7 = vpop.f32.mrf.mxu1  ;;  %v7509_v8 = vpop.f32.mrf.mxu0  ;;  %v810_v13 = vadd.f32 1.0, %v8380_v5 }
 0x1dc   :  { %v8206_v7 = vld [vmem:[%s9998_s3 + $0x28] sm:$0xff]  }
 0x1dd   :  { %v792_v11 = vpop.f32.mrf.mxu1  ;;  %8385 = vrcp.f32 %v810_v13 }
 0x1de   :  { %v793_v14 = vadd.f32 %v792_v11, %v740_v32  ;;  %8387 = vtanh.f32 %v683_v15  ;;  %v8208_v11 = vld [vmem:[%s9998_s3 + $0x20] sm:$0xff]  }
 0x1df   :  { %v7484_v16 = vpop.f32.mrf.mxu1 }
 0x1e0   :  { %v806_v17 = vadd.f32 %v8927_v12, %v793_v14  ;;  %v8209_v14 = vld [vmem:[%s9997_s2 + $0x18] sm:$0xff]  }
 0x1e1   :  { %v8382_v18 = vpop.eup %8381  ;;  %v795_v19 = vpop.f32.mrf.mxu1  ;;  %v8210_v16 = vld [vmem:[%s9998_s3 + $0x38] sm:$0xff]  }
 0x1e2   :  { %v816_v20 = vadd.f32 1.0, %v8382_v18  ;;  %v6471_v21 = vmul.f32 -1.442695, %v806_v17  ;;  %v8384_v32 = vpop.eup %8383  ;;  %v8211_v17 = vld [vmem:[%s9997_s2 + $0x10] sm:$0xff]   ;;  %v8213_v19 = vld [vmem:[%s9997_s2 + $0x28] sm:$0xff]  }
 0x1e3   :  { %v7485_v22 = vpop.f32.mrf.mxu1  ;;  %v1075_v48 = vadd.f32 1.0, %v8384_v32  ;;  %v8212_v18 = vld [vmem:[%s9998_s3 + $0x30] sm:$0xff]  }
 0x1e4   :  { %8389 = vrcp.f32 %v816_v20  ;;  %v8214_v20 = vld [vmem:[%s9996_s1 + $0x8] sm:$0xff]   ;;  %v8216_v22 = vld [vmem:[%s9996_s1] sm:$0xff]   ;;  %v8224_v32 = vld [vmem:[%s9996_s1 + $0x30] sm:$0xff]  }
 0x1e5   :  { %8391 = vpow2.f32 %v6471_v21  ;;  %v951_v24 = vpop.f32.mrf.mxu1  ;;  %v8215_v21 = vld [vmem:[%s9997_s2 + $0x20] sm:$0xff]  }
 0x1e6   :  { %v957_v25 = vadd.f32 %v6473_v23, %v951_v24  ;;  %v8217_v23 = vld [vmem:[%s9997_s2 + $0x38] sm:$0xff]  }
 0x1e7   :  { %v7500_v26 = vpop.f32.mrf.mxu1 }
 0x1e8   :  { %v6501_v27 = vmul.f32 -1.442695, %v957_v25  ;;  %v8218_v25 = vld [vmem:[%s9996_s1 + $0x28] sm:$0xff]  }
 0x1e9   :  { %v954_v28 = vpop.f32.mrf.mxu1 }
 0x1ea   :  { %8393 = vpow2.f32 %v6501_v27  ;;  %v8386_v33 = vpop.eup %8385  ;;  %v8219_v27 = vld [vmem:[%s9997_s2 + $0x30] sm:$0xff]   ;;  %v8220_v28 = vld [vmem:[%s9996_s1 + $0x20] sm:$0xff]  }
 0x1eb   :  { %v7501_v29 = vpop.f32.mrf.mxu1  ;;  %v8388_v37 = vpop.eup %8387 }
 0x1ec   :  { %v827_v43 = vmul.f32 %v8388_v37, %v8386_v33  ;;  %v8221_v29 = vld [vmem:[%s9996_s1 + $0x18] sm:$0xff]   ;;  %v8225_v33 = vld [vmem:[%s9998_s3 + $0x8] sm:$0xff]  }
 0x1ed   :  { %v1065_v31 = vpop.f32.mrf.mxu1 }
 0x1ee   :  { %v1071_v35 = vadd.f32 %v6475_v30, %v1065_v31  ;;  %v8222_v30 = vld [vmem:[%s9996_s1 + $0x10] sm:$0xff]   ;;  %v8223_v31 = vld [vmem:[%s9996_s1 + $0x38] sm:$0xff]  }
 0x1ef   :  { %v7516_v36 = vpop.f32.mrf.mxu1 }
 0x1f0   :  { %v6502_v46 = vmul.f32 -1.442695, %v1071_v35  ;;  %v8229_v35 = vld [vmem:[%s9997_s2 + $0x8] sm:$0xff]   ;;  %v8231_v36 = vld [vmem:[%s9997_s2] sm:$0xff]  }
 0x1f1   :  { %v8390_v38 = vpop.eup %8389  ;;  %v1068_v39 = vpop.f32.mrf.mxu1 }
 0x1f2   :  { %v8392_v40 = vpop.eup %8391  ;;  %v826_v42 = vmul.f32 %v8390_v38, %v309_v34  ;;  %v8226_v34 = vld [vmem:[%s9998_s3] sm:$0xff]  }
 0x1f3   :  { %v823_v45 = vadd.f32 1.0, %v8392_v40  ;;  %v7517_v47 = vpop.f32.mrf.mxu1 }
 0x1f4   :  { %v828_v50 = vadd.f32 %v827_v43, %v826_v42 }
 0x1f5   :  { %8395 = vrcp.f32 %v823_v45 }
 0x1f6   :  { %8397 = vtanh.f32 %v828_v50  ;;  %832 = vst.msk [vmem:[#allocation3 + $0x2] sm:$0x3] %vm32_vm1, %v828_v50 }
 0x1f7   :  { %v8394_v52 = vpop.eup %8393  ;;  %8399 = vpow2.f32 %v6502_v46 }
 0x1f8   :  { %8401 = vrcp.f32 %v1075_v48  ;;  %v1081_v53 = vadd.f32 1.0, %v8394_v52 }
 0x1f9   :  { %8403 = vtanh.f32 %v1014_v51 }
 0x1fa   :  { %8405 = vrcp.f32 %v1081_v53 }
 0x202   :  { %v8396_v54 = vpop.eup %8395 }
 0x203   :  { %v8398_v55 = vpop.eup %8397 }
 0x204   :  { %v8400_v56 = vpop.eup %8399  ;;  %v830_v57 = vmul.f32 %v8398_v55, %v8396_v54 }
 0x205   :  { %v8402_v58 = vpop.eup %8401  ;;  %v1088_v62 = vadd.f32 1.0, %v8400_v56 }
 0x206   :  { %v8404_v59 = vpop.eup %8403  ;;  %831 = vst.msk [vmem:[#allocation2 + $0x2] sm:$0x3] %vm32_vm1, %v830_v57 }
 0x207   :  { %v8406_v60 = vpop.eup %8405  ;;  %v1092_v63 = vmul.f32 %v8404_v59, %v8402_v58  ;;  %8407 = vrcp.f32 %v1088_v62 }
 0x208   :  { %v1091_v0 = vmul.f32 %v8406_v60, %v839_v61 }
 0x20a   :  { %v1093_v2 = vadd.f32 %v1092_v63, %v1091_v0 }
 0x20c   :  { %8409 = vtanh.f32 %v1093_v2  ;;  %1097 = vst.msk [vmem:[#allocation3] sm:$0x3] %vm32_vm1, %v1093_v2 }
 0x20d   :  { %v1098_v3 = vld [vmem:[#allocation2 + $0x2] sm:$0x3] }
 0x20e   :  { %v1101_v5 = vpack.c.bf16 %v1098_v3, %v1098_v3 }
 0x210   :  { %7523 = vmatmul.mubr.msk.bf16.vlgmr.msra.gmra.mxu0 %vm60_vm2, %v1101_v5 }
 0x211   :  { %7535 = vmatpush3.bf16.msra.mxu0 %v8203_v4  ;;  %7538 = vmatprep.mubr.msk.bf16.mxu0 %vm8642_vm0, %v8641_v1 }
 0x212   :  { %7536 = vmatprep.subr.bf16.mxu0 %v8641_v1 }
 0x214   :  { %v8408_v8 = vpop.eup %8407 }
 0x215   :  { %7537 = vmatpush3.bf16.msra.mxu0 %v8204_v6 }
 0x216   :  { %7550 = vmatprep.subr.bf16.mxu0 %v8641_v1 }
 0x218   :  { %7539 = vmatmul.mubr.msk.bf16.vlgmr.msra.gmra.mxu0 %vm60_vm2, %v1101_v5 }
 0x219   :  { %v8410_v10 = vpop.eup %8409  ;;  %7551 = vmatpush3.bf16.msra.mxu0 %v8206_v7  ;;  %7554 = vmatprep.mubr.msk.bf16.mxu0 %vm8642_vm0, %v8641_v1 }
 0x21a   :  { %7552 = vmatprep.subr.bf16.mxu0 %v8641_v1  ;;  %v1095_v13 = vmul.f32 %v8410_v10, %v8408_v8  ;;  %v6561_v8 = vld [vmem:[%s9995_s0 + $0x10] sm:$0x3] }
 0x21c   :  { %1096 = vst.msk [vmem:[#allocation2] sm:$0x3] %vm32_vm1, %v1095_v13  ;;  %v1100_v15 = vpack.c.bf16 %v1095_v13, %v1095_v13 }
 0x21d   :  { %7553 = vmatpush3.bf16.msra.mxu0 %v8208_v11 }
 0x21e   :  { %7531 = vmatmul.mubr.msk.bf16.vlgmr.msra.gmra.mxu1 %vm60_vm2, %v1100_v15  ;;  %7566 = vmatprep.subr.bf16.mxu0 %v8641_v1 }
 0x21f   :  { %7543 = vmatpush3.bf16.msra.mxu1 %v8209_v14  ;;  %7546 = vmatprep.mubr.msk.bf16.mxu1 %vm8642_vm0, %v8641_v1 }
 0x220   :  { %7555 = vmatmul.mubr.msk.bf16.vlgmr.msra.gmra.mxu0 %vm60_vm2, %v1101_v5  ;;  %7544 = vmatprep.subr.bf16.mxu1 %v8641_v1 }
 0x221   :  { %7567 = vmatpush3.bf16.msra.mxu0 %v8210_v16  ;;  %7570 = vmatprep.mubr.msk.bf16.mxu0 %vm8642_vm0, %v8641_v1 }
 0x222   :  { %7568 = vmatprep.subr.bf16.mxu0 %v8641_v1 }
 0x223   :  { %7545 = vmatpush3.bf16.msra.mxu1 %v8211_v17  ;;  %v1619_v24 = vld [vmem:[#allocation2] sm:$0x3] }
 0x224   :  { %7558 = vmatprep.subr.bf16.mxu1 %v8641_v1  ;;  %v1621_v26 = vpack.c.bf16 %v1619_v24, %v1619_v24 }
 0x225   :  { %7569 = vmatpush3.bf16.msra.mxu0 %v8212_v18 }
 0x226   :  { %7547 = vmatmul.mubr.msk.bf16.vlgmr.msra.gmra.mxu1 %vm60_vm2, %v1100_v15  ;;  %7582 = vmatprep.subr.bf16.mxu0 %v8641_v1 }
 0x227   :  { %7559 = vmatpush3.bf16.msra.mxu1 %v8213_v19  ;;  %7562 = vmatprep.mubr.msk.bf16.mxu1 %vm8642_vm0, %v8641_v1 }
 0x228   :  { %7571 = vmatmul.mubr.msk.bf16.vlgmr.msra.gmra.mxu0 %vm60_vm2, %v1101_v5  ;;  %7560 = vmatprep.subr.bf16.mxu1 %v8641_v1 }
 0x229   :  { %7583 = vmatpush3.bf16.msra.mxu0 %v8214_v20  ;;  %7586 = vmatprep.mubr.msk.bf16.mxu0 %vm8642_vm0, %v8641_v1 }
 0x22a   :  { %7584 = vmatprep.subr.bf16.mxu0 %v8641_v1 }
 0x22b   :  { %7561 = vmatpush3.bf16.msra.mxu1 %v8215_v21 }
 0x22c   :  { %7574 = vmatprep.subr.bf16.mxu1 %v8641_v1 }
 0x22d   :  { %7585 = vmatpush3.bf16.msra.mxu0 %v8216_v22 }
 0x22e   :  { %7563 = vmatmul.mubr.msk.bf16.vlgmr.msra.gmra.mxu1 %vm60_vm2, %v1100_v15  ;;  %7598 = vmatprep.subr.bf16.mxu0 %v8641_v1 }
 0x22f   :  { %7575 = vmatpush3.bf16.msra.mxu1 %v8217_v23  ;;  %7578 = vmatprep.mubr.msk.bf16.mxu1 %vm8642_vm0, %v8641_v1 }
 0x230   :  { %7587 = vmatmul.mubr.msk.bf16.vlgmr.msra.gmra.mxu0 %vm60_vm2, %v1621_v26  ;;  %7576 = vmatprep.subr.bf16.mxu1 %v8641_v1 }
 0x231   :  { %7599 = vmatpush3.bf16.msra.mxu0 %v8218_v25  ;;  %7602 = vmatprep.mubr.msk.bf16.mxu0 %vm8642_vm0, %v8641_v1 }
 0x232   :  { %7600 = vmatprep.subr.bf16.mxu0 %v8641_v1 }
 0x233   :  { %7577 = vmatpush3.bf16.msra.mxu1 %v8219_v27 }
 0x234   :  { %7590 = vmatprep.subr.bf16.mxu1 %v8641_v1 }
 0x235   :  { %7601 = vmatpush3.bf16.msra.mxu0 %v8220_v28 }
 0x236   :  { %7579 = vmatmul.mubr.msk.bf16.vlgmr.msra.gmra.mxu1 %vm60_vm2, %v1100_v15  ;;  %7614 = vmatprep.subr.bf16.mxu0 %v8641_v1 }
 0x237   :  { %7591 = vmatpush3.bf16.msra.mxu1 %v8221_v29  ;;  %7594 = vmatprep.mubr.msk.bf16.mxu1 %vm8642_vm0, %v8641_v1 }
 0x238   :  { %7603 = vmatmul.mubr.msk.bf16.vlgmr.msra.gmra.mxu0 %vm60_vm2, %v1621_v26  ;;  %7592 = vmatprep.subr.bf16.mxu1 %v8641_v1 }
 0x239   :  { %7618 = vmatprep.mubr.msk.bf16.mxu0 %vm8642_vm0, %v8641_v1  ;;  %7615 = vmatpush3.bf16.msra.mxu0 %v8225_v33  ;;  %v6562_v33 = vld [vmem:[%s9995_s0 + $0x12] sm:$0x3] }
 0x23a   :  { %7616 = vmatprep.subr.bf16.mxu0 %v8641_v1 }
 0x23b   :  { %7593 = vmatpush3.bf16.msra.mxu1 %v8222_v30 }
 0x23c   :  { %7606 = vmatprep.subr.bf16.mxu1 %v8641_v1 }
 0x23d   :  { %7617 = vmatpush3.bf16.msra.mxu0 %v8226_v34 }
 0x23e   :  { %7595 = vmatmul.mubr.msk.bf16.vlgmr.msra.gmra.mxu1 %vm60_vm2, %v1621_v26  ;;  %7630 = vmatprep.subr.bf16.mxu0 %v8641_v1 }
 0x23f   :  { %7607 = vmatpush3.bf16.msra.mxu1 %v8223_v31  ;;  %7610 = vmatprep.mubr.msk.bf16.mxu1 %vm8642_vm0, %v8641_v1 }
 0x240   :  { %7608 = vmatprep.subr.bf16.mxu1 %v8641_v1 }
 0x243   :  { %7609 = vmatpush3.bf16.msra.mxu1 %v8224_v32 }
 0x244   :  { %7622 = vmatprep.subr.bf16.mxu1 %v8641_v1 }
 0x246   :  { %7611 = vmatmul.mubr.msk.bf16.vlgmr.msra.gmra.mxu1 %vm60_vm2, %v1621_v26 }
 0x247   :  { %7626 = vmatprep.mubr.msk.bf16.mxu1 %vm8642_vm0, %v8641_v1  ;;  %7623 = vmatpush3.bf16.msra.mxu1 %v8229_v35 }
 0x248   :  { %7624 = vmatprep.subr.bf16.mxu1 %v8641_v1 }
 0x24b   :  { %7625 = vmatpush3.bf16.msra.mxu1 %v8231_v36 }
 0x24c   :  { %7638 = vmatprep.subr.bf16.mxu1 %v8641_v1 }
 0x2d0   :  { %v1159_v37 = vpop.f32.mrf.mxu0 }
 0x2d2   :  { %v7524_v38 = vpop.f32.mrf.mxu0 }
 0x2d4   :  { %v1162_v39 = vpop.f32.mrf.mxu0 }
 0x2d6   :  { %v7525_v40 = vpop.f32.mrf.mxu0 }
 0x2d8   :  { %v1282_v42 = vpop.f32.mrf.mxu0 }
 0x2da   :  { %v7540_v43 = vpop.f32.mrf.mxu0 }
 0x2dc   :  { %v1285_v44 = vpop.f32.mrf.mxu0 }
 0x2de   :  { %v1214_v45 = vpop.f32.mrf.mxu1  ;;  %v7541_v46 = vpop.f32.mrf.mxu0 }
 0x2df   :  { %v1215_v47 = vadd.f32 %v1214_v45, %v1159_v37 }
 0x2e0   :  { %v7532_v48 = vpop.f32.mrf.mxu1  ;;  %v1402_v50 = vpop.f32.mrf.mxu0 }
 0x2e1   :  { %v1227_v51 = vadd.f32 %v8907_v41, %v1215_v47 }
 0x2e2   :  { %v1217_v52 = vpop.f32.mrf.mxu1  ;;  %v7556_v53 = vpop.f32.mrf.mxu0 }
 0x2e3   :  { %v6558_v54 = vmul.f32 -1.442695, %v1227_v51  ;;  %v1099_v51 = vld [vmem:[#allocation3 + $0x2] sm:$0x3] }
 0x2e4   :  { %v7533_v55 = vpop.f32.mrf.mxu1  ;;  %v1405_v56 = vpop.f32.mrf.mxu0 }
 0x2e5   :  { %8411 = vpow2.f32 %v6558_v54  ;;  %v6563_v56 = vld [vmem:[%s9995_s0 + $0x14] sm:$0x3] }
 0x2e6   :  { %v1334_v57 = vpop.f32.mrf.mxu1  ;;  %v7557_v58 = vpop.f32.mrf.mxu0 }
 0x2e7   :  { %v1335_v59 = vadd.f32 %v1334_v57, %v1282_v42  ;;  %v6564_v42 = vld [vmem:[%s9995_s0 + $0x16] sm:$0x3] }
 0x2e8   :  { %v7548_v60 = vpop.f32.mrf.mxu1  ;;  %v1522_v61 = vpop.f32.mrf.mxu0 }
 0x2e9   :  { %v1347_v62 = vadd.f32 %v8913_v49, %v1335_v59 }
 0x2ea   :  { %v1337_v63 = vpop.f32.mrf.mxu1  ;;  %v7572_v0 = vpop.f32.mrf.mxu0 }
 0x2eb   :  { %v6559_v2 = vmul.f32 -1.442695, %v1347_v62 }
 0x2ec   :  { %v7549_v3 = vpop.f32.mrf.mxu1  ;;  %v1525_v4 = vpop.f32.mrf.mxu0 }
 0x2ed   :  { %8413 = vpow2.f32 %v6559_v2 }
 0x2ee   :  { %v1454_v41 = vpop.f32.mrf.mxu1  ;;  %v7573_v5 = vpop.f32.mrf.mxu0 }
 0x2ef   :  { %v1455_v10 = vadd.f32 %v1454_v41, %v1402_v50 }
 0x2f0   :  { %v7564_v6 = vpop.f32.mrf.mxu1  ;;  %v1675_v7 = vpop.f32.mrf.mxu0 }
 0x2f1   :  { %v1681_v15 = vadd.f32 %v6561_v8, %v1675_v7  ;;  %v1467_v17 = vadd.f32 %v8922_v9, %v1455_v10  ;;  %v1620_v8 = vld [vmem:[#allocation3] sm:$0x3] }
 0x2f2   :  { %v1457_v11 = vpop.f32.mrf.mxu1  ;;  %v7588_v13 = vpop.f32.mrf.mxu0 }
 0x2f3   :  { %v8412_v14 = vpop.eup %8411  ;;  %v6589_v22 = vmul.f32 -1.442695, %v1681_v15  ;;  %8415 = vtanh.f32 %v1467_v17  ;;  %v8228_v17 = vld [vmem:[%s9998_s3 + $0x10] sm:$0xff]  }
 0x2f4   :  { %v7565_v49 = vpop.f32.mrf.mxu1  ;;  %v1678_v16 = vpop.f32.mrf.mxu0  ;;  %v1591_v20 = vadd.f32 1.0, %v8412_v14 }
 0x2f5   :  { %v8227_v49 = vld [vmem:[%s9998_s3 + $0x18] sm:$0xff]  }
 0x2f6   :  { %v1574_v18 = vpop.f32.mrf.mxu1  ;;  %v7589_v19 = vpop.f32.mrf.mxu0  ;;  %8417 = vrcp.f32 %v1591_v20 }
 0x2f7   :  { %v1575_v21 = vadd.f32 %v1574_v18, %v1522_v61  ;;  %8419 = vpow2.f32 %v6589_v22  ;;  %v8230_v18 = vld [vmem:[%s9998_s3 + $0x28] sm:$0xff]  }
 0x2f8   :  { %v7580_v23 = vpop.f32.mrf.mxu1  ;;  %v1789_v24 = vpop.f32.mrf.mxu0 }
 0x2f9   :  { %v1587_v25 = vadd.f32 %v8927_v12, %v1575_v21  ;;  %v1795_v62 = vadd.f32 %v6563_v56, %v1789_v24  ;;  %v8232_v21 = vld [vmem:[%s9998_s3 + $0x20] sm:$0xff]   ;;  %v8233_v23 = vld [vmem:[%s9997_s2 + $0x18] sm:$0xff]  }
 0x2fa   :  { %v8414_v26 = vpop.eup %8413  ;;  %v1577_v27 = vpop.f32.mrf.mxu1  ;;  %v9231_v56 = vld [vmem:[%s9999_s4] ss:$0 sm:$0xff] }
 0x2fb   :  { %v7604_v28 = vpop.f32.mrf.mxu0  ;;  %v1597_v29 = vadd.f32 1.0, %v8414_v26  ;;  %v6560_v30 = vmul.f32 -1.442695, %v1587_v25  ;;  %v8234_v25 = vld [vmem:[%s9998_s3 + $0x38] sm:$0xff]   ;;  %v8235_v26 = vld [vmem:[%s9997_s2 + $0x10] sm:$0xff]  }
 0x2fc   :  { %v7581_v31 = vpop.f32.mrf.mxu1  ;;  %v8236_v27 = vld [vmem:[%s9998_s3 + $0x30] sm:$0xff]   ;;  %v8237_v28 = vld [vmem:[%s9997_s2 + $0x28] sm:$0xff]  }
 0x2fd   :  { %v1792_v32 = vpop.f32.mrf.mxu0  ;;  %8421 = vrcp.f32 %v1597_v29  ;;  %v8238_v29 = vld [vmem:[%s9996_s1 + $0x8] sm:$0xff]   ;;  %v8240_v31 = vld [vmem:[%s9996_s1] sm:$0xff]  }
 0x2fe   :  { %8423 = vpow2.f32 %v6560_v30  ;;  %v1732_v34 = vpop.f32.mrf.mxu1  ;;  %v8239_v30 = vld [vmem:[%s9997_s2 + $0x20] sm:$0xff]   ;;  %v8241_v32 = vld [vmem:[%s9997_s2 + $0x38] sm:$0xff]  }
 0x2ff   :  { %v7605_v35 = vpop.f32.mrf.mxu0  ;;  %v1738_v36 = vadd.f32 %v6562_v33, %v1732_v34  ;;  %v8242_v34 = vld [vmem:[%s9996_s1 + $0x28] sm:$0xff]  }
 0x300   :  { %v7596_v37 = vpop.f32.mrf.mxu1  ;;  %v8416_v44 = vpop.eup %8415 }
 0x301   :  { %v6590_v38 = vmul.f32 -1.442695, %v1738_v36  ;;  %v8243_v36 = vld [vmem:[%s9997_s2 + $0x30] sm:$0xff]   ;;  %v8244_v37 = vld [vmem:[%s9996_s1 + $0x20] sm:$0xff]  }
 0x302   :  { %v1735_v39 = vpop.f32.mrf.mxu1 }
 0x303   :  { %8425 = vpow2.f32 %v6590_v38  ;;  %v8418_v45 = vpop.eup %8417  ;;  %v8245_v38 = vld [vmem:[%s9996_s1 + $0x18] sm:$0xff]   ;;  %v8246_v39 = vld [vmem:[%s9996_s1 + $0x10] sm:$0xff]  }
 0x304   :  { %v7597_v40 = vpop.f32.mrf.mxu1  ;;  %v8420_v48 = vpop.eup %8419  ;;  %v1608_v55 = vmul.f32 %v8418_v45, %v8416_v44  ;;  %v8250_v44 = vld [vmem:[%s9998_s3] sm:$0xff]   ;;  %v8253_v45 = vld [vmem:[%s9997_s2 + $0x8] sm:$0xff]  }
 0x305   :  { %v1856_v61 = vadd.f32 1.0, %v8420_v48  ;;  %v8247_v40 = vld [vmem:[%s9996_s1 + $0x38] sm:$0xff]  }
 0x306   :  { %v1846_v43 = vpop.f32.mrf.mxu1 }
 0x307   :  { %v1852_v46 = vadd.f32 %v6564_v42, %v1846_v43  ;;  %v8248_v42 = vld [vmem:[%s9996_s1 + $0x30] sm:$0xff]   ;;  %v8249_v43 = vld [vmem:[%s9998_s3 + $0x8] sm:$0xff]  }
 0x308   :  { %v7612_v47 = vpop.f32.mrf.mxu1 }
 0x309   :  { %v6591_v58 = vmul.f32 -1.442695, %v1852_v46  ;;  %v8255_v46 = vld [vmem:[%s9997_s2] sm:$0xff]  }
 0x30a   :  { %v8422_v50 = vpop.eup %8421  ;;  %v1849_v52 = vpop.f32.mrf.mxu1 }
 0x30b   :  { %v8424_v53 = vpop.eup %8423  ;;  %v1607_v54 = vmul.f32 %v8422_v50, %v1099_v51 }
 0x30c   :  { %v1604_v57 = vadd.f32 1.0, %v8424_v53  ;;  %v7613_v59 = vpop.f32.mrf.mxu1 }
 0x30d   :  { %v1609_v60 = vadd.f32 %v1608_v55, %v1607_v54 }
 0x30e   :  { %8427 = vrcp.f32 %v1604_v57 }
 0x30f   :  { %8429 = vtanh.f32 %v1609_v60  ;;  %1613 = vst.msk [vmem:[#allocation3 + $0x2] sm:$0x3] %vm32_vm1, %v1609_v60 }
 0x310   :  { %v8426_v63 = vpop.eup %8425  ;;  %8431 = vpow2.f32 %v6591_v58 }
 0x311   :  { %8433 = vrcp.f32 %v1856_v61  ;;  %v1862_v0 = vadd.f32 1.0, %v8426_v63 }
 0x312   :  { %8435 = vtanh.f32 %v1795_v62 }
 0x313   :  { %8437 = vrcp.f32 %v1862_v0 }
 0x31b   :  { %v8428_v2 = vpop.eup %8427 }
 0x31c   :  { %v8430_v3 = vpop.eup %8429 }
 0x31d   :  { %v8432_v4 = vpop.eup %8431  ;;  %v1611_v41 = vmul.f32 %v8430_v3, %v8428_v2 }
 0x31e   :  { %v8434_v5 = vpop.eup %8433  ;;  %v1869_v10 = vadd.f32 1.0, %v8432_v4 }
 0x31f   :  { %v8436_v6 = vpop.eup %8435  ;;  %1612 = vst.msk [vmem:[#allocation2 + $0x2] sm:$0x3] %vm32_vm1, %v1611_v41  ;;  %v9237_v41 = vld [vmem:[%s9999_s4 + $0x1] ss:$0 sm:$0xff] }
 0x320   :  { %v8438_v7 = vpop.eup %8437  ;;  %v1873_v11 = vmul.f32 %v8436_v6, %v8434_v5  ;;  %8439 = vrcp.f32 %v1869_v10 }
 0x321   :  { %v1872_v13 = vmul.f32 %v8438_v7, %v1620_v8 }
 0x323   :  { %v1874_v14 = vadd.f32 %v1873_v11, %v1872_v13 }
 0x325   :  { %8441 = vtanh.f32 %v1874_v14  ;;  %1878 = vst.msk [vmem:[#allocation3] sm:$0x3] %vm32_vm1, %v1874_v14 }
 0x326   :  { %v1879_v15 = vld [vmem:[#allocation2 + $0x2] sm:$0x3] }
 0x327   :  { %v1882_v16 = vpack.c.bf16 %v1879_v15, %v1879_v15 }
 0x329   :  { %7619 = vmatmul.mubr.msk.bf16.vlgmr.msra.gmra.mxu0 %vm60_vm2, %v1882_v16 }
 0x32a   :  { %7631 = vmatpush3.bf16.msra.mxu0 %v8227_v49  ;;  %7634 = vmatprep.mubr.msk.bf16.mxu0 %vm8642_vm0, %v8641_v1 }
 0x32b   :  { %7632 = vmatprep.subr.bf16.mxu0 %v8641_v1 }
 0x32d   :  { %v8440_v19 = vpop.eup %8439 }
 0x32e   :  { %7633 = vmatpush3.bf16.msra.mxu0 %v8228_v17 }
 0x32f   :  { %7646 = vmatprep.subr.bf16.mxu0 %v8641_v1 }
 0x331   :  { %7635 = vmatmul.mubr.msk.bf16.vlgmr.msra.gmra.mxu0 %vm60_vm2, %v1882_v16 }
 0x332   :  { %v8442_v20 = vpop.eup %8441  ;;  %7647 = vmatpush3.bf16.msra.mxu0 %v8230_v18  ;;  %7650 = vmatprep.mubr.msk.bf16.mxu0 %vm8642_vm0, %v8641_v1 }
 0x333   :  { %7648 = vmatprep.subr.bf16.mxu0 %v8641_v1  ;;  %v1876_v22 = vmul.f32 %v8442_v20, %v8440_v19  ;;  %v6650_v20 = vld [vmem:[%s9995_s0 + $0x18] sm:$0x3] }
 0x335   :  { %1877 = vst.msk [vmem:[#allocation2] sm:$0x3] %vm32_vm1, %v1876_v22  ;;  %v1881_v24 = vpack.c.bf16 %v1876_v22, %v1876_v22 }
 0x336   :  { %7649 = vmatpush3.bf16.msra.mxu0 %v8232_v21 }
 0x337   :  { %7627 = vmatmul.mubr.msk.bf16.vlgmr.msra.gmra.mxu1 %vm60_vm2, %v1881_v24  ;;  %7662 = vmatprep.subr.bf16.mxu0 %v8641_v1 }
 0x338   :  { %7639 = vmatpush3.bf16.msra.mxu1 %v8233_v23  ;;  %7642 = vmatprep.mubr.msk.bf16.mxu1 %vm8642_vm0, %v8641_v1 }
 0x339   :  { %7651 = vmatmul.mubr.msk.bf16.vlgmr.msra.gmra.mxu0 %vm60_vm2, %v1882_v16  ;;  %7640 = vmatprep.subr.bf16.mxu1 %v8641_v1 }
 0x33a   :  { %7663 = vmatpush3.bf16.msra.mxu0 %v8234_v25  ;;  %7666 = vmatprep.mubr.msk.bf16.mxu0 %vm8642_vm0, %v8641_v1 }
 0x33b   :  { %7664 = vmatprep.subr.bf16.mxu0 %v8641_v1 }
 0x33c   :  { %7641 = vmatpush3.bf16.msra.mxu1 %v8235_v26  ;;  %v2400_v33 = vld [vmem:[#allocation2] sm:$0x3] }
 0x33d   :  { %7654 = vmatprep.subr.bf16.mxu1 %v8641_v1  ;;  %v2402_v35 = vpack.c.bf16 %v2400_v33, %v2400_v33 }
 0x33e   :  { %7665 = vmatpush3.bf16.msra.mxu0 %v8236_v27 }
 0x33f   :  { %7643 = vmatmul.mubr.msk.bf16.vlgmr.msra.gmra.mxu1 %vm60_vm2, %v1881_v24  ;;  %7678 = vmatprep.subr.bf16.mxu0 %v8641_v1 }
 0x340   :  { %7655 = vmatpush3.bf16.msra.mxu1 %v8237_v28  ;;  %7658 = vmatprep.mubr.msk.bf16.mxu1 %vm8642_vm0, %v8641_v1 }
 0x341   :  { %7667 = vmatmul.mubr.msk.bf16.vlgmr.msra.gmra.mxu0 %vm60_vm2, %v1882_v16  ;;  %7656 = vmatprep.subr.bf16.mxu1 %v8641_v1 }
 0x342   :  { %7679 = vmatpush3.bf16.msra.mxu0 %v8238_v29  ;;  %7682 = vmatprep.mubr.msk.bf16.mxu0 %vm8642_vm0, %v8641_v1 }
 0x343   :  { %7680 = vmatprep.subr.bf16.mxu0 %v8641_v1 }
 0x344   :  { %7657 = vmatpush3.bf16.msra.mxu1 %v8239_v30 }
 0x345   :  { %7670 = vmatprep.subr.bf16.mxu1 %v8641_v1 }
 0x346   :  { %7681 = vmatpush3.bf16.msra.mxu0 %v8240_v31 }
 0x347   :  { %7659 = vmatmul.mubr.msk.bf16.vlgmr.msra.gmra.mxu1 %vm60_vm2, %v1881_v24  ;;  %7694 = vmatprep.subr.bf16.mxu0 %v8641_v1 }
 0x348   :  { %7671 = vmatpush3.bf16.msra.mxu1 %v8241_v32  ;;  %7674 = vmatprep.mubr.msk.bf16.mxu1 %vm8642_vm0, %v8641_v1 }
 0x349   :  { %7683 = vmatmul.mubr.msk.bf16.vlgmr.msra.gmra.mxu0 %vm60_vm2, %v2402_v35  ;;  %7672 = vmatprep.subr.bf16.mxu1 %v8641_v1 }
 0x34a   :  { %7695 = vmatpush3.bf16.msra.mxu0 %v8242_v34  ;;  %7698 = vmatprep.mubr.msk.bf16.mxu0 %vm8642_vm0, %v8641_v1 }
 0x34b   :  { %7696 = vmatprep.subr.bf16.mxu0 %v8641_v1 }
 0x34c   :  { %7673 = vmatpush3.bf16.msra.mxu1 %v8243_v36 }
 0x34d   :  { %7686 = vmatprep.subr.bf16.mxu1 %v8641_v1 }
 0x34e   :  { %7697 = vmatpush3.bf16.msra.mxu0 %v8244_v37 }
 0x34f   :  { %7675 = vmatmul.mubr.msk.bf16.vlgmr.msra.gmra.mxu1 %vm60_vm2, %v1881_v24  ;;  %7710 = vmatprep.subr.bf16.mxu0 %v8641_v1 }
 0x350   :  { %7687 = vmatpush3.bf16.msra.mxu1 %v8245_v38  ;;  %7690 = vmatprep.mubr.msk.bf16.mxu1 %vm8642_vm0, %v8641_v1 }
 0x351   :  { %7699 = vmatmul.mubr.msk.bf16.vlgmr.msra.gmra.mxu0 %vm60_vm2, %v2402_v35  ;;  %7688 = vmatprep.subr.bf16.mxu1 %v8641_v1 }
 0x352   :  { %7714 = vmatprep.mubr.msk.bf16.mxu0 %vm8642_vm0, %v8641_v1  ;;  %7711 = vmatpush3.bf16.msra.mxu0 %v8249_v43 }
 0x353   :  { %7712 = vmatprep.subr.bf16.mxu0 %v8641_v1 }
 0x354   :  { %7689 = vmatpush3.bf16.msra.mxu1 %v8246_v39 }
 0x355   :  { %7702 = vmatprep.subr.bf16.mxu1 %v8641_v1 }
 0x356   :  { %7713 = vmatpush3.bf16.msra.mxu0 %v8250_v44 }
 0x357   :  { %7691 = vmatmul.mubr.msk.bf16.vlgmr.msra.gmra.mxu1 %vm60_vm2, %v2402_v35  ;;  %7726 = vmatprep.subr.bf16.mxu0 %v8641_v1 }
 0x358   :  { %7703 = vmatpush3.bf16.msra.mxu1 %v8247_v40  ;;  %7706 = vmatprep.mubr.msk.bf16.mxu1 %vm8642_vm0, %v8641_v1 }
 0x359   :  { %7704 = vmatprep.subr.bf16.mxu1 %v8641_v1 }
 0x35c   :  { %7705 = vmatpush3.bf16.msra.mxu1 %v8248_v42 }
 0x35d   :  { %7718 = vmatprep.subr.bf16.mxu1 %v8641_v1 }
 0x35f   :  { %7707 = vmatmul.mubr.msk.bf16.vlgmr.msra.gmra.mxu1 %vm60_vm2, %v2402_v35 }
 0x360   :  { %7722 = vmatprep.mubr.msk.bf16.mxu1 %vm8642_vm0, %v8641_v1  ;;  %7719 = vmatpush3.bf16.msra.mxu1 %v8253_v45 }
 0x361   :  { %7720 = vmatprep.subr.bf16.mxu1 %v8641_v1 }
 0x364   :  { %7721 = vmatpush3.bf16.msra.mxu1 %v8255_v46 }
 0x365   :  { %7734 = vmatprep.subr.bf16.mxu1 %v8641_v1 }
 0x3e9   :  { %v1940_v47 = vpop.f32.mrf.mxu0 }
 0x3eb   :  { %v7620_v48 = vpop.f32.mrf.mxu0 }
 0x3ed   :  { %v1943_v50 = vpop.f32.mrf.mxu0 }
 0x3ef   :  { %v7621_v51 = vpop.f32.mrf.mxu0 }
 0x3f1   :  { %v2063_v52 = vpop.f32.mrf.mxu0 }
 0x3f3   :  { %v7636_v53 = vpop.f32.mrf.mxu0 }
 0x3f5   :  { %v2066_v54 = vpop.f32.mrf.mxu0 }
 0x3f7   :  { %v1995_v55 = vpop.f32.mrf.mxu1  ;;  %v7637_v57 = vpop.f32.mrf.mxu0 }
 0x3f8   :  { %v1996_v58 = vadd.f32 %v1995_v55, %v1940_v47 }
 0x3f9   :  { %v7628_v59 = vpop.f32.mrf.mxu1  ;;  %v2183_v60 = vpop.f32.mrf.mxu0 }
 0x3fa   :  { %v2008_v61 = vadd.f32 %v9231_v56, %v1996_v58 }
 0x3fb   :  { %v1998_v62 = vpop.f32.mrf.mxu1  ;;  %v7652_v63 = vpop.f32.mrf.mxu0 }
 0x3fc   :  { %v6647_v0 = vmul.f32 -1.442695, %v2008_v61  ;;  %v1880_v61 = vld [vmem:[#allocation3 + $0x2] sm:$0x3] }
 0x3fd   :  { %v7629_v2 = vpop.f32.mrf.mxu1  ;;  %v2186_v3 = vpop.f32.mrf.mxu0 }
 0x3fe   :  { %8443 = vpow2.f32 %v6647_v0  ;;  %v6652_v3 = vld [vmem:[%s9995_s0 + $0x1c] sm:$0x3] }
 0x3ff   :  { %v2115_v4 = vpop.f32.mrf.mxu1  ;;  %v7653_v5 = vpop.f32.mrf.mxu0 }
 0x400   :  { %v2116_v6 = vadd.f32 %v2115_v4, %v2063_v52  ;;  %v6653_v52 = vld [vmem:[%s9995_s0 + $0x1e] sm:$0x3] }
 0x401   :  { %v7644_v7 = vpop.f32.mrf.mxu1  ;;  %v2303_v8 = vpop.f32.mrf.mxu0 }
 0x402   :  { %v2128_v10 = vadd.f32 %v9237_v41, %v2116_v6 }
 0x403   :  { %v2118_v11 = vpop.f32.mrf.mxu1  ;;  %v7668_v13 = vpop.f32.mrf.mxu0 }
 0x404   :  { %v6648_v14 = vmul.f32 -1.442695, %v2128_v10 }
 0x405   :  { %v7645_v15 = vpop.f32.mrf.mxu1  ;;  %v2306_v49 = vpop.f32.mrf.mxu0 }
 0x406   :  { %8445 = vpow2.f32 %v6648_v14 }
 0x407   :  { %v2235_v16 = vpop.f32.mrf.mxu1  ;;  %v7669_v17 = vpop.f32.mrf.mxu0 }
 0x408   :  { %v2236_v21 = vadd.f32 %v2235_v16, %v2183_v60 }
 0x409   :  { %v7660_v18 = vpop.f32.mrf.mxu1  ;;  %v2456_v19 = vpop.f32.mrf.mxu0 }
 0x40a   :  { %v2462_v25 = vadd.f32 %v6650_v20, %v2456_v19  ;;  %v2248_v28 = vadd.f32 %v8922_v9, %v2236_v21  ;;  %v6651_v9 = vld [vmem:[%s9995_s0 + $0x1a] sm:$0x3]  ;;  %v2401_v20 = vld [vmem:[#allocation3] sm:$0x3] }
 0x40b   :  { %v2238_v22 = vpop.f32.mrf.mxu1  ;;  %v7684_v23 = vpop.f32.mrf.mxu0 }
 0x40c   :  { %v8444_v24 = vpop.eup %8443  ;;  %v6678_v33 = vmul.f32 -1.442695, %v2462_v25  ;;  %8447 = vtanh.f32 %v2248_v28  ;;  %v8252_v28 = vld [vmem:[%s9998_s3 + $0x10] sm:$0xff]  }
 0x40d   :  { %v7661_v26 = vpop.f32.mrf.mxu1  ;;  %v2459_v27 = vpop.f32.mrf.mxu0  ;;  %v2372_v31 = vadd.f32 1.0, %v8444_v24 }
 0x40e   :  { %v8251_v26 = vld [vmem:[%s9998_s3 + $0x18] sm:$0xff]  }
 0x40f   :  { %v2355_v29 = vpop.f32.mrf.mxu1  ;;  %v7685_v30 = vpop.f32.mrf.mxu0  ;;  %8449 = vrcp.f32 %v2372_v31 }
 0x410   :  { %v2356_v32 = vadd.f32 %v2355_v29, %v2303_v8  ;;  %8451 = vpow2.f32 %v6678_v33  ;;  %v8254_v29 = vld [vmem:[%s9998_s3 + $0x28] sm:$0xff]  }
 0x411   :  { %v7676_v34 = vpop.f32.mrf.mxu1  ;;  %v2570_v35 = vpop.f32.mrf.mxu0 }
 0x412   :  { %v2368_v36 = vadd.f32 %v8927_v12, %v2356_v32  ;;  %v2576_v10 = vadd.f32 %v6652_v3, %v2570_v35  ;;  %v8256_v32 = vld [vmem:[%s9998_s3 + $0x20] sm:$0xff]   ;;  %v8257_v34 = vld [vmem:[%s9997_s2 + $0x18] sm:$0xff]  }
 0x413   :  { %v8446_v37 = vpop.eup %8445  ;;  %v2358_v38 = vpop.f32.mrf.mxu1 }
 0x414   :  { %v7700_v39 = vpop.f32.mrf.mxu0  ;;  %v2378_v40 = vadd.f32 1.0, %v8446_v37  ;;  %v6649_v42 = vmul.f32 -1.442695, %v2368_v36  ;;  %v8258_v36 = vld [vmem:[%s9998_s3 + $0x38] sm:$0xff]   ;;  %v8259_v37 = vld [vmem:[%s9997_s2 + $0x10] sm:$0xff]  }
 0x415   :  { %v7677_v43 = vpop.f32.mrf.mxu1  ;;  %v8260_v38 = vld [vmem:[%s9998_s3 + $0x30] sm:$0xff]   ;;  %v8261_v39 = vld [vmem:[%s9997_s2 + $0x28] sm:$0xff]  }
 0x416   :  { %v2573_v44 = vpop.f32.mrf.mxu0  ;;  %8453 = vrcp.f32 %v2378_v40  ;;  %v8262_v40 = vld [vmem:[%s9996_s1 + $0x8] sm:$0xff]   ;;  %v8264_v43 = vld [vmem:[%s9996_s1] sm:$0xff]  }
 0x417   :  { %8455 = vpow2.f32 %v6649_v42  ;;  %v2513_v45 = vpop.f32.mrf.mxu1  ;;  %v8263_v42 = vld [vmem:[%s9997_s2 + $0x20] sm:$0xff]   ;;  %v8265_v44 = vld [vmem:[%s9997_s2 + $0x38] sm:$0xff]  }
 0x418   :  { %v7701_v46 = vpop.f32.mrf.mxu0  ;;  %v2519_v47 = vadd.f32 %v6651_v9, %v2513_v45  ;;  %v8266_v45 = vld [vmem:[%s9996_s1 + $0x28] sm:$0xff]  }
 0x419   :  { %v7692_v12 = vpop.f32.mrf.mxu1  ;;  %v8448_v54 = vpop.eup %8447 }
 0x41a   :  { %v6679_v48 = vmul.f32 -1.442695, %v2519_v47  ;;  %v8267_v47 = vld [vmem:[%s9997_s2 + $0x30] sm:$0xff]   ;;  %v8268_v12 = vld [vmem:[%s9996_s1 + $0x20] sm:$0xff]  }
 0x41b   :  { %v2516_v50 = vpop.f32.mrf.mxu1 }
 0x41c   :  { %8457 = vpow2.f32 %v6679_v48  ;;  %v8450_v55 = vpop.eup %8449  ;;  %v8269_v48 = vld [vmem:[%s9996_s1 + $0x18] sm:$0xff]   ;;  %v8270_v50 = vld [vmem:[%s9996_s1 + $0x10] sm:$0xff]  }
 0x41d   :  { %v7693_v51 = vpop.f32.mrf.mxu1  ;;  %v8452_v59 = vpop.eup %8451  ;;  %v2389_v2 = vmul.f32 %v8450_v55, %v8448_v54  ;;  %v8274_v54 = vld [vmem:[%s9998_s3] sm:$0xff]   ;;  %v8277_v55 = vld [vmem:[%s9997_s2 + $0x8] sm:$0xff]  }
 0x41e   :  { %v2637_v8 = vadd.f32 1.0, %v8452_v59  ;;  %v8271_v51 = vld [vmem:[%s9996_s1 + $0x38] sm:$0xff]  }
 0x41f   :  { %v2627_v53 = vpop.f32.mrf.mxu1 }
 0x420   :  { %v2633_v57 = vadd.f32 %v6653_v52, %v2627_v53  ;;  %v8272_v52 = vld [vmem:[%s9996_s1 + $0x30] sm:$0xff]   ;;  %v8273_v53 = vld [vmem:[%s9998_s3 + $0x8] sm:$0xff]  }
 0x421   :  { %v7708_v58 = vpop.f32.mrf.mxu1 }
 0x422   :  { %v6680_v5 = vmul.f32 -1.442695, %v2633_v57  ;;  %v8279_v57 = vld [vmem:[%s9997_s2] sm:$0xff]  }
 0x423   :  { %v8454_v60 = vpop.eup %8453  ;;  %v2630_v62 = vpop.f32.mrf.mxu1 }
 0x424   :  { %v8456_v63 = vpop.eup %8455  ;;  %v2388_v0 = vmul.f32 %v8454_v60, %v1880_v61 }
 0x425   :  { %v2385_v4 = vadd.f32 1.0, %v8456_v63  ;;  %v7709_v6 = vpop.f32.mrf.mxu1 }
 0x426   :  { %v2390_v7 = vadd.f32 %v2389_v2, %v2388_v0 }
 0x427   :  { %8459 = vrcp.f32 %v2385_v4 }
 0x428   :  { %8461 = vtanh.f32 %v2390_v7  ;;  %2394 = vst.msk [vmem:[#allocation3 + $0x2] sm:$0x3] %vm32_vm1, %v2390_v7 }
 0x429   :  { %v8458_v11 = vpop.eup %8457  ;;  %8463 = vpow2.f32 %v6680_v5 }
 0x42a   :  { %8465 = vrcp.f32 %v2637_v8  ;;  %v2643_v13 = vadd.f32 1.0, %v8458_v11 }
 0x42b   :  { %8467 = vtanh.f32 %v2576_v10 }
 0x42c   :  { %8469 = vrcp.f32 %v2643_v13 }
 0x434   :  { %v8460_v14 = vpop.eup %8459 }
 0x435   :  { %v8462_v15 = vpop.eup %8461 }
 0x436   :  { %v8464_v49 = vpop.eup %8463  ;;  %v2392_v16 = vmul.f32 %v8462_v15, %v8460_v14 }
 0x437   :  { %v8466_v17 = vpop.eup %8465  ;;  %v2650_v21 = vadd.f32 1.0, %v8464_v49 }
 0x438   :  { %v8468_v18 = vpop.eup %8467  ;;  %2393 = vst.msk [vmem:[#allocation2 + $0x2] sm:$0x3] %vm32_vm1, %v2392_v16 }
 0x439   :  { %v8470_v19 = vpop.eup %8469  ;;  %v2654_v22 = vmul.f32 %v8468_v18, %v8466_v17  ;;  %8471 = vrcp.f32 %v2650_v21 }
 0x43a   :  { %v2653_v23 = vmul.f32 %v8470_v19, %v2401_v20 }
 0x43c   :  { %v2655_v24 = vadd.f32 %v2654_v22, %v2653_v23 }
 0x43e   :  { %8473 = vtanh.f32 %v2655_v24  ;;  %2659 = vst.msk [vmem:[#allocation3] sm:$0x3] %vm32_vm1, %v2655_v24 }
 0x43f   :  { %v2660_v25 = vld [vmem:[#allocation2 + $0x2] sm:$0x3] }
 0x440   :  { %v2663_v27 = vpack.c.bf16 %v2660_v25, %v2660_v25 }
 0x442   :  { %7715 = vmatmul.mubr.msk.bf16.vlgmr.msra.gmra.mxu0 %vm60_vm2, %v2663_v27 }
 0x443   :  { %7727 = vmatpush3.bf16.msra.mxu0 %v8251_v26  ;;  %7730 = vmatprep.mubr.msk.bf16.mxu0 %vm8642_vm0, %v8641_v1 }
 0x444   :  { %7728 = vmatprep.subr.bf16.mxu0 %v8641_v1 }
 0x446   :  { %v8472_v30 = vpop.eup %8471 }
 0x447   :  { %7729 = vmatpush3.bf16.msra.mxu0 %v8252_v28  ;;  %v6739_v28 = vld [vmem:[%s9995_s0 + $0x20] sm:$0x3] }
 0x448   :  { %7742 = vmatprep.subr.bf16.mxu0 %v8641_v1 }
 0x44a   :  { %7731 = vmatmul.mubr.msk.bf16.vlgmr.msra.gmra.mxu0 %vm60_vm2, %v2663_v27 }
 0x44b   :  { %v8474_v31 = vpop.eup %8473  ;;  %7743 = vmatpush3.bf16.msra.mxu0 %v8254_v29  ;;  %7746 = vmatprep.mubr.msk.bf16.mxu0 %vm8642_vm0, %v8641_v1 }
 0x44c   :  { %7744 = vmatprep.subr.bf16.mxu0 %v8641_v1  ;;  %v2657_v33 = vmul.f32 %v8474_v31, %v8472_v30 }
 0x44e   :  { %2658 = vst.msk [vmem:[#allocation2] sm:$0x3] %vm32_vm1, %v2657_v33  ;;  %v2662_v35 = vpack.c.bf16 %v2657_v33, %v2657_v33 }
 0x44f   :  { %7745 = vmatpush3.bf16.msra.mxu0 %v8256_v32 }
 0x450   :  { %7723 = vmatmul.mubr.msk.bf16.vlgmr.msra.gmra.mxu1 %vm60_vm2, %v2662_v35  ;;  %7758 = vmatprep.subr.bf16.mxu0 %v8641_v1 }
 0x451   :  { %7735 = vmatpush3.bf16.msra.mxu1 %v8257_v34  ;;  %7738 = vmatprep.mubr.msk.bf16.mxu1 %vm8642_vm0, %v8641_v1 }
 0x452   :  { %7747 = vmatmul.mubr.msk.bf16.vlgmr.msra.gmra.mxu0 %vm60_vm2, %v2663_v27  ;;  %7736 = vmatprep.subr.bf16.mxu1 %v8641_v1 }
 0x453   :  { %7759 = vmatpush3.bf16.msra.mxu0 %v8258_v36  ;;  %7762 = vmatprep.mubr.msk.bf16.mxu0 %vm8642_vm0, %v8641_v1 }
 0x454   :  { %7760 = vmatprep.subr.bf16.mxu0 %v8641_v1 }
 0x455   :  { %7737 = vmatpush3.bf16.msra.mxu1 %v8259_v37  ;;  %v3181_v9 = vld [vmem:[#allocation2] sm:$0x3] }
 0x456   :  { %7750 = vmatprep.subr.bf16.mxu1 %v8641_v1  ;;  %v3183_v46 = vpack.c.bf16 %v3181_v9, %v3181_v9 }
 0x457   :  { %7761 = vmatpush3.bf16.msra.mxu0 %v8260_v38  ;;  %v9404_v38 = vld [vmem:[%s9999_s4 + $0x3] ss:$0 sm:$0xff] }
 0x458   :  { %7739 = vmatmul.mubr.msk.bf16.vlgmr.msra.gmra.mxu1 %vm60_vm2, %v2662_v35  ;;  %7774 = vmatprep.subr.bf16.mxu0 %v8641_v1 }
 0x459   :  { %7751 = vmatpush3.bf16.msra.mxu1 %v8261_v39  ;;  %7754 = vmatprep.mubr.msk.bf16.mxu1 %vm8642_vm0, %v8641_v1 }
 0x45a   :  { %7763 = vmatmul.mubr.msk.bf16.vlgmr.msra.gmra.mxu0 %vm60_vm2, %v2663_v27  ;;  %7752 = vmatprep.subr.bf16.mxu1 %v8641_v1 }
 0x45b   :  { %7775 = vmatpush3.bf16.msra.mxu0 %v8262_v40  ;;  %7778 = vmatprep.mubr.msk.bf16.mxu0 %vm8642_vm0, %v8641_v1 }
 0x45c   :  { %7776 = vmatprep.subr.bf16.mxu0 %v8641_v1 }
 0x45d   :  { %7753 = vmatpush3.bf16.msra.mxu1 %v8263_v42 }
 0x45e   :  { %7766 = vmatprep.subr.bf16.mxu1 %v8641_v1 }
 0x45f   :  { %7777 = vmatpush3.bf16.msra.mxu0 %v8264_v43 }
 0x460   :  { %7755 = vmatmul.mubr.msk.bf16.vlgmr.msra.gmra.mxu1 %vm60_vm2, %v2662_v35  ;;  %7790 = vmatprep.subr.bf16.mxu0 %v8641_v1 }
 0x461   :  { %7767 = vmatpush3.bf16.msra.mxu1 %v8265_v44  ;;  %7770 = vmatprep.mubr.msk.bf16.mxu1 %vm8642_vm0, %v8641_v1 }
 0x462   :  { %7779 = vmatmul.mubr.msk.bf16.vlgmr.msra.gmra.mxu0 %vm60_vm2, %v3183_v46  ;;  %7768 = vmatprep.subr.bf16.mxu1 %v8641_v1 }
 0x463   :  { %7791 = vmatpush3.bf16.msra.mxu0 %v8266_v45  ;;  %7794 = vmatprep.mubr.msk.bf16.mxu0 %vm8642_vm0, %v8641_v1 }
 0x464   :  { %7792 = vmatprep.subr.bf16.mxu0 %v8641_v1 }
 0x465   :  { %7769 = vmatpush3.bf16.msra.mxu1 %v8267_v47 }
 0x466   :  { %7782 = vmatprep.subr.bf16.mxu1 %v8641_v1 }
 0x467   :  { %7793 = vmatpush3.bf16.msra.mxu0 %v8268_v12 }
 0x468   :  { %7771 = vmatmul.mubr.msk.bf16.vlgmr.msra.gmra.mxu1 %vm60_vm2, %v2662_v35  ;;  %7806 = vmatprep.subr.bf16.mxu0 %v8641_v1 }
 0x469   :  { %7783 = vmatpush3.bf16.msra.mxu1 %v8269_v48  ;;  %7786 = vmatprep.mubr.msk.bf16.mxu1 %vm8642_vm0, %v8641_v1 }
 0x46a   :  { %7795 = vmatmul.mubr.msk.bf16.vlgmr.msra.gmra.mxu0 %vm60_vm2, %v3183_v46  ;;  %7784 = vmatprep.subr.bf16.mxu1 %v8641_v1 }
 0x46b   :  { %7810 = vmatprep.mubr.msk.bf16.mxu0 %vm8642_vm0, %v8641_v1  ;;  %7807 = vmatpush3.bf16.msra.mxu0 %v8273_v53  ;;  %v6740_v53 = vld [vmem:[%s9995_s0 + $0x22] sm:$0x3] }
 0x46c   :  { %7808 = vmatprep.subr.bf16.mxu0 %v8641_v1 }
 0x46d   :  { %7785 = vmatpush3.bf16.msra.mxu1 %v8270_v50 }
 0x46e   :  { %7798 = vmatprep.subr.bf16.mxu1 %v8641_v1 }
 0x46f   :  { %7809 = vmatpush3.bf16.msra.mxu0 %v8274_v54 }
 0x470   :  { %7787 = vmatmul.mubr.msk.bf16.vlgmr.msra.gmra.mxu1 %vm60_vm2, %v3183_v46  ;;  %7822 = vmatprep.subr.bf16.mxu0 %v8641_v1 }
 0x471   :  { %7799 = vmatpush3.bf16.msra.mxu1 %v8271_v51  ;;  %7802 = vmatprep.mubr.msk.bf16.mxu1 %vm8642_vm0, %v8641_v1 }
 0x472   :  { %7800 = vmatprep.subr.bf16.mxu1 %v8641_v1 }
 0x475   :  { %7801 = vmatpush3.bf16.msra.mxu1 %v8272_v52 }
 0x476   :  { %7814 = vmatprep.subr.bf16.mxu1 %v8641_v1 }
 0x478   :  { %7803 = vmatmul.mubr.msk.bf16.vlgmr.msra.gmra.mxu1 %vm60_vm2, %v3183_v46 }
 0x479   :  { %7818 = vmatprep.mubr.msk.bf16.mxu1 %vm8642_vm0, %v8641_v1  ;;  %7815 = vmatpush3.bf16.msra.mxu1 %v8277_v55 }
 0x47a   :  { %7816 = vmatprep.subr.bf16.mxu1 %v8641_v1 }
 0x47d   :  { %7817 = vmatpush3.bf16.msra.mxu1 %v8279_v57 }
 0x47e   :  { %7830 = vmatprep.subr.bf16.mxu1 %v8641_v1 }
 0x502   :  { %v2721_v58 = vpop.f32.mrf.mxu0 }
 0x504   :  { %v7716_v59 = vpop.f32.mrf.mxu0 }
 0x506   :  { %v2724_v60 = vpop.f32.mrf.mxu0 }
 0x508   :  { %v7717_v61 = vpop.f32.mrf.mxu0 }
 0x50a   :  { %v2844_v62 = vpop.f32.mrf.mxu0 }
 0x50c   :  { %v7732_v63 = vpop.f32.mrf.mxu0 }
 0x50e   :  { %v2847_v0 = vpop.f32.mrf.mxu0 }
 0x510   :  { %v2776_v2 = vpop.f32.mrf.mxu1  ;;  %v7733_v3 = vpop.f32.mrf.mxu0 }
 0x511   :  { %v2777_v4 = vadd.f32 %v2776_v2, %v2721_v58 }
 0x512   :  { %v7724_v5 = vpop.f32.mrf.mxu1  ;;  %v2964_v6 = vpop.f32.mrf.mxu0 }
 0x513   :  { %v2789_v7 = vadd.f32 %v9231_v56, %v2777_v4 }
 0x514   :  { %v2779_v8 = vpop.f32.mrf.mxu1  ;;  %v7748_v10 = vpop.f32.mrf.mxu0 }
 0x515   :  { %v6736_v11 = vmul.f32 -1.442695, %v2789_v7  ;;  %v2661_v7 = vld [vmem:[#allocation3 + $0x2] sm:$0x3] }
 0x516   :  { %v7725_v13 = vpop.f32.mrf.mxu1  ;;  %v2967_v14 = vpop.f32.mrf.mxu0 }
 0x517   :  { %8475 = vpow2.f32 %v6736_v11  ;;  %v6741_v14 = vld [vmem:[%s9995_s0 + $0x24] sm:$0x3] }
 0x518   :  { %v2896_v15 = vpop.f32.mrf.mxu1  ;;  %v7749_v49 = vpop.f32.mrf.mxu0 }
 0x519   :  { %v2897_v16 = vadd.f32 %v2896_v15, %v2844_v62  ;;  %v6742_v62 = vld [vmem:[%s9995_s0 + $0x26] sm:$0x3] }
 0x51a   :  { %v7740_v17 = vpop.f32.mrf.mxu1  ;;  %v3084_v18 = vpop.f32.mrf.mxu0 }
 0x51b   :  { %v2909_v19 = vadd.f32 %v9237_v41, %v2897_v16  ;;  %v9398_v41 = vld [vmem:[%s9999_s4 + $0x2] ss:$0 sm:$0xff] }
 0x51c   :  { %v2899_v20 = vpop.f32.mrf.mxu1  ;;  %v7764_v21 = vpop.f32.mrf.mxu0 }
 0x51d   :  { %v6737_v22 = vmul.f32 -1.442695, %v2909_v19 }
 0x51e   :  { %v7741_v23 = vpop.f32.mrf.mxu1  ;;  %v3087_v24 = vpop.f32.mrf.mxu0 }
 0x51f   :  { %8477 = vpow2.f32 %v6737_v22 }
 0x520   :  { %v3016_v56 = vpop.f32.mrf.mxu1  ;;  %v7765_v25 = vpop.f32.mrf.mxu0 }
 0x521   :  { %v3017_v29 = vadd.f32 %v3016_v56, %v2964_v6 }
 0x522   :  { %v7756_v26 = vpop.f32.mrf.mxu1  ;;  %v3237_v27 = vpop.f32.mrf.mxu0 }
 0x523   :  { %v3243_v33 = vadd.f32 %v6739_v28, %v3237_v27  ;;  %v3029_v36 = vadd.f32 %v9398_v41, %v3017_v29  ;;  %v3182_v28 = vld [vmem:[#allocation3] sm:$0x3] }
 0x524   :  { %v3019_v30 = vpop.f32.mrf.mxu1  ;;  %v7780_v31 = vpop.f32.mrf.mxu0 }
 0x525   :  { %v8476_v32 = vpop.eup %8475  ;;  %v6767_v43 = vmul.f32 -1.442695, %v3243_v33  ;;  %8479 = vtanh.f32 %v3029_v36  ;;  %v8276_v36 = vld [vmem:[%s9998_s3 + $0x10] sm:$0xff]  }
 0x526   :  { %v7757_v34 = vpop.f32.mrf.mxu1  ;;  %v3240_v35 = vpop.f32.mrf.mxu0  ;;  %v3153_v40 = vadd.f32 1.0, %v8476_v32 }
 0x527   :  { %v8275_v34 = vld [vmem:[%s9998_s3 + $0x18] sm:$0xff]  }
 0x528   :  { %v3136_v37 = vpop.f32.mrf.mxu1  ;;  %v7781_v39 = vpop.f32.mrf.mxu0  ;;  %8481 = vrcp.f32 %v3153_v40 }
 0x529   :  { %v3137_v42 = vadd.f32 %v3136_v37, %v3084_v18  ;;  %8483 = vpow2.f32 %v6767_v43  ;;  %v8278_v37 = vld [vmem:[%s9998_s3 + $0x28] sm:$0xff]  }
 0x52a   :  { %v7772_v44 = vpop.f32.mrf.mxu1  ;;  %v3351_v9 = vpop.f32.mrf.mxu0 }
 0x52b   :  { %v3149_v45 = vadd.f32 %v9404_v38, %v3137_v42  ;;  %v3357_v19 = vadd.f32 %v6741_v14, %v3351_v9  ;;  %v8280_v42 = vld [vmem:[%s9998_s3 + $0x20] sm:$0xff]   ;;  %v8281_v44 = vld [vmem:[%s9997_s2 + $0x18] sm:$0xff]  }
 0x52c   :  { %v8478_v46 = vpop.eup %8477  ;;  %v3139_v47 = vpop.f32.mrf.mxu1  ;;  %v9555_v14 = vld [vmem:[%s9999_s4] ss:$0 sm:$0xff] }
 0x52d   :  { %v7796_v12 = vpop.f32.mrf.mxu0  ;;  %v3159_v48 = vadd.f32 1.0, %v8478_v46  ;;  %v6738_v50 = vmul.f32 -1.442695, %v3149_v45  ;;  %v8282_v45 = vld [vmem:[%s9998_s3 + $0x38] sm:$0xff]   ;;  %v8283_v46 = vld [vmem:[%s9997_s2 + $0x10] sm:$0xff]  }
 0x52e   :  { %v7773_v51 = vpop.f32.mrf.mxu1  ;;  %v8284_v47 = vld [vmem:[%s9998_s3 + $0x30] sm:$0xff]   ;;  %v8285_v12 = vld [vmem:[%s9997_s2 + $0x28] sm:$0xff]  }
 0x52f   :  { %v3354_v52 = vpop.f32.mrf.mxu0  ;;  %8485 = vrcp.f32 %v3159_v48  ;;  %v8286_v48 = vld [vmem:[%s9996_s1 + $0x8] sm:$0xff]   ;;  %v8288_v51 = vld [vmem:[%s9996_s1] sm:$0xff]  }
 0x530   :  { %8487 = vpow2.f32 %v6738_v50  ;;  %v3294_v54 = vpop.f32.mrf.mxu1  ;;  %v8287_v50 = vld [vmem:[%s9997_s2 + $0x20] sm:$0xff]   ;;  %v8289_v52 = vld [vmem:[%s9997_s2 + $0x38] sm:$0xff]  }
 0x531   :  { %v7797_v55 = vpop.f32.mrf.mxu0  ;;  %v3300_v57 = vadd.f32 %v6740_v53, %v3294_v54  ;;  %v8290_v54 = vld [vmem:[%s9996_s1 + $0x28] sm:$0xff]  }
 0x532   :  { %v7788_v58 = vpop.f32.mrf.mxu1  ;;  %v8480_v0 = vpop.eup %8479 }
 0x533   :  { %v6768_v59 = vmul.f32 -1.442695, %v3300_v57  ;;  %v8291_v57 = vld [vmem:[%s9997_s2 + $0x30] sm:$0xff]   ;;  %v8292_v58 = vld [vmem:[%s9996_s1 + $0x20] sm:$0xff]  }
 0x534   :  { %v3297_v60 = vpop.f32.mrf.mxu1 }
 0x535   :  { %8489 = vpow2.f32 %v6768_v59  ;;  %v8482_v2 = vpop.eup %8481  ;;  %v8293_v59 = vld [vmem:[%s9996_s1 + $0x18] sm:$0xff]   ;;  %v8294_v60 = vld [vmem:[%s9996_s1 + $0x10] sm:$0xff]  }
 0x536   :  { %v7789_v61 = vpop.f32.mrf.mxu1  ;;  %v8484_v5 = vpop.eup %8483  ;;  %v3170_v13 = vmul.f32 %v8482_v2, %v8480_v0  ;;  %v8298_v0 = vld [vmem:[%s9998_s3] sm:$0xff]   ;;  %v8301_v2 = vld [vmem:[%s9997_s2 + $0x8] sm:$0xff]  }
 0x537   :  { %v3418_v18 = vadd.f32 1.0, %v8484_v5  ;;  %v8295_v61 = vld [vmem:[%s9996_s1 + $0x38] sm:$0xff]  }
 0x538   :  { %v3408_v63 = vpop.f32.mrf.mxu1 }
 0x539   :  { %v3414_v3 = vadd.f32 %v6742_v62, %v3408_v63  ;;  %v8296_v62 = vld [vmem:[%s9996_s1 + $0x30] sm:$0xff]   ;;  %v8297_v63 = vld [vmem:[%s9998_s3 + $0x8] sm:$0xff]  }
 0x53a   :  { %v7804_v4 = vpop.f32.mrf.mxu1 }
 0x53b   :  { %v6769_v49 = vmul.f32 -1.442695, %v3414_v3  ;;  %v8303_v3 = vld [vmem:[%s9997_s2] sm:$0xff]  }
 0x53c   :  { %v8486_v6 = vpop.eup %8485  ;;  %v3411_v8 = vpop.f32.mrf.mxu1 }
 0x53d   :  { %v8488_v10 = vpop.eup %8487  ;;  %v3169_v11 = vmul.f32 %v8486_v6, %v2661_v7 }
 0x53e   :  { %v3166_v15 = vadd.f32 1.0, %v8488_v10  ;;  %v7805_v16 = vpop.f32.mrf.mxu1 }
 0x53f   :  { %v3171_v17 = vadd.f32 %v3170_v13, %v3169_v11 }
 0x540   :  { %8491 = vrcp.f32 %v3166_v15 }
 0x541   :  { %8493 = vtanh.f32 %v3171_v17  ;;  %3175 = vst.msk [vmem:[#allocation3 + $0x2] sm:$0x3] %vm32_vm1, %v3171_v17 }
 0x542   :  { %v8490_v20 = vpop.eup %8489  ;;  %8495 = vpow2.f32 %v6769_v49 }
 0x543   :  { %8497 = vrcp.f32 %v3418_v18  ;;  %v3424_v21 = vadd.f32 1.0, %v8490_v20 }
 0x544   :  { %8499 = vtanh.f32 %v3357_v19 }
 0x545   :  { %8501 = vrcp.f32 %v3424_v21 }
 0x54d   :  { %v8492_v22 = vpop.eup %8491 }
 0x54e   :  { %v8494_v23 = vpop.eup %8493 }
 0x54f   :  { %v8496_v24 = vpop.eup %8495  ;;  %v3173_v56 = vmul.f32 %v8494_v23, %v8492_v22 }
 0x550   :  { %v8498_v25 = vpop.eup %8497  ;;  %v3431_v29 = vadd.f32 1.0, %v8496_v24 }
 0x551   :  { %v8500_v26 = vpop.eup %8499  ;;  %3174 = vst.msk [vmem:[#allocation2 + $0x2] sm:$0x3] %vm32_vm1, %v3173_v56  ;;  %v9561_v56 = vld [vmem:[%s9999_s4 + $0x1] ss:$0 sm:$0xff] }
 0x552   :  { %v8502_v27 = vpop.eup %8501  ;;  %v3435_v30 = vmul.f32 %v8500_v26, %v8498_v25  ;;  %8503 = vrcp.f32 %v3431_v29 }
 0x553   :  { %v3434_v31 = vmul.f32 %v8502_v27, %v3182_v28 }
 0x555   :  { %v3436_v32 = vadd.f32 %v3435_v30, %v3434_v31 }
 0x557   :  { %8505 = vtanh.f32 %v3436_v32  ;;  %3440 = vst.msk [vmem:[#allocation3] sm:$0x3] %vm32_vm1, %v3436_v32 }
 0x558   :  { %v3441_v33 = vld [vmem:[#allocation2 + $0x2] sm:$0x3] }
 0x559   :  { %v3444_v35 = vpack.c.bf16 %v3441_v33, %v3441_v33 }
 0x55b   :  { %7811 = vmatmul.mubr.msk.bf16.vlgmr.msra.gmra.mxu0 %vm60_vm2, %v3444_v35 }
 0x55c   :  { %7823 = vmatpush3.bf16.msra.mxu0 %v8275_v34  ;;  %7826 = vmatprep.mubr.msk.bf16.mxu0 %vm8642_vm0, %v8641_v1 }
 0x55d   :  { %7824 = vmatprep.subr.bf16.mxu0 %v8641_v1 }
 0x55f   :  { %v8504_v39 = vpop.eup %8503 }
 0x560   :  { %7825 = vmatpush3.bf16.msra.mxu0 %v8276_v36 }
 0x561   :  { %7838 = vmatprep.subr.bf16.mxu0 %v8641_v1 }
 0x563   :  { %7827 = vmatmul.mubr.msk.bf16.vlgmr.msra.gmra.mxu0 %vm60_vm2, %v3444_v35 }
 0x564   :  { %v8506_v40 = vpop.eup %8505  ;;  %7839 = vmatpush3.bf16.msra.mxu0 %v8278_v37  ;;  %7842 = vmatprep.mubr.msk.bf16.mxu0 %vm8642_vm0, %v8641_v1 }
 0x565   :  { %7840 = vmatprep.subr.bf16.mxu0 %v8641_v1  ;;  %v3438_v43 = vmul.f32 %v8506_v40, %v8504_v39  ;;  %v6828_v40 = vld [vmem:[%s9995_s0 + $0x28] sm:$0x3] }
 0x567   :  { %3439 = vst.msk [vmem:[#allocation2] sm:$0x3] %vm32_vm1, %v3438_v43  ;;  %v3443_v9 = vpack.c.bf16 %v3438_v43, %v3438_v43 }
 0x568   :  { %7841 = vmatpush3.bf16.msra.mxu0 %v8280_v42 }
 0x569   :  { %7819 = vmatmul.mubr.msk.bf16.vlgmr.msra.gmra.mxu1 %vm60_vm2, %v3443_v9  ;;  %7854 = vmatprep.subr.bf16.mxu0 %v8641_v1 }
 0x56a   :  { %7831 = vmatpush3.bf16.msra.mxu1 %v8281_v44  ;;  %7834 = vmatprep.mubr.msk.bf16.mxu1 %vm8642_vm0, %v8641_v1 }
 0x56b   :  { %7843 = vmatmul.mubr.msk.bf16.vlgmr.msra.gmra.mxu0 %vm60_vm2, %v3444_v35  ;;  %7832 = vmatprep.subr.bf16.mxu1 %v8641_v1 }
 0x56c   :  { %7855 = vmatpush3.bf16.msra.mxu0 %v8282_v45  ;;  %7858 = vmatprep.mubr.msk.bf16.mxu0 %vm8642_vm0, %v8641_v1 }
 0x56d   :  { %7856 = vmatprep.subr.bf16.mxu0 %v8641_v1 }
 0x56e   :  { %7833 = vmatpush3.bf16.msra.mxu1 %v8283_v46  ;;  %v3962_v53 = vld [vmem:[#allocation2] sm:$0x3] }
 0x56f   :  { %7846 = vmatprep.subr.bf16.mxu1 %v8641_v1  ;;  %v3964_v55 = vpack.c.bf16 %v3962_v53, %v3962_v53 }
 0x570   :  { %7857 = vmatpush3.bf16.msra.mxu0 %v8284_v47 }
 0x571   :  { %7835 = vmatmul.mubr.msk.bf16.vlgmr.msra.gmra.mxu1 %vm60_vm2, %v3443_v9  ;;  %7870 = vmatprep.subr.bf16.mxu0 %v8641_v1 }
 0x572   :  { %7847 = vmatpush3.bf16.msra.mxu1 %v8285_v12  ;;  %7850 = vmatprep.mubr.msk.bf16.mxu1 %vm8642_vm0, %v8641_v1 }
 0x573   :  { %7859 = vmatmul.mubr.msk.bf16.vlgmr.msra.gmra.mxu0 %vm60_vm2, %v3444_v35  ;;  %7848 = vmatprep.subr.bf16.mxu1 %v8641_v1 }
 0x574   :  { %7871 = vmatpush3.bf16.msra.mxu0 %v8286_v48  ;;  %7874 = vmatprep.mubr.msk.bf16.mxu0 %vm8642_vm0, %v8641_v1 }
 0x575   :  { %7872 = vmatprep.subr.bf16.mxu0 %v8641_v1 }
 0x576   :  { %7849 = vmatpush3.bf16.msra.mxu1 %v8287_v50 }
 0x577   :  { %7862 = vmatprep.subr.bf16.mxu1 %v8641_v1 }
 0x578   :  { %7873 = vmatpush3.bf16.msra.mxu0 %v8288_v51 }
 0x579   :  { %7851 = vmatmul.mubr.msk.bf16.vlgmr.msra.gmra.mxu1 %vm60_vm2, %v3443_v9  ;;  %7886 = vmatprep.subr.bf16.mxu0 %v8641_v1 }
 0x57a   :  { %7863 = vmatpush3.bf16.msra.mxu1 %v8289_v52  ;;  %7866 = vmatprep.mubr.msk.bf16.mxu1 %vm8642_vm0, %v8641_v1 }
 0x57b   :  { %7875 = vmatmul.mubr.msk.bf16.vlgmr.msra.gmra.mxu0 %vm60_vm2, %v3964_v55  ;;  %7864 = vmatprep.subr.bf16.mxu1 %v8641_v1 }
 0x57c   :  { %7887 = vmatpush3.bf16.msra.mxu0 %v8290_v54  ;;  %7890 = vmatprep.mubr.msk.bf16.mxu0 %vm8642_vm0, %v8641_v1 }
 0x57d   :  { %7888 = vmatprep.subr.bf16.mxu0 %v8641_v1 }
 0x57e   :  { %7865 = vmatpush3.bf16.msra.mxu1 %v8291_v57 }
 0x57f   :  { %7878 = vmatprep.subr.bf16.mxu1 %v8641_v1 }
 0x580   :  { %7889 = vmatpush3.bf16.msra.mxu0 %v8292_v58 }
 0x581   :  { %7867 = vmatmul.mubr.msk.bf16.vlgmr.msra.gmra.mxu1 %vm60_vm2, %v3443_v9  ;;  %7902 = vmatprep.subr.bf16.mxu0 %v8641_v1 }
 0x582   :  { %7879 = vmatpush3.bf16.msra.mxu1 %v8293_v59  ;;  %7882 = vmatprep.mubr.msk.bf16.mxu1 %vm8642_vm0, %v8641_v1 }
 0x583   :  { %7891 = vmatmul.mubr.msk.bf16.vlgmr.msra.gmra.mxu0 %vm60_vm2, %v3964_v55  ;;  %7880 = vmatprep.subr.bf16.mxu1 %v8641_v1 }
 0x584   :  { %7906 = vmatprep.mubr.msk.bf16.mxu0 %vm8642_vm0, %v8641_v1  ;;  %7903 = vmatpush3.bf16.msra.mxu0 %v8297_v63 }
 0x585   :  { %7904 = vmatprep.subr.bf16.mxu0 %v8641_v1 }
 0x586   :  { %7881 = vmatpush3.bf16.msra.mxu1 %v8294_v60 }
 0x587   :  { %7894 = vmatprep.subr.bf16.mxu1 %v8641_v1 }
 0x588   :  { %7905 = vmatpush3.bf16.msra.mxu0 %v8298_v0 }
 0x589   :  { %7883 = vmatmul.mubr.msk.bf16.vlgmr.msra.gmra.mxu1 %vm60_vm2, %v3964_v55  ;;  %7918 = vmatprep.subr.bf16.mxu0 %v8641_v1 }
 0x58a   :  { %7895 = vmatpush3.bf16.msra.mxu1 %v8295_v61  ;;  %7898 = vmatprep.mubr.msk.bf16.mxu1 %vm8642_vm0, %v8641_v1 }
 0x58b   :  { %7896 = vmatprep.subr.bf16.mxu1 %v8641_v1 }
 0x58e   :  { %7897 = vmatpush3.bf16.msra.mxu1 %v8296_v62 }
 0x58f   :  { %7910 = vmatprep.subr.bf16.mxu1 %v8641_v1 }
 0x591   :  { %7899 = vmatmul.mubr.msk.bf16.vlgmr.msra.gmra.mxu1 %vm60_vm2, %v3964_v55 }
 0x592   :  { %7914 = vmatprep.mubr.msk.bf16.mxu1 %vm8642_vm0, %v8641_v1  ;;  %7911 = vmatpush3.bf16.msra.mxu1 %v8301_v2 }
 0x593   :  { %7912 = vmatprep.subr.bf16.mxu1 %v8641_v1 }
 0x596   :  { %7913 = vmatpush3.bf16.msra.mxu1 %v8303_v3 }
 0x597   :  { %7926 = vmatprep.subr.bf16.mxu1 %v8641_v1 }
 0x61b   :  { %v3502_v4 = vpop.f32.mrf.mxu0 }
 0x61d   :  { %v7812_v5 = vpop.f32.mrf.mxu0 }
 0x61f   :  { %v3505_v6 = vpop.f32.mrf.mxu0 }
 0x621   :  { %v7813_v7 = vpop.f32.mrf.mxu0 }
 0x623   :  { %v3625_v8 = vpop.f32.mrf.mxu0 }
 0x625   :  { %v7828_v10 = vpop.f32.mrf.mxu0 }
 0x627   :  { %v3628_v11 = vpop.f32.mrf.mxu0 }
 0x629   :  { %v3557_v13 = vpop.f32.mrf.mxu1  ;;  %v7829_v15 = vpop.f32.mrf.mxu0 }
 0x62a   :  { %v3558_v49 = vadd.f32 %v3557_v13, %v3502_v4 }
 0x62b   :  { %v7820_v16 = vpop.f32.mrf.mxu1  ;;  %v3745_v17 = vpop.f32.mrf.mxu0 }
 0x62c   :  { %v3570_v18 = vadd.f32 %v9555_v14, %v3558_v49 }
 0x62d   :  { %v3560_v19 = vpop.f32.mrf.mxu1  ;;  %v7844_v20 = vpop.f32.mrf.mxu0 }
 0x62e   :  { %v6825_v21 = vmul.f32 -1.442695, %v3570_v18  ;;  %v3442_v18 = vld [vmem:[#allocation3 + $0x2] sm:$0x3] }
 0x62f   :  { %v7821_v22 = vpop.f32.mrf.mxu1  ;;  %v3748_v23 = vpop.f32.mrf.mxu0 }
 0x630   :  { %8507 = vpow2.f32 %v6825_v21  ;;  %v6830_v23 = vld [vmem:[%s9995_s0 + $0x2c] sm:$0x3] }
 0x631   :  { %v3677_v24 = vpop.f32.mrf.mxu1  ;;  %v7845_v25 = vpop.f32.mrf.mxu0 }
 0x632   :  { %v3678_v26 = vadd.f32 %v3677_v24, %v3625_v8  ;;  %v6831_v8 = vld [vmem:[%s9995_s0 + $0x2e] sm:$0x3] }
 0x633   :  { %v7836_v27 = vpop.f32.mrf.mxu1  ;;  %v3865_v28 = vpop.f32.mrf.mxu0 }
 0x634   :  { %v3690_v29 = vadd.f32 %v9561_v56, %v3678_v26 }
 0x635   :  { %v3680_v30 = vpop.f32.mrf.mxu1  ;;  %v7860_v31 = vpop.f32.mrf.mxu0 }
 0x636   :  { %v6826_v32 = vmul.f32 -1.442695, %v3690_v29 }
 0x637   :  { %v7837_v33 = vpop.f32.mrf.mxu1  ;;  %v3868_v34 = vpop.f32.mrf.mxu0 }
 0x638   :  { %8509 = vpow2.f32 %v6826_v32 }
 0x639   :  { %v3797_v35 = vpop.f32.mrf.mxu1  ;;  %v7861_v36 = vpop.f32.mrf.mxu0 }
 0x63a   :  { %v3798_v42 = vadd.f32 %v3797_v35, %v3745_v17 }
 0x63b   :  { %v7852_v37 = vpop.f32.mrf.mxu1  ;;  %v4018_v39 = vpop.f32.mrf.mxu0 }
 0x63c   :  { %v4024_v45 = vadd.f32 %v6828_v40, %v4018_v39  ;;  %v3810_v12 = vadd.f32 %v9398_v41, %v3798_v42  ;;  %v6829_v41 = vld [vmem:[%s9995_s0 + $0x2a] sm:$0x3]  ;;  %v3963_v40 = vld [vmem:[#allocation3] sm:$0x3] }
 0x63d   :  { %v3800_v43 = vpop.f32.mrf.mxu1  ;;  %v7876_v44 = vpop.f32.mrf.mxu0 }
 0x63e   :  { %v8508_v9 = vpop.eup %8507  ;;  %v6856_v53 = vmul.f32 -1.442695, %v4024_v45  ;;  %8511 = vtanh.f32 %v3810_v12  ;;  %v8300_v12 = vld [vmem:[%s9998_s3 + $0x10] sm:$0xff]  }
 0x63f   :  { %v7853_v46 = vpop.f32.mrf.mxu1  ;;  %v4021_v47 = vpop.f32.mrf.mxu0  ;;  %v3934_v51 = vadd.f32 1.0, %v8508_v9 }
 0x640   :  { %v8299_v46 = vld [vmem:[%s9998_s3 + $0x18] sm:$0xff]  }
 0x641   :  { %v3917_v48 = vpop.f32.mrf.mxu1  ;;  %v7877_v50 = vpop.f32.mrf.mxu0  ;;  %8513 = vrcp.f32 %v3934_v51 }
 0x642   :  { %v3918_v52 = vadd.f32 %v3917_v48, %v3865_v28  ;;  %8515 = vpow2.f32 %v6856_v53  ;;  %v8302_v48 = vld [vmem:[%s9998_s3 + $0x28] sm:$0xff]  }
 0x643   :  { %v7868_v54 = vpop.f32.mrf.mxu1  ;;  %v4132_v55 = vpop.f32.mrf.mxu0 }
 0x644   :  { %v3930_v57 = vadd.f32 %v9404_v38, %v3918_v52  ;;  %v4138_v29 = vadd.f32 %v6830_v23, %v4132_v55  ;;  %v8304_v52 = vld [vmem:[%s9998_s3 + $0x20] sm:$0xff]   ;;  %v8305_v54 = vld [vmem:[%s9997_s2 + $0x18] sm:$0xff]  }
 0x645   :  { %v8510_v58 = vpop.eup %8509  ;;  %v3920_v59 = vpop.f32.mrf.mxu1 }
 0x646   :  { %v7892_v60 = vpop.f32.mrf.mxu0  ;;  %v3940_v61 = vadd.f32 1.0, %v8510_v58  ;;  %v6827_v62 = vmul.f32 -1.442695, %v3930_v57  ;;  %v8306_v57 = vld [vmem:[%s9998_s3 + $0x38] sm:$0xff]   ;;  %v8307_v58 = vld [vmem:[%s9997_s2 + $0x10] sm:$0xff]  }
 0x647   :  { %v7869_v63 = vpop.f32.mrf.mxu1  ;;  %v8308_v59 = vld [vmem:[%s9998_s3 + $0x30] sm:$0xff]   ;;  %v8309_v60 = vld [vmem:[%s9997_s2 + $0x28] sm:$0xff]  }
 0x648   :  { %v4135_v0 = vpop.f32.mrf.mxu0  ;;  %8517 = vrcp.f32 %v3940_v61  ;;  %v8310_v61 = vld [vmem:[%s9996_s1 + $0x8] sm:$0xff]   ;;  %v8312_v63 = vld [vmem:[%s9996_s1] sm:$0xff]  }
 0x649   :  { %8519 = vpow2.f32 %v6827_v62  ;;  %v4075_v2 = vpop.f32.mrf.mxu1  ;;  %v8311_v62 = vld [vmem:[%s9997_s2 + $0x20] sm:$0xff]   ;;  %v8313_v0 = vld [vmem:[%s9997_s2 + $0x38] sm:$0xff]  }
 0x64a   :  { %v7893_v3 = vpop.f32.mrf.mxu0  ;;  %v4081_v4 = vadd.f32 %v6829_v41, %v4075_v2  ;;  %v8314_v2 = vld [vmem:[%s9996_s1 + $0x28] sm:$0xff]  }
 0x64b   :  { %v7884_v38 = vpop.f32.mrf.mxu1  ;;  %v8512_v11 = vpop.eup %8511 }
 0x64c   :  { %v6857_v5 = vmul.f32 -1.442695, %v4081_v4  ;;  %v8315_v4 = vld [vmem:[%s9997_s2 + $0x30] sm:$0xff]   ;;  %v8316_v38 = vld [vmem:[%s9996_s1 + $0x20] sm:$0xff]  }
 0x64d   :  { %v4078_v6 = vpop.f32.mrf.mxu1 }
 0x64e   :  { %8521 = vpow2.f32 %v6857_v5  ;;  %v8514_v13 = vpop.eup %8513  ;;  %v8317_v5 = vld [vmem:[%s9996_s1 + $0x18] sm:$0xff]   ;;  %v8318_v6 = vld [vmem:[%s9996_s1 + $0x10] sm:$0xff]  }
 0x64f   :  { %v7885_v7 = vpop.f32.mrf.mxu1  ;;  %v8516_v16 = vpop.eup %8515  ;;  %v3951_v22 = vmul.f32 %v8514_v13, %v8512_v11  ;;  %v8322_v11 = vld [vmem:[%s9998_s3] sm:$0xff]   ;;  %v8325_v13 = vld [vmem:[%s9997_s2 + $0x8] sm:$0xff]  }
 0x650   :  { %v4199_v28 = vadd.f32 1.0, %v8516_v16  ;;  %v8319_v7 = vld [vmem:[%s9996_s1 + $0x38] sm:$0xff]  }
 0x651   :  { %v4189_v10 = vpop.f32.mrf.mxu1 }
 0x652   :  { %v4195_v15 = vadd.f32 %v6831_v8, %v4189_v10  ;;  %v8320_v8 = vld [vmem:[%s9996_s1 + $0x30] sm:$0xff]   ;;  %v8321_v10 = vld [vmem:[%s9998_s3 + $0x8] sm:$0xff]  }
 0x653   :  { %v7900_v49 = vpop.f32.mrf.mxu1 }
 0x654   :  { %v6858_v25 = vmul.f32 -1.442695, %v4195_v15  ;;  %v8327_v15 = vld [vmem:[%s9997_s2] sm:$0xff]  }
 0x655   :  { %v8518_v17 = vpop.eup %8517  ;;  %v4192_v19 = vpop.f32.mrf.mxu1 }
 0x656   :  { %v8520_v20 = vpop.eup %8519  ;;  %v3950_v21 = vmul.f32 %v8518_v17, %v3442_v18 }
 0x657   :  { %v3947_v24 = vadd.f32 1.0, %v8520_v20  ;;  %v7901_v26 = vpop.f32.mrf.mxu1 }
 0x658   :  { %v3952_v27 = vadd.f32 %v3951_v22, %v3950_v21 }
 0x659   :  { %8523 = vrcp.f32 %v3947_v24 }
 0x65a   :  { %8525 = vtanh.f32 %v3952_v27  ;;  %3956 = vst.msk [vmem:[#allocation3 + $0x2] sm:$0x3] %vm32_vm1, %v3952_v27 }
 0x65b   :  { %v8522_v30 = vpop.eup %8521  ;;  %8527 = vpow2.f32 %v6858_v25 }
 0x65c   :  { %8529 = vrcp.f32 %v4199_v28  ;;  %v4205_v31 = vadd.f32 1.0, %v8522_v30 }
 0x65d   :  { %8531 = vtanh.f32 %v4138_v29 }
 0x65e   :  { %8533 = vrcp.f32 %v4205_v31 }
 0x666   :  { %v8524_v32 = vpop.eup %8523 }
 0x667   :  { %v8526_v33 = vpop.eup %8525 }
 0x668   :  { %v8528_v34 = vpop.eup %8527  ;;  %v3954_v35 = vmul.f32 %v8526_v33, %v8524_v32 }
 0x669   :  { %v8530_v36 = vpop.eup %8529  ;;  %v4212_v42 = vadd.f32 1.0, %v8528_v34 }
 0x66a   :  { %v8532_v37 = vpop.eup %8531  ;;  %3955 = vst.msk [vmem:[#allocation2 + $0x2] sm:$0x3] %vm32_vm1, %v3954_v35 }
 0x66b   :  { %v8534_v39 = vpop.eup %8533  ;;  %v4216_v43 = vmul.f32 %v8532_v37, %v8530_v36  ;;  %8535 = vrcp.f32 %v4212_v42 }
 0x66c   :  { %v4215_v44 = vmul.f32 %v8534_v39, %v3963_v40 }
 0x66e   :  { %v4217_v9 = vadd.f32 %v4216_v43, %v4215_v44 }
 0x670   :  { %8537 = vtanh.f32 %v4217_v9  ;;  %4221 = vst.msk [vmem:[#allocation3] sm:$0x3] %vm32_vm1, %v4217_v9 }
 0x671   :  { %v4222_v45 = vld [vmem:[#allocation2 + $0x2] sm:$0x3] }
 0x672   :  { %v4225_v47 = vpack.c.bf16 %v4222_v45, %v4222_v45 }
 0x674   :  { %7907 = vmatmul.mubr.msk.bf16.vlgmr.msra.gmra.mxu0 %vm60_vm2, %v4225_v47 }
 0x675   :  { %7919 = vmatpush3.bf16.msra.mxu0 %v8299_v46  ;;  %7922 = vmatprep.mubr.msk.bf16.mxu0 %vm8642_vm0, %v8641_v1 }
 0x676   :  { %7920 = vmatprep.subr.bf16.mxu0 %v8641_v1 }
 0x678   :  { %v8536_v50 = vpop.eup %8535 }
 0x679   :  { %7921 = vmatpush3.bf16.msra.mxu0 %v8300_v12  ;;  %v6917_v12 = vld [vmem:[%s9995_s0 + $0x30] sm:$0x3] }
 0x67a   :  { %7934 = vmatprep.subr.bf16.mxu0 %v8641_v1 }
 0x67c   :  { %7923 = vmatmul.mubr.msk.bf16.vlgmr.msra.gmra.mxu0 %vm60_vm2, %v4225_v47 }
 0x67d   :  { %v8538_v51 = vpop.eup %8537  ;;  %7935 = vmatpush3.bf16.msra.mxu0 %v8302_v48  ;;  %7938 = vmatprep.mubr.msk.bf16.mxu0 %vm8642_vm0, %v8641_v1 }
 0x67e   :  { %7936 = vmatprep.subr.bf16.mxu0 %v8641_v1  ;;  %v4219_v53 = vmul.f32 %v8538_v51, %v8536_v50 }
 0x680   :  { %v4224_v55 = vpack.c.bf16 %v4219_v53, %v4219_v53  ;;  %4220 = vst.msk [vmem:[#allocation2] sm:$0x3] %vm32_vm1, %v4219_v53 }
 0x681   :  { %7937 = vmatpush3.bf16.msra.mxu0 %v8304_v52 }
 0x682   :  { %7915 = vmatmul.mubr.msk.bf16.vlgmr.msra.gmra.mxu1 %vm60_vm2, %v4224_v55  ;;  %7950 = vmatprep.subr.bf16.mxu0 %v8641_v1 }
 0x683   :  { %7927 = vmatpush3.bf16.msra.mxu1 %v8305_v54  ;;  %7930 = vmatprep.mubr.msk.bf16.mxu1 %vm8642_vm0, %v8641_v1 }
 0x684   :  { %7939 = vmatmul.mubr.msk.bf16.vlgmr.msra.gmra.mxu0 %vm60_vm2, %v4225_v47  ;;  %7928 = vmatprep.subr.bf16.mxu1 %v8641_v1 }
 0x685   :  { %7951 = vmatpush3.bf16.msra.mxu0 %v8306_v57  ;;  %7954 = vmatprep.mubr.msk.bf16.mxu0 %vm8642_vm0, %v8641_v1 }
 0x686   :  { %7952 = vmatprep.subr.bf16.mxu0 %v8641_v1 }
 0x687   :  { %7929 = vmatpush3.bf16.msra.mxu1 %v8307_v58  ;;  %v4743_v41 = vld [vmem:[#allocation2] sm:$0x3] }
 0x688   :  { %7942 = vmatprep.subr.bf16.mxu1 %v8641_v1  ;;  %v4745_v3 = vpack.c.bf16 %v4743_v41, %v4743_v41 }
 0x689   :  { %7953 = vmatpush3.bf16.msra.mxu0 %v8308_v59  ;;  %v9728_v59 = vld [vmem:[%s9999_s4 + $0x3] ss:$0 sm:$0xff] }
 0x68a   :  { %7931 = vmatmul.mubr.msk.bf16.vlgmr.msra.gmra.mxu1 %vm60_vm2, %v4224_v55  ;;  %7966 = vmatprep.subr.bf16.mxu0 %v8641_v1 }
 0x68b   :  { %7943 = vmatpush3.bf16.msra.mxu1 %v8309_v60  ;;  %7946 = vmatprep.mubr.msk.bf16.mxu1 %vm8642_vm0, %v8641_v1 }
 0x68c   :  { %7955 = vmatmul.mubr.msk.bf16.vlgmr.msra.gmra.mxu0 %vm60_vm2, %v4225_v47  ;;  %7944 = vmatprep.subr.bf16.mxu1 %v8641_v1 }
 0x68d   :  { %7967 = vmatpush3.bf16.msra.mxu0 %v8310_v61  ;;  %7970 = vmatprep.mubr.msk.bf16.mxu0 %vm8642_vm0, %v8641_v1 }
 0x68e   :  { %7968 = vmatprep.subr.bf16.mxu0 %v8641_v1 }
 0x68f   :  { %7945 = vmatpush3.bf16.msra.mxu1 %v8311_v62 }
 0x690   :  { %7958 = vmatprep.subr.bf16.mxu1 %v8641_v1 }
 0x691   :  { %7969 = vmatpush3.bf16.msra.mxu0 %v8312_v63 }
 0x692   :  { %7947 = vmatmul.mubr.msk.bf16.vlgmr.msra.gmra.mxu1 %vm60_vm2, %v4224_v55  ;;  %7982 = vmatprep.subr.bf16.mxu0 %v8641_v1 }
 0x693   :  { %7959 = vmatpush3.bf16.msra.mxu1 %v8313_v0  ;;  %7962 = vmatprep.mubr.msk.bf16.mxu1 %vm8642_vm0, %v8641_v1 }
 0x694   :  { %7971 = vmatmul.mubr.msk.bf16.vlgmr.msra.gmra.mxu0 %vm60_vm2, %v4745_v3  ;;  %7960 = vmatprep.subr.bf16.mxu1 %v8641_v1 }
 0x695   :  { %7983 = vmatpush3.bf16.msra.mxu0 %v8314_v2  ;;  %7986 = vmatprep.mubr.msk.bf16.mxu0 %vm8642_vm0, %v8641_v1 }
 0x696   :  { %7984 = vmatprep.subr.bf16.mxu0 %v8641_v1 }
 0x697   :  { %7961 = vmatpush3.bf16.msra.mxu1 %v8315_v4 }
 0x698   :  { %7974 = vmatprep.subr.bf16.mxu1 %v8641_v1 }
 0x699   :  { %7985 = vmatpush3.bf16.msra.mxu0 %v8316_v38 }
 0x69a   :  { %7963 = vmatmul.mubr.msk.bf16.vlgmr.msra.gmra.mxu1 %vm60_vm2, %v4224_v55  ;;  %7998 = vmatprep.subr.bf16.mxu0 %v8641_v1 }
 0x69b   :  { %7975 = vmatpush3.bf16.msra.mxu1 %v8317_v5  ;;  %7978 = vmatprep.mubr.msk.bf16.mxu1 %vm8642_vm0, %v8641_v1 }
 0x69c   :  { %7987 = vmatmul.mubr.msk.bf16.vlgmr.msra.gmra.mxu0 %vm60_vm2, %v4745_v3  ;;  %7976 = vmatprep.subr.bf16.mxu1 %v8641_v1 }
 0x69d   :  { %8002 = vmatprep.mubr.msk.bf16.mxu0 %vm8642_vm0, %v8641_v1  ;;  %7999 = vmatpush3.bf16.msra.mxu0 %v8321_v10  ;;  %v6918_v10 = vld [vmem:[%s9995_s0 + $0x32] sm:$0x3] }
 0x69e   :  { %8000 = vmatprep.subr.bf16.mxu0 %v8641_v1 }
 0x69f   :  { %7977 = vmatpush3.bf16.msra.mxu1 %v8318_v6 }
 0x6a0   :  { %7990 = vmatprep.subr.bf16.mxu1 %v8641_v1 }
 0x6a1   :  { %8001 = vmatpush3.bf16.msra.mxu0 %v8322_v11 }
 0x6a2   :  { %7979 = vmatmul.mubr.msk.bf16.vlgmr.msra.gmra.mxu1 %vm60_vm2, %v4745_v3  ;;  %8014 = vmatprep.subr.bf16.mxu0 %v8641_v1 }
 0x6a3   :  { %7991 = vmatpush3.bf16.msra.mxu1 %v8319_v7  ;;  %7994 = vmatprep.mubr.msk.bf16.mxu1 %vm8642_vm0, %v8641_v1 }
 0x6a4   :  { %7992 = vmatprep.subr.bf16.mxu1 %v8641_v1 }
 0x6a7   :  { %7993 = vmatpush3.bf16.msra.mxu1 %v8320_v8 }
 0x6a8   :  { %8006 = vmatprep.subr.bf16.mxu1 %v8641_v1 }
 0x6aa   :  { %7995 = vmatmul.mubr.msk.bf16.vlgmr.msra.gmra.mxu1 %vm60_vm2, %v4745_v3 }
 0x6ab   :  { %8010 = vmatprep.mubr.msk.bf16.mxu1 %vm8642_vm0, %v8641_v1  ;;  %8007 = vmatpush3.bf16.msra.mxu1 %v8325_v13 }
 0x6ac   :  { %8008 = vmatprep.subr.bf16.mxu1 %v8641_v1 }
 0x6af   :  { %8009 = vmatpush3.bf16.msra.mxu1 %v8327_v15 }
 0x6b0   :  { %8022 = vmatprep.subr.bf16.mxu1 %v8641_v1 }
 0x734   :  { %v4283_v49 = vpop.f32.mrf.mxu0 }
 0x736   :  { %v7908_v16 = vpop.f32.mrf.mxu0 }
 0x738   :  { %v4286_v17 = vpop.f32.mrf.mxu0 }
 0x73a   :  { %v7909_v18 = vpop.f32.mrf.mxu0 }
 0x73c   :  { %v4406_v19 = vpop.f32.mrf.mxu0 }
 0x73e   :  { %v7924_v20 = vpop.f32.mrf.mxu0 }
 0x740   :  { %v4409_v21 = vpop.f32.mrf.mxu0 }
 0x742   :  { %v4338_v22 = vpop.f32.mrf.mxu1  ;;  %v7925_v23 = vpop.f32.mrf.mxu0 }
 0x743   :  { %v4339_v24 = vadd.f32 %v4338_v22, %v4283_v49 }
 0x744   :  { %v7916_v25 = vpop.f32.mrf.mxu1  ;;  %v4526_v26 = vpop.f32.mrf.mxu0 }
 0x745   :  { %v4351_v27 = vadd.f32 %v9555_v14, %v4339_v24 }
 0x746   :  { %v4341_v28 = vpop.f32.mrf.mxu1  ;;  %v7940_v29 = vpop.f32.mrf.mxu0 }
 0x747   :  { %v6914_v30 = vmul.f32 -1.442695, %v4351_v27  ;;  %v4223_v27 = vld [vmem:[#allocation3 + $0x2] sm:$0x3] }
 0x748   :  { %v7917_v31 = vpop.f32.mrf.mxu1  ;;  %v4529_v32 = vpop.f32.mrf.mxu0 }
 0x749   :  { %8539 = vpow2.f32 %v6914_v30  ;;  %v6919_v32 = vld [vmem:[%s9995_s0 + $0x34] sm:$0x3] }
 0x74a   :  { %v4458_v33 = vpop.f32.mrf.mxu1  ;;  %v7941_v34 = vpop.f32.mrf.mxu0 }
 0x74b   :  { %v4459_v35 = vadd.f32 %v4458_v33, %v4406_v19  ;;  %v6920_v19 = vld [vmem:[%s9995_s0 + $0x36] sm:$0x3] }
 0x74c   :  { %v7932_v36 = vpop.f32.mrf.mxu1  ;;  %v4646_v37 = vpop.f32.mrf.mxu0 }
 0x74d   :  { %v4471_v39 = vadd.f32 %v9561_v56, %v4459_v35  ;;  %v9722_v56 = vld [vmem:[%s9999_s4 + $0x2] ss:$0 sm:$0xff] }
 0x74e   :  { %v4461_v40 = vpop.f32.mrf.mxu1  ;;  %v7956_v42 = vpop.f32.mrf.mxu0 }
 0x74f   :  { %v6915_v43 = vmul.f32 -1.442695, %v4471_v39 }
 0x750   :  { %v7933_v44 = vpop.f32.mrf.mxu1  ;;  %v4649_v9 = vpop.f32.mrf.mxu0 }
 0x751   :  { %8541 = vpow2.f32 %v6915_v43 }
 0x752   :  { %v4578_v14 = vpop.f32.mrf.mxu1  ;;  %v7957_v45 = vpop.f32.mrf.mxu0 }
 0x753   :  { %v4579_v48 = vadd.f32 %v4578_v14, %v4526_v26 }
 0x754   :  { %v7948_v46 = vpop.f32.mrf.mxu1  ;;  %v4799_v47 = vpop.f32.mrf.mxu0 }
 0x755   :  { %v4805_v53 = vadd.f32 %v6917_v12, %v4799_v47  ;;  %v4591_v57 = vadd.f32 %v9722_v56, %v4579_v48  ;;  %v4744_v12 = vld [vmem:[#allocation3] sm:$0x3] }
 0x756   :  { %v4581_v50 = vpop.f32.mrf.mxu1  ;;  %v7972_v51 = vpop.f32.mrf.mxu0 }
 0x757   :  { %v8540_v52 = vpop.eup %8539  ;;  %v6945_v63 = vmul.f32 -1.442695, %v4805_v53  ;;  %8543 = vtanh.f32 %v4591_v57  ;;  %v8324_v57 = vld [vmem:[%s9998_s3 + $0x10] sm:$0xff]  }
 0x758   :  { %v7949_v54 = vpop.f32.mrf.mxu1  ;;  %v4802_v55 = vpop.f32.mrf.mxu0  ;;  %v4715_v61 = vadd.f32 1.0, %v8540_v52 }
 0x759   :  { %v8323_v54 = vld [vmem:[%s9998_s3 + $0x18] sm:$0xff]  }
 0x75a   :  { %v4698_v58 = vpop.f32.mrf.mxu1  ;;  %v7973_v60 = vpop.f32.mrf.mxu0  ;;  %8545 = vrcp.f32 %v4715_v61 }
 0x75b   :  { %v4699_v62 = vadd.f32 %v4698_v58, %v4646_v37  ;;  %8547 = vpow2.f32 %v6945_v63  ;;  %v8326_v58 = vld [vmem:[%s9998_s3 + $0x28] sm:$0xff]  }
 0x75c   :  { %v7964_v0 = vpop.f32.mrf.mxu1  ;;  %v4913_v41 = vpop.f32.mrf.mxu0 }
 0x75d   :  { %v4711_v2 = vadd.f32 %v9728_v59, %v4699_v62  ;;  %v4919_v39 = vadd.f32 %v6919_v32, %v4913_v41  ;;  %v8328_v62 = vld [vmem:[%s9998_s3 + $0x20] sm:$0xff]   ;;  %v8329_v0 = vld [vmem:[%s9997_s2 + $0x18] sm:$0xff]  }
 0x75e   :  { %v8542_v3 = vpop.eup %8541  ;;  %v4701_v4 = vpop.f32.mrf.mxu1  ;;  %v9879_v32 = vld [vmem:[%s9999_s4] ss:$0 sm:$0xff] }
 0x75f   :  { %v7988_v38 = vpop.f32.mrf.mxu0  ;;  %v4721_v5 = vadd.f32 1.0, %v8542_v3  ;;  %v6916_v6 = vmul.f32 -1.442695, %v4711_v2  ;;  %v8330_v2 = vld [vmem:[%s9998_s3 + $0x38] sm:$0xff]   ;;  %v8331_v3 = vld [vmem:[%s9997_s2 + $0x10] sm:$0xff]  }
 0x760   :  { %v7965_v7 = vpop.f32.mrf.mxu1  ;;  %v8332_v4 = vld [vmem:[%s9998_s3 + $0x30] sm:$0xff]   ;;  %v8333_v38 = vld [vmem:[%s9997_s2 + $0x28] sm:$0xff]  }
 0x761   :  { %v4916_v8 = vpop.f32.mrf.mxu0  ;;  %8549 = vrcp.f32 %v4721_v5  ;;  %v8334_v5 = vld [vmem:[%s9996_s1 + $0x8] sm:$0xff]   ;;  %v8336_v7 = vld [vmem:[%s9996_s1] sm:$0xff]  }
 0x762   :  { %8551 = vpow2.f32 %v6916_v6  ;;  %v4856_v11 = vpop.f32.mrf.mxu1  ;;  %v8335_v6 = vld [vmem:[%s9997_s2 + $0x20] sm:$0xff]   ;;  %v8337_v8 = vld [vmem:[%s9997_s2 + $0x38] sm:$0xff]  }
 0x763   :  { %v7989_v13 = vpop.f32.mrf.mxu0  ;;  %v4862_v15 = vadd.f32 %v6918_v10, %v4856_v11  ;;  %v8338_v11 = vld [vmem:[%s9996_s1 + $0x28] sm:$0xff]  }
 0x764   :  { %v7980_v49 = vpop.f32.mrf.mxu1  ;;  %v8544_v21 = vpop.eup %8543 }
 0x765   :  { %v6946_v16 = vmul.f32 -1.442695, %v4862_v15  ;;  %v8339_v15 = vld [vmem:[%s9997_s2 + $0x30] sm:$0xff]   ;;  %v8340_v49 = vld [vmem:[%s9996_s1 + $0x20] sm:$0xff]  }
 0x766   :  { %v4859_v17 = vpop.f32.mrf.mxu1 }
 0x767   :  { %8553 = vpow2.f32 %v6946_v16  ;;  %v8546_v22 = vpop.eup %8545  ;;  %v8341_v16 = vld [vmem:[%s9996_s1 + $0x18] sm:$0xff]   ;;  %v8342_v17 = vld [vmem:[%s9996_s1 + $0x10] sm:$0xff]  }
 0x768   :  { %v7981_v18 = vpop.f32.mrf.mxu1  ;;  %v8548_v25 = vpop.eup %8547  ;;  %v4732_v31 = vmul.f32 %v8546_v22, %v8544_v21  ;;  %v8346_v21 = vld [vmem:[%s9998_s3] sm:$0xff]   ;;  %v8349_v22 = vld [vmem:[%s9997_s2 + $0x8] sm:$0xff]  }
 0x769   :  { %v4980_v37 = vadd.f32 1.0, %v8548_v25  ;;  %v8343_v18 = vld [vmem:[%s9996_s1 + $0x38] sm:$0xff]  }
 0x76a   :  { %v4970_v20 = vpop.f32.mrf.mxu1 }
 0x76b   :  { %v4976_v23 = vadd.f32 %v6920_v19, %v4970_v20  ;;  %v8344_v19 = vld [vmem:[%s9996_s1 + $0x30] sm:$0xff]   ;;  %v8345_v20 = vld [vmem:[%s9998_s3 + $0x8] sm:$0xff]  }
 0x76c   :  { %v7996_v24 = vpop.f32.mrf.mxu1 }
 0x76d   :  { %v6947_v34 = vmul.f32 -1.442695, %v4976_v23  ;;  %v8351_v23 = vld [vmem:[%s9997_s2] sm:$0xff]  }
 0x76e   :  { %v8550_v26 = vpop.eup %8549  ;;  %v4973_v28 = vpop.f32.mrf.mxu1 }
 0x76f   :  { %v8552_v29 = vpop.eup %8551  ;;  %v4731_v30 = vmul.f32 %v8550_v26, %v4223_v27 }
 0x770   :  { %v4728_v33 = vadd.f32 1.0, %v8552_v29  ;;  %v7997_v35 = vpop.f32.mrf.mxu1 }
 0x771   :  { %v4733_v36 = vadd.f32 %v4732_v31, %v4731_v30 }
 0x772   :  { %8555 = vrcp.f32 %v4728_v33 }
 0x773   :  { %8557 = vtanh.f32 %v4733_v36  ;;  %4737 = vst.msk [vmem:[#allocation3 + $0x2] sm:$0x3] %vm32_vm1, %v4733_v36 }
 0x774   :  { %v8554_v40 = vpop.eup %8553  ;;  %8559 = vpow2.f32 %v6947_v34 }
 0x775   :  { %8561 = vrcp.f32 %v4980_v37  ;;  %v4986_v42 = vadd.f32 1.0, %v8554_v40 }
 0x776   :  { %8563 = vtanh.f32 %v4919_v39 }
 0x777   :  { %8565 = vrcp.f32 %v4986_v42 }
 0x77f   :  { %v8556_v43 = vpop.eup %8555 }
 0x780   :  { %v8558_v44 = vpop.eup %8557 }
 0x781   :  { %v8560_v9 = vpop.eup %8559  ;;  %v4735_v14 = vmul.f32 %v8558_v44, %v8556_v43 }
 0x782   :  { %v8562_v45 = vpop.eup %8561  ;;  %v4993_v48 = vadd.f32 1.0, %v8560_v9 }
 0x783   :  { %v8564_v46 = vpop.eup %8563  ;;  %4736 = vst.msk [vmem:[#allocation2 + $0x2] sm:$0x3] %vm32_vm1, %v4735_v14  ;;  %v9885_v14 = vld [vmem:[%s9999_s4 + $0x1] ss:$0 sm:$0xff] }
 0x784   :  { %v8566_v47 = vpop.eup %8565  ;;  %v4997_v50 = vmul.f32 %v8564_v46, %v8562_v45  ;;  %8567 = vrcp.f32 %v4993_v48 }
 0x785   :  { %v4996_v51 = vmul.f32 %v8566_v47, %v4744_v12 }
 0x787   :  { %v4998_v52 = vadd.f32 %v4997_v50, %v4996_v51 }
 0x789   :  { %8569 = vtanh.f32 %v4998_v52  ;;  %5002 = vst.msk [vmem:[#allocation3] sm:$0x3] %vm32_vm1, %v4998_v52 }
 0x78a   :  { %v5003_v53 = vld [vmem:[#allocation2 + $0x2] sm:$0x3] }
 0x78b   :  { %v5006_v55 = vpack.c.bf16 %v5003_v53, %v5003_v53 }
 0x78d   :  { %8003 = vmatmul.mubr.msk.bf16.vlgmr.msra.gmra.mxu0 %vm60_vm2, %v5006_v55 }
 0x78e   :  { %8015 = vmatpush3.bf16.msra.mxu0 %v8323_v54  ;;  %8018 = vmatprep.mubr.msk.bf16.mxu0 %vm8642_vm0, %v8641_v1 }
 0x78f   :  { %8016 = vmatprep.subr.bf16.mxu0 %v8641_v1 }
 0x791   :  { %v8568_v60 = vpop.eup %8567 }
 0x792   :  { %8017 = vmatpush3.bf16.msra.mxu0 %v8324_v57 }
 0x793   :  { %8030 = vmatprep.subr.bf16.mxu0 %v8641_v1 }
 0x795   :  { %8019 = vmatmul.mubr.msk.bf16.vlgmr.msra.gmra.mxu0 %vm60_vm2, %v5006_v55 }
 0x796   :  { %v8570_v61 = vpop.eup %8569  ;;  %8031 = vmatpush3.bf16.msra.mxu0 %v8326_v58  ;;  %8034 = vmatprep.mubr.msk.bf16.mxu0 %vm8642_vm0, %v8641_v1 }
 0x797   :  { %8032 = vmatprep.subr.bf16.mxu0 %v8641_v1  ;;  %v5000_v63 = vmul.f32 %v8570_v61, %v8568_v60  ;;  %v7006_v61 = vld [vmem:[%s9995_s0 + $0x38] sm:$0x3] }
 0x799   :  { %v5005_v41 = vpack.c.bf16 %v5000_v63, %v5000_v63  ;;  %5001 = vst.msk [vmem:[#allocation2] sm:$0x3] %vm32_vm1, %v5000_v63 }
 0x79a   :  { %8033 = vmatpush3.bf16.msra.mxu0 %v8328_v62 }
 0x79b   :  { %8011 = vmatmul.mubr.msk.bf16.vlgmr.msra.gmra.mxu1 %vm60_vm2, %v5005_v41  ;;  %8046 = vmatprep.subr.bf16.mxu0 %v8641_v1 }
 0x79c   :  { %8023 = vmatpush3.bf16.msra.mxu1 %v8329_v0  ;;  %8026 = vmatprep.mubr.msk.bf16.mxu1 %vm8642_vm0, %v8641_v1 }
 0x79d   :  { %8035 = vmatmul.mubr.msk.bf16.vlgmr.msra.gmra.mxu0 %vm60_vm2, %v5006_v55  ;;  %8024 = vmatprep.subr.bf16.mxu1 %v8641_v1 }
 0x79e   :  { %8047 = vmatpush3.bf16.msra.mxu0 %v8330_v2  ;;  %8050 = vmatprep.mubr.msk.bf16.mxu0 %vm8642_vm0, %v8641_v1 }
 0x79f   :  { %8048 = vmatprep.subr.bf16.mxu0 %v8641_v1 }
 0x7a0   :  { %8025 = vmatpush3.bf16.msra.mxu1 %v8331_v3  ;;  %v5524_v10 = vld [vmem:[#allocation2] sm:$0x3] }
 0x7a1   :  { %8038 = vmatprep.subr.bf16.mxu1 %v8641_v1  ;;  %v5526_v13 = vpack.c.bf16 %v5524_v10, %v5524_v10 }
 0x7a2   :  { %8049 = vmatpush3.bf16.msra.mxu0 %v8332_v4 }
 0x7a3   :  { %8027 = vmatmul.mubr.msk.bf16.vlgmr.msra.gmra.mxu1 %vm60_vm2, %v5005_v41  ;;  %8062 = vmatprep.subr.bf16.mxu0 %v8641_v1 }
 0x7a4   :  { %8039 = vmatpush3.bf16.msra.mxu1 %v8333_v38  ;;  %8042 = vmatprep.mubr.msk.bf16.mxu1 %vm8642_vm0, %v8641_v1 }
 0x7a5   :  { %8051 = vmatmul.mubr.msk.bf16.vlgmr.msra.gmra.mxu0 %vm60_vm2, %v5006_v55  ;;  %8040 = vmatprep.subr.bf16.mxu1 %v8641_v1 }
 0x7a6   :  { %8063 = vmatpush3.bf16.msra.mxu0 %v8334_v5  ;;  %8066 = vmatprep.mubr.msk.bf16.mxu0 %vm8642_vm0, %v8641_v1 }
 0x7a7   :  { %8064 = vmatprep.subr.bf16.mxu0 %v8641_v1 }
 0x7a8   :  { %8041 = vmatpush3.bf16.msra.mxu1 %v8335_v6 }
 0x7a9   :  { %8054 = vmatprep.subr.bf16.mxu1 %v8641_v1 }
 0x7aa   :  { %8065 = vmatpush3.bf16.msra.mxu0 %v8336_v7 }
 0x7ab   :  { %8043 = vmatmul.mubr.msk.bf16.vlgmr.msra.gmra.mxu1 %vm60_vm2, %v5005_v41  ;;  %8078 = vmatprep.subr.bf16.mxu0 %v8641_v1 }
 0x7ac   :  { %8055 = vmatpush3.bf16.msra.mxu1 %v8337_v8  ;;  %8058 = vmatprep.mubr.msk.bf16.mxu1 %vm8642_vm0, %v8641_v1 }
 0x7ad   :  { %8067 = vmatmul.mubr.msk.bf16.vlgmr.msra.gmra.mxu0 %vm60_vm2, %v5526_v13  ;;  %8056 = vmatprep.subr.bf16.mxu1 %v8641_v1 }
 0x7ae   :  { %8079 = vmatpush3.bf16.msra.mxu0 %v8338_v11  ;;  %8082 = vmatprep.mubr.msk.bf16.mxu0 %vm8642_vm0, %v8641_v1 }
 0x7af   :  { %8080 = vmatprep.subr.bf16.mxu0 %v8641_v1 }
 0x7b0   :  { %8057 = vmatpush3.bf16.msra.mxu1 %v8339_v15 }
 0x7b1   :  { %8070 = vmatprep.subr.bf16.mxu1 %v8641_v1 }
 0x7b2   :  { %8081 = vmatpush3.bf16.msra.mxu0 %v8340_v49 }
 0x7b3   :  { %8059 = vmatmul.mubr.msk.bf16.vlgmr.msra.gmra.mxu1 %vm60_vm2, %v5005_v41  ;;  %8094 = vmatprep.subr.bf16.mxu0 %v8641_v1 }
 0x7b4   :  { %8071 = vmatpush3.bf16.msra.mxu1 %v8341_v16  ;;  %8074 = vmatprep.mubr.msk.bf16.mxu1 %vm8642_vm0, %v8641_v1 }
 0x7b5   :  { %8083 = vmatmul.mubr.msk.bf16.vlgmr.msra.gmra.mxu0 %vm60_vm2, %v5526_v13  ;;  %8072 = vmatprep.subr.bf16.mxu1 %v8641_v1 }
 0x7b6   :  { %8098 = vmatprep.mubr.msk.bf16.mxu0 %vm8642_vm0, %v8641_v1  ;;  %8095 = vmatpush3.bf16.msra.mxu0 %v8345_v20 }
 0x7b7   :  { %8096 = vmatprep.subr.bf16.mxu0 %v8641_v1 }
 0x7b8   :  { %8073 = vmatpush3.bf16.msra.mxu1 %v8342_v17 }
 0x7b9   :  { %8086 = vmatprep.subr.bf16.mxu1 %v8641_v1 }
 0x7ba   :  { %8097 = vmatpush3.bf16.msra.mxu0 %v8346_v21 }
 0x7bb   :  { %8075 = vmatmul.mubr.msk.bf16.vlgmr.msra.gmra.mxu1 %vm60_vm2, %v5526_v13  ;;  %8110 = vmatprep.subr.bf16.mxu0 %v8641_v1 }
 0x7bc   :  { %8087 = vmatpush3.bf16.msra.mxu1 %v8343_v18  ;;  %8090 = vmatprep.mubr.msk.bf16.mxu1 %vm8642_vm0, %v8641_v1 }
 0x7bd   :  { %8088 = vmatprep.subr.bf16.mxu1 %v8641_v1 }
 0x7c0   :  { %8089 = vmatpush3.bf16.msra.mxu1 %v8344_v19 }
 0x7c1   :  { %8102 = vmatprep.subr.bf16.mxu1 %v8641_v1 }
 0x7c3   :  { %8091 = vmatmul.mubr.msk.bf16.vlgmr.msra.gmra.mxu1 %vm60_vm2, %v5526_v13 }
 0x7c4   :  { %8106 = vmatprep.mubr.msk.bf16.mxu1 %vm8642_vm0, %v8641_v1  ;;  %8103 = vmatpush3.bf16.msra.mxu1 %v8349_v22  ;;  %v7007_v22 = vld [vmem:[%s9995_s0 + $0x3a] sm:$0x3] }
 0x7c5   :  { %8104 = vmatprep.subr.bf16.mxu1 %v8641_v1 }
 0x7c8   :  { %8105 = vmatpush3.bf16.msra.mxu1 %v8351_v23 }
 0x7c9   :  { %8118 = vmatprep.subr.bf16.mxu1 %v8641_v1 }
 0x84d   :  { %v5064_v24 = vpop.f32.mrf.mxu0 }
 0x84f   :  { %v8004_v25 = vpop.f32.mrf.mxu0 }
 0x851   :  { %v5067_v26 = vpop.f32.mrf.mxu0 }
 0x853   :  { %v8005_v27 = vpop.f32.mrf.mxu0 }
 0x855   :  { %v5187_v28 = vpop.f32.mrf.mxu0 }
 0x857   :  { %v8020_v29 = vpop.f32.mrf.mxu0 }
 0x859   :  { %v5190_v30 = vpop.f32.mrf.mxu0 }
 0x85a   :  { %v7009_v30 = vld [vmem:[%s9995_s0 + $0x3e] sm:$0x3] }
 0x85b   :  { %v5119_v31 = vpop.f32.mrf.mxu1  ;;  %v8021_v33 = vpop.f32.mrf.mxu0 }
 0x85c   :  { %v5120_v34 = vadd.f32 %v5119_v31, %v5064_v24 }
 0x85d   :  { %v8012_v35 = vpop.f32.mrf.mxu1  ;;  %v5307_v36 = vpop.f32.mrf.mxu0 }
 0x85e   :  { %v5132_v37 = vadd.f32 %v9879_v32, %v5120_v34 }
 0x85f   :  { %v5122_v39 = vpop.f32.mrf.mxu1  ;;  %v8036_v40 = vpop.f32.mrf.mxu0 }
 0x860   :  { %v7003_v42 = vmul.f32 -1.442695, %v5132_v37  ;;  %v5004_v40 = vld [vmem:[#allocation3 + $0x2] sm:$0x3] }
 0x861   :  { %v8013_v43 = vpop.f32.mrf.mxu1  ;;  %v5310_v44 = vpop.f32.mrf.mxu0 }
 0x862   :  { %8571 = vpow2.f32 %v7003_v42 }
 0x863   :  { %v5239_v9 = vpop.f32.mrf.mxu1  ;;  %v8037_v45 = vpop.f32.mrf.mxu0 }
 0x864   :  { %v5240_v46 = vadd.f32 %v5239_v9, %v5187_v28  ;;  %v7008_v45 = vld [vmem:[%s9995_s0 + $0x3c] sm:$0x3] }
 0x865   :  { %v8028_v47 = vpop.f32.mrf.mxu1  ;;  %v5427_v12 = vpop.f32.mrf.mxu0 }
 0x866   :  { %v5252_v48 = vadd.f32 %v9885_v14, %v5240_v46 }
 0x867   :  { %v5242_v50 = vpop.f32.mrf.mxu1  ;;  %v8052_v51 = vpop.f32.mrf.mxu0 }
 0x868   :  { %v7004_v52 = vmul.f32 -1.442695, %v5252_v48 }
 0x869   :  { %v8029_v53 = vpop.f32.mrf.mxu1  ;;  %v5430_v54 = vpop.f32.mrf.mxu0 }
 0x86a   :  { %8573 = vpow2.f32 %v7004_v52 }
 0x86b   :  { %v5359_v55 = vpop.f32.mrf.mxu1  ;;  %v8053_v57 = vpop.f32.mrf.mxu0 }
 0x86c   :  { %v5360_v62 = vadd.f32 %v5359_v55, %v5307_v36 }
 0x86d   :  { %v8044_v58 = vpop.f32.mrf.mxu1  ;;  %v5580_v60 = vpop.f32.mrf.mxu0 }
 0x86e   :  { %v5586_v2 = vadd.f32 %v7006_v61, %v5580_v60  ;;  %v5372_v38 = vadd.f32 %v9722_v56, %v5360_v62 }
 0x86f   :  { %v5362_v63 = vpop.f32.mrf.mxu1  ;;  %v8068_v0 = vpop.f32.mrf.mxu0 }
 0x870   :  { %v8572_v41 = vpop.eup %8571  ;;  %v7034_v10 = vmul.f32 -1.442695, %v5586_v2  ;;  %8575 = vtanh.f32 %v5372_v38  ;;  %v5525_v63 = vld [vmem:[#allocation3] sm:$0x3]  ;;  %v8347_v38 = vld [vmem:[%s9998_s3 + $0x18] sm:$0xff]  }
 0x871   :  { %v8045_v3 = vpop.f32.mrf.mxu1  ;;  %v5583_v4 = vpop.f32.mrf.mxu0  ;;  %v5496_v7 = vadd.f32 1.0, %v8572_v41 }
 0x873   :  { %v5479_v5 = vpop.f32.mrf.mxu1  ;;  %v8069_v6 = vpop.f32.mrf.mxu0  ;;  %8577 = vrcp.f32 %v5496_v7  ;;  %v8350_v7 = vld [vmem:[%s9998_s3 + $0x28] sm:$0xff]  }
 0x874   :  { %v5480_v8 = vadd.f32 %v5479_v5, %v5427_v12  ;;  %8579 = vpow2.f32 %v7034_v10  ;;  %v8348_v6 = vld [vmem:[%s9998_s3 + $0x10] sm:$0xff]  }
 0x875   :  { %v8060_v11 = vpop.f32.mrf.mxu1  ;;  %v5694_v13 = vpop.f32.mrf.mxu0 }
 0x876   :  { %v5492_v15 = vadd.f32 %v9728_v59, %v5480_v8  ;;  %v5700_v51 = vadd.f32 %v7008_v45, %v5694_v13  ;;  %v8352_v11 = vld [vmem:[%s9998_s3 + $0x20] sm:$0xff]  }
 0x877   :  { %v8574_v49 = vpop.eup %8573  ;;  %v5482_v16 = vpop.f32.mrf.mxu1 }
 0x878   :  { %v8084_v17 = vpop.f32.mrf.mxu0  ;;  %v5502_v18 = vadd.f32 1.0, %v8574_v49  ;;  %v7005_v19 = vmul.f32 -1.442695, %v5492_v15  ;;  %v8353_v15 = vld [vmem:[%s9997_s2 + $0x18] sm:$0xff]  }
 0x879   :  { %v8061_v20 = vpop.f32.mrf.mxu1  ;;  %v8354_v16 = vld [vmem:[%s9998_s3 + $0x38] sm:$0xff]   ;;  %v8355_v17 = vld [vmem:[%s9997_s2 + $0x10] sm:$0xff]  }
 0x87a   :  { %v5697_v21 = vpop.f32.mrf.mxu0  ;;  %8581 = vrcp.f32 %v5502_v18  ;;  %v8356_v18 = vld [vmem:[%s9998_s3 + $0x30] sm:$0xff]   ;;  %v8358_v20 = vld [vmem:[%s9997_s2 + $0x20] sm:$0xff]  }
 0x87b   :  { %8583 = vpow2.f32 %v7005_v19  ;;  %v5637_v23 = vpop.f32.mrf.mxu1  ;;  %v8357_v19 = vld [vmem:[%s9997_s2 + $0x28] sm:$0xff]   ;;  %v8359_v21 = vld [vmem:[%s9997_s2 + $0x38] sm:$0xff]  }
 0x87c   :  { %v8085_v24 = vpop.f32.mrf.mxu0  ;;  %v5643_v25 = vadd.f32 %v7007_v22, %v5637_v23  ;;  %v8360_v22 = vld [vmem:[%s9997_s2 + $0x30] sm:$0xff]   ;;  %v8361_v23 = vld [vmem:[%s10000_s5 + $0x8] sm:$0xff]  }
 0x87d   :  { %v8076_v26 = vpop.f32.mrf.mxu1  ;;  %v8576_v33 = vpop.eup %8575  ;;  %v8362_v24 = vld [vmem:[%s10000_s5] sm:$0xff]  }
 0x87e   :  { %v7035_v27 = vmul.f32 -1.442695, %v5643_v25 }
 0x87f   :  { %v5640_v28 = vpop.f32.mrf.mxu1 }
 0x880   :  { %8585 = vpow2.f32 %v7035_v27  ;;  %v8578_v34 = vpop.eup %8577 }
 0x881   :  { %v8077_v29 = vpop.f32.mrf.mxu1  ;;  %v8580_v37 = vpop.eup %8579  ;;  %v5513_v9 = vmul.f32 %v8578_v34, %v8576_v33 }
 0x882   :  { %v5761_v50 = vadd.f32 1.0, %v8580_v37 }
 0x883   :  { %v5751_v31 = vpop.f32.mrf.mxu1 }
 0x884   :  { %v5757_v35 = vadd.f32 %v7009_v30, %v5751_v31 }
 0x885   :  { %v8092_v36 = vpop.f32.mrf.mxu1 }
 0x886   :  { %v7036_v47 = vmul.f32 -1.442695, %v5757_v35 }
 0x887   :  { %v8582_v39 = vpop.eup %8581  ;;  %v5754_v42 = vpop.f32.mrf.mxu1 }
 0x888   :  { %v8584_v43 = vpop.eup %8583  ;;  %v5512_v44 = vmul.f32 %v8582_v39, %v5004_v40 }
 0x889   :  { %v5509_v46 = vadd.f32 1.0, %v8584_v43  ;;  %v8093_v12 = vpop.f32.mrf.mxu1 }
 0x88a   :  { %v5514_v48 = vadd.f32 %v5513_v9, %v5512_v44 }
 0x88b   :  { %8587 = vrcp.f32 %v5509_v46 }
 0x88c   :  { %8589 = vtanh.f32 %v5514_v48  ;;  %5518 = vst.msk [vmem:[#allocation3 + $0x2] sm:$0x3] %vm32_vm1, %v5514_v48 }
 0x88d   :  { %v8586_v52 = vpop.eup %8585  ;;  %8591 = vpow2.f32 %v7036_v47 }
 0x88e   :  { %8593 = vrcp.f32 %v5761_v50  ;;  %v5767_v53 = vadd.f32 1.0, %v8586_v52 }
 0x88f   :  { %8595 = vtanh.f32 %v5700_v51 }
 0x890   :  { %8597 = vrcp.f32 %v5767_v53 }
 0x898   :  { %v8588_v54 = vpop.eup %8587 }
 0x899   :  { %v8590_v55 = vpop.eup %8589 }
 0x89a   :  { %v8592_v57 = vpop.eup %8591  ;;  %v5516_v58 = vmul.f32 %v8590_v55, %v8588_v54 }
 0x89b   :  { %v8594_v60 = vpop.eup %8593  ;;  %v5774_v0 = vadd.f32 1.0, %v8592_v57 }
 0x89c   :  { %v8596_v61 = vpop.eup %8595  ;;  %5517 = vst.msk [vmem:[#allocation2 + $0x2] sm:$0x3] %vm32_vm1, %v5516_v58 }
 0x89d   :  { %v8598_v62 = vpop.eup %8597  ;;  %v5778_v41 = vmul.f32 %v8596_v61, %v8594_v60  ;;  %8599 = vrcp.f32 %v5774_v0 }
 0x89e   :  { %v5777_v2 = vmul.f32 %v8598_v62, %v5525_v63 }
 0x8a0   :  { %v5779_v3 = vadd.f32 %v5778_v41, %v5777_v2 }
 0x8a2   :  { %8601 = vtanh.f32 %v5779_v3  ;;  %5783 = vst.msk [vmem:[#allocation3] sm:$0x3] %vm32_vm1, %v5779_v3 }
 0x8a3   :  { %v5784_v4 = vld [vmem:[#allocation2 + $0x2] sm:$0x3] }
 0x8a4   :  { %v5787_v5 = vpack.c.bf16 %v5784_v4, %v5784_v4 }
 0x8a6   :  { %8099 = vmatmul.mubr.msk.bf16.vlgmr.msra.gmra.mxu0 %vm60_vm2, %v5787_v5 }
 0x8a7   :  { %8111 = vmatpush3.bf16.msra.mxu0 %v8347_v38  ;;  %8114 = vmatprep.mubr.msk.bf16.mxu0 %vm8642_vm0, %v8641_v1 }
 0x8a8   :  { %8112 = vmatprep.subr.bf16.mxu0 %v8641_v1 }
 0x8aa   :  { %v8600_v8 = vpop.eup %8599 }
 0x8ab   :  { %8113 = vmatpush3.bf16.msra.mxu0 %v8348_v6 }
 0x8ac   :  { %8126 = vmatprep.subr.bf16.mxu0 %v8641_v1 }
 0x8ae   :  { %8115 = vmatmul.mubr.msk.bf16.vlgmr.msra.gmra.mxu0 %vm60_vm2, %v5787_v5 }
 0x8af   :  { %v8602_v10 = vpop.eup %8601  ;;  %8127 = vmatpush3.bf16.msra.mxu0 %v8350_v7  ;;  %8130 = vmatprep.mubr.msk.bf16.mxu0 %vm8642_vm0, %v8641_v1 }
 0x8b0   :  { %8128 = vmatprep.subr.bf16.mxu0 %v8641_v1  ;;  %v5781_v13 = vmul.f32 %v8602_v10, %v8600_v8 }
 0x8b2   :  { %5782 = vst.msk [vmem:[#allocation2] sm:$0x3] %vm32_vm1, %v5781_v13  ;;  %v5786_v49 = vpack.c.bf16 %v5781_v13, %v5781_v13  ;;  %v5785_v13 = vld [vmem:[#allocation3 + $0x2] sm:$0x3] }
 0x8b3   :  { %8129 = vmatpush3.bf16.msra.mxu0 %v8352_v11 }
 0x8b4   :  { %8107 = vmatmul.mubr.msk.bf16.vlgmr.msra.gmra.mxu1 %vm60_vm2, %v5786_v49  ;;  %8142 = vmatprep.subr.bf16.mxu0 %v8641_v1 }
 0x8b5   :  { %8119 = vmatpush3.bf16.msra.mxu1 %v8353_v15  ;;  %8122 = vmatprep.mubr.msk.bf16.mxu1 %vm8642_vm0, %v8641_v1 }
 0x8b6   :  { %8131 = vmatmul.mubr.msk.bf16.vlgmr.msra.gmra.mxu0 %vm60_vm2, %v5787_v5  ;;  %8120 = vmatprep.subr.bf16.mxu1 %v8641_v1 }
 0x8b7   :  { %8143 = vmatpush3.bf16.msra.mxu0 %v8354_v16  ;;  %8146 = vmatprep.mubr.msk.bf16.mxu0 %vm8642_vm0, %v8641_v1 }
 0x8b8   :  { %8144 = vmatprep.subr.bf16.mxu0 %v8641_v1 }
 0x8b9   :  { %8121 = vmatpush3.bf16.msra.mxu1 %v8355_v17 }
 0x8ba   :  { %8134 = vmatprep.subr.bf16.mxu1 %v8641_v1 }
 0x8bb   :  { %8145 = vmatpush3.bf16.msra.mxu0 %v8356_v18 }
 0x8bc   :  { %8123 = vmatmul.mubr.msk.bf16.vlgmr.msra.gmra.mxu1 %vm60_vm2, %v5786_v49  ;;  %8158 = vmatprep.subr.bf16.mxu0 %v8641_v1 }
 0x8bd   :  { %8135 = vmatpush3.bf16.msra.mxu1 %v8357_v19  ;;  %8138 = vmatprep.mubr.msk.bf16.mxu1 %vm8642_vm0, %v8641_v1 }
 0x8be   :  { %8147 = vmatmul.mubr.msk.bf16.vlgmr.msra.gmra.mxu0 %vm60_vm2, %v5787_v5  ;;  %8136 = vmatprep.subr.bf16.mxu1 %v8641_v1 }
 0x8bf   :  { %8162 = vmatprep.mubr.msk.bf16.mxu0 %vm8642_vm0, %v8641_v1  ;;  %8159 = vmatpush3.bf16.msra.mxu0 %v8361_v23 }
 0x8c0   :  { %8160 = vmatprep.subr.bf16.mxu0 %v8641_v1 }
 0x8c1   :  { %8137 = vmatpush3.bf16.msra.mxu1 %v8358_v20 }
 0x8c2   :  { %8150 = vmatprep.subr.bf16.mxu1 %v8641_v1 }
 0x8c3   :  { %8161 = vmatpush3.bf16.msra.mxu0 %v8362_v24 }
 0x8c4   :  { %8139 = vmatmul.mubr.msk.bf16.vlgmr.msra.gmra.mxu1 %vm60_vm2, %v5786_v49 }
 0x8c5   :  { %8151 = vmatpush3.bf16.msra.mxu1 %v8359_v21  ;;  %8154 = vmatprep.mubr.msk.bf16.mxu1 %vm8642_vm0, %v8641_v1 }
 0x8c6   :  { %8152 = vmatprep.subr.bf16.mxu1 %v8641_v1 }
 0x8c9   :  { %8153 = vmatpush3.bf16.msra.mxu1 %v8360_v22  ;;  %v7095_v22 = vld [vmem:[%s10001_s6] ss:$0 sm:$0xff] }
 0x8cc   :  { %8155 = vmatmul.mubr.msk.bf16.vlgmr.msra.gmra.mxu1 %vm60_vm2, %v5786_v49 }
 0x966   :  { %v5845_v25 = vpop.f32.mrf.mxu0 }
 0x968   :  { %v8100_v26 = vpop.f32.mrf.mxu0 }
 0x96a   :  { %v5848_v27 = vpop.f32.mrf.mxu0 }
 0x96c   :  { %v8101_v28 = vpop.f32.mrf.mxu0 }
 0x96e   :  { %v5968_v29 = vpop.f32.mrf.mxu0 }
 0x970   :  { %v8116_v30 = vpop.f32.mrf.mxu0 }
 0x972   :  { %v5971_v31 = vpop.f32.mrf.mxu0 }
 0x974   :  { %v5900_v33 = vpop.f32.mrf.mxu1  ;;  %v8117_v34 = vpop.f32.mrf.mxu0 }
 0x975   :  { %v5901_v35 = vadd.f32 %v5900_v33, %v5845_v25 }
 0x976   :  { %v8108_v36 = vpop.f32.mrf.mxu1  ;;  %v6088_v37 = vpop.f32.mrf.mxu0 }
 0x977   :  { %v5913_v39 = vadd.f32 %v9879_v32, %v5901_v35 }
 0x978   :  { %v5903_v40 = vpop.f32.mrf.mxu1  ;;  %v8132_v42 = vpop.f32.mrf.mxu0 }
 0x979   :  { %v7092_v43 = vmul.f32 -1.442695, %v5913_v39 }
 0x97a   :  { %v8109_v44 = vpop.f32.mrf.mxu1  ;;  %v6091_v1 = vpop.f32.mrf.mxu0 }
 0x97b   :  { %8603 = vpow2.f32 %v7092_v43 }
 0x97c   :  { %v6020_v9 = vpop.f32.mrf.mxu1  ;;  %v8133_v45 = vpop.f32.mrf.mxu0 }
 0x97d   :  { %v6021_v46 = vadd.f32 %v6020_v9, %v5968_v29 }
 0x97e   :  { %v8124_v47 = vpop.f32.mrf.mxu1  ;;  %v6208_v12 = vpop.f32.mrf.mxu0 }
 0x97f   :  { %v6033_v48 = vadd.f32 %v9885_v14, %v6021_v46 }
 0x980   :  { %v6023_v50 = vpop.f32.mrf.mxu1  ;;  %v8148_v51 = vpop.f32.mrf.mxu0 }
 0x981   :  { %v7093_v52 = vmul.f32 -1.442695, %v6033_v48 }
 0x982   :  { %v8125_v53 = vpop.f32.mrf.mxu1  ;;  %v6211_v54 = vpop.f32.mrf.mxu0 }
 0x983   :  { %8605 = vpow2.f32 %v7093_v52 }
 0x984   :  { %v6140_v32 = vpop.f32.mrf.mxu1  ;;  %v8149_v55 = vpop.f32.mrf.mxu0 }
 0x985   :  { %v6141_v61 = vadd.f32 %v6140_v32, %v6088_v37 }
 0x986   :  { %v8140_v57 = vpop.f32.mrf.mxu1 }
 0x987   :  { %v6153_v2 = vadd.f32 %v9722_v56, %v6141_v61 }
 0x988   :  { %v6143_v58 = vpop.f32.mrf.mxu1  ;;  %v8604_v60 = vpop.eup %8603 }
 0x989   :  { %v6277_v0 = vadd.f32 1.0, %v8604_v60 }
 0x98a   :  { %v8141_v62 = vpop.f32.mrf.mxu1 }
 0x98b   :  { %8607 = vrcp.f32 %v6277_v0 }
 0x98c   :  { %v6260_v63 = vpop.f32.mrf.mxu1  ;;  %8609 = vtanh.f32 %v6153_v2 }
 0x98d   :  { %v6261_v41 = vadd.f32 %v6260_v63, %v6208_v12 }
 0x98e   :  { %v8156_v3 = vpop.f32.mrf.mxu1 }
 0x98f   :  { %v6273_v14 = vadd.f32 %v9728_v59, %v6261_v41 }
 0x990   :  { %v8606_v4 = vpop.eup %8605  ;;  %v6263_v38 = vpop.f32.mrf.mxu1 }
 0x991   :  { %v6283_v5 = vadd.f32 1.0, %v8606_v4  ;;  %v7094_v6 = vmul.f32 -1.442695, %v6273_v14 }
 0x992   :  { %v8157_v7 = vpop.f32.mrf.mxu1 }
 0x993   :  { %8611 = vrcp.f32 %v6283_v5 }
 0x994   :  { %8613 = vpow2.f32 %v7094_v6 }
 0x998   :  { %v8608_v8 = vpop.eup %8607 }
 0x999   :  { %v8610_v10 = vpop.eup %8609 }
 0x99a   :  { %v6294_v16 = vmul.f32 %v8610_v10, %v8608_v8 }
 0x9a0   :  { %v8612_v11 = vpop.eup %8611 }
 0x9a1   :  { %v8614_v15 = vpop.eup %8613  ;;  %v6293_v49 = vmul.f32 %v8612_v11, %v5785_v13 }
 0x9a2   :  { %v6290_v56 = vadd.f32 1.0, %v8614_v15 }
 0x9a3   :  { %v6295_v17 = vadd.f32 %v6294_v16, %v6293_v49 }
 0x9a4   :  { %8615 = vrcp.f32 %v6290_v56 }
 0x9a5   :  { %8617 = vtanh.f32 %v6295_v17  ;;  %6299 = vst.msk [vmem:[#allocation3 + $0x2] sm:$0x3] %vm32_vm1, %v6295_v17 }
 0x9b1   :  { %v8616_v59 = vpop.eup %8615 }
 0x9b2   :  { %v8618_v18 = vpop.eup %8617 }
 0x9b3   :  { %v6297_v19 = vmul.f32 %v8618_v18, %v8616_v59 }
 0x9b5   :  { %6298 = vst.msk [vmem:[#allocation2 + $0x2] sm:$0x3] %vm32_vm1, %v6297_v19 }
 0x9bc   :  { %v6303_v20 = vld [vmem:[#allocation2 + $0x2] sm:$0x3] }
 0x9bd   :  { %v6304_v21 = vpack.c.bf16 %v6303_v20, %v6303_v20 }
 0x9bf   :  { %8163 = vmatmul.mubr.msk.bf16.vlgmr.msra.gmra.mxu0 %vm60_vm2, %v6304_v21 }
 0xa7f   :  { %v6365_v23 = vpop.f32.mrf.mxu0 }
 0xa80   :  { %v6366_v24 = vadd.f32 %v7095_v22, %v6365_v23 }
 0xa81   :  { %v8164_v25 = vpop.f32.mrf.mxu0 }
 0xa82   :  { %6372 = vst.msk [vmem:[#allocation4] sm:$0x3] %vm6371_vm3, %v6366_v24 }
 0xa83   :  { %v6368_v26 = vpop.f32.mrf.mxu0 }
 0xa84   :  { %8630 = shalt.err (!%p8627_p4)
}
 0xa85   :  { %6382 = dma.vmem_to_hbm [thread:$0]  %s6380_s15, 32, %s10002_s7, [#allocation5]   ;;  %v8165_v27 = vpop.f32.mrf.mxu0 }
 0xa86   :  { %8639 = dma.done.wait [#allocation5], 32  }
 0xa87   :  { %8640 = vsyncadd [#allocation5], 4294967264 }
 0xa88   :  { %6386 = vsyncpa [#allocation5], 1 }

</bundles_post_ra>
